<compile_context>
chip_gen: v6e
topology: v6e:2x2x1
jax: 0.10.0
libtpu: 0.0.40
codegen_flags: <defaults>
</compile_context>

<pallas_src>
import functools
import math

import numpy as np
import jax
import jax.numpy as jnp
from jax import lax
from jax.experimental import pallas as pl
from jax.experimental.pallas import tpu as pltpu

PAD_TOKEN = 0
VOCAB_SIZE = 8008

LAYER_PARAM_NAMES = [
    "wq1", "bq1", "wk1", "bk1", "wv1", "bv1", "wo1", "bo1", "g1", "be1",
    "wq2", "bq2", "wk2", "bk2", "wv2", "bv2", "wo2", "bo2", "g2", "be2",
    "wf1", "bf1", "wf2", "bf2", "g3", "be3",
]


# ---------------------------------------------------------------------------
# in-kernel helpers (traced inside the Pallas body)
# ---------------------------------------------------------------------------
def _gelu(x):
    # tanh-approx GELU (EUP handles tanh; the slot is otherwise idle here)
    return 0.5 * x * (1.0 + jnp.tanh(math.sqrt(2.0 / math.pi) * (x + 0.044715 * x ** 3)))


def _layer_norm(x, gamma, beta, eps):
    mean = jnp.mean(x, axis=-1, keepdims=True)
    var = jnp.mean((x - mean) ** 2, axis=-1, keepdims=True)
    return (x - mean) * lax.rsqrt(var + eps) * gamma + beta


def _split_heads(x2d, batch, seq, num_heads, head_dim):
    """(batch*seq, num_heads*head_dim) -> (batch*num_heads, seq, head_dim)."""
    x3 = x2d.reshape(batch, seq, num_heads * head_dim)
    heads = [x3[:, :, h * head_dim:(h + 1) * head_dim] for h in range(num_heads)]
    x4 = jnp.stack(heads, axis=1)                       # (B, nh, S, d)
    return x4.reshape(batch * num_heads, seq, head_dim)  # leading-dim merge only


def _merge_heads(ctx, batch, seq, num_heads, head_dim):
    """(batch*num_heads, seq, head_dim) -> (batch*seq, num_heads*head_dim)."""
    c4 = ctx.reshape(batch, num_heads, seq, head_dim)
    merged = jnp.concatenate([c4[:, h] for h in range(num_heads)], axis=-1)  # (B, S, nh*d)
    return merged.reshape(batch * seq, num_heads * head_dim)


def _mha(xq2d, xkv2d, batch, sq, sk, wq, bq, wk, bk, wv, bv, wo, bo, num_heads, head_dim):
    """Multi-head attention, batch folded into M, heads batched in the einsums.

    xq2d: (B*Sq, H), xkv2d: (B*Sk, H). Returns (out (B*Sq, H), probs (B*nh, Sq, Sk)).
    """
    Q = jnp.dot(xq2d, wq, preferred_element_type=jnp.float32) + bq
    K = jnp.dot(xkv2d, wk, preferred_element_type=jnp.float32) + bk
    V = jnp.dot(xkv2d, wv, preferred_element_type=jnp.float32) + bv

    Qh = _split_heads(Q, batch, sq, num_heads, head_dim)   # (B*nh, Sq, d)
    Kh = _split_heads(K, batch, sk, num_heads, head_dim)   # (B*nh, Sk, d)
    Vh = _split_heads(V, batch, sk, num_heads, head_dim)   # (B*nh, Sk, d)

    scale = 1.0 / math.sqrt(head_dim)
    scores = jnp.einsum("nqd,nkd->nqk", Qh, Kh,
                        preferred_element_type=jnp.float32) * scale
    # NOTE: PyTorch's masked_fill result is discarded -> no masking here (faithful).
    m = jnp.max(scores, axis=-1, keepdims=True)
    e = jnp.exp(scores - m)
    p = e / jnp.sum(e, axis=-1, keepdims=True)             # (B*nh, Sq, Sk), f32

    ctx = jnp.einsum("nqk,nkd->nqd", p, Vh, preferred_element_type=jnp.float32)
    attn = _merge_heads(ctx, batch, sq, num_heads, head_dim)  # (B*Sq, nh*d)
    out = jnp.dot(attn, wo, preferred_element_type=jnp.float32) + bo
    return out, p


# ---------------------------------------------------------------------------
# fused decoder-STACK kernel: grid over layers, activations VMEM-resident
# ---------------------------------------------------------------------------
def decoder_stack_kernel(x0_ref, enc_ref, *refs, num_heads, head_dim, eps):
    nw = len(LAYER_PARAM_NAMES)
    w = {name: refs[i] for i, name in enumerate(LAYER_PARAM_NAMES)}
    out_ref, sp_ref, cp_ref = refs[nw:]

    B, S, H = out_ref.shape
    Se = enc_ref.shape[1]

    layer = pl.program_id(0)

    # out_ref is the cross-layer carry (constant output block index -> stays in VMEM).
    @pl.when(layer == 0)
    def _():
        out_ref[...] = x0_ref[...]

    x = out_ref[...]                       # (B, S, H) layer input
    xf = x.reshape(B * S, H)               # batch folded into M
    encf = enc_ref[...].reshape(B * Se, H)

    def W(name):
        return w[name][0]                  # drop the leading layer-block axis

    # ---- self attention + residual + LN1 ----
    sa, sa_probs = _mha(
        xf, xf, B, S, S,
        W("wq1"), W("bq1"), W("wk1"), W("bk1"), W("wv1"), W("bv1"),
        W("wo1"), W("bo1"), num_heads, head_dim,
    )
    ln1 = _layer_norm(sa + xf, W("g1"), W("be1"), eps)

    # ---- dec-enc attention (query is the layer INPUT x, as in the PyTorch code) ----
    ca, ca_probs = _mha(
        xf, encf, B, S, Se,
        W("wq2"), W("bq2"), W("wk2"), W("bk2"), W("wv2"), W("bv2"),
        W("wo2"), W("bo2"), num_heads, head_dim,
    )
    ln2 = _layer_norm(ca + ln1, W("g2"), W("be2"), eps)

    # ---- feed forward (dropout == identity) + residual + LN3 ----
    ff = jnp.dot(ln2, W("wf1"), preferred_element_type=jnp.float32) + W("bf1")
    ff = _gelu(ff)
    ff = jnp.dot(ff, W("wf2"), preferred_element_type=jnp.float32) + W("bf2")
    out = _layer_norm(ff + ln2, W("g3"), W("be3"), eps)

    out_ref[...] = out.reshape(B, S, H)
    # single contiguous stores for the attention probabilities (no per-head loop)
    sp_ref[0] = sa_probs.astype(sp_ref.dtype)
    cp_ref[0] = ca_probs.astype(cp_ref.dtype)


def decoder_stack(x0, enc_out, stacked_params, *, num_heads, head_dim, eps):
    B, S, H = x0.shape
    _, Se, _ = enc_out.shape
    L = stacked_params[LAYER_PARAM_NAMES[0]].shape[0]

    weights = [stacked_params[name] for name in LAYER_PARAM_NAMES]

    in_specs = [
        pl.BlockSpec((B, S, H), lambda l: (0, 0, 0)),    # x0: only consumed at layer 0
        pl.BlockSpec((B, Se, H), lambda l: (0, 0, 0)),   # encoder outputs (resident)
    ]
    for wname in LAYER_PARAM_NAMES:
        r, c = stacked_params[wname].shape[1:]
        # per-layer weight block; layer l+1's block is prefetched while layer l computes
        in_specs.append(pl.BlockSpec((1, r, c), lambda l: (l, 0, 0)))

    out_shapes = (
        jax.ShapeDtypeStruct((B, S, H), jnp.float32),
        jax.ShapeDtypeStruct((L, B * num_heads, S, S), jnp.float32),
        jax.ShapeDtypeStruct((L, B * num_heads, S, Se), jnp.float32),
    )
    out_specs = (
        pl.BlockSpec((B, S, H), lambda l: (0, 0, 0)),    # constant index -> VMEM carry
        pl.BlockSpec((1, B * num_heads, S, S), lambda l: (l, 0, 0, 0)),
        pl.BlockSpec((1, B * num_heads, S, Se), lambda l: (l, 0, 0, 0)),
    )

    kernel = functools.partial(
        decoder_stack_kernel, num_heads=num_heads, head_dim=head_dim, eps=eps
    )
    return pl.pallas_call(
        kernel,
        out_shape=out_shapes,
        grid=(L,),
        in_specs=in_specs,
        out_specs=out_specs,
        compiler_params=pltpu.CompilerParams(
            # layers are sequential (activation carry) -> "arbitrary"
            dimension_semantics=("arbitrary",),
        ),
    )(x0, enc_out, *weights)


# ---------------------------------------------------------------------------
# parameter construction (deterministic, mirrors nn.Module __init__ shapes)
# ---------------------------------------------------------------------------
def get_sinusoid_encoding_table(sequence_length, hidden_dim):
    pos = np.arange(sequence_length, dtype=np.float64)[:, None]
    i = np.arange(hidden_dim, dtype=np.float64)[None, :]
    angle = pos / np.power(10000.0, 2.0 * (i // 2) / hidden_dim)
    table = np.zeros((sequence_length, hidden_dim), dtype=np.float32)
    table[:, 0::2] = np.sin(angle[:, 0::2])
    table[:, 1::2] = np.cos(angle[:, 1::2])
    return table


def init_layer_params(key, hidden_dim, num_heads, head_dim, ff_dim):
    proj = num_heads * head_dim
    keys = jax.random.split(key, 10)

    def lin(k, din, dout):
        w = jax.random.normal(k, (din, dout), jnp.float32) * (1.0 / math.sqrt(din))
        b = jnp.zeros((1, dout), jnp.float32)
        return w, b

    p = {}
    p["wq1"], p["bq1"] = lin(keys[0], hidden_dim, proj)
    p["wk1"], p["bk1"] = lin(keys[1], hidden_dim, proj)
    p["wv1"], p["bv1"] = lin(keys[2], hidden_dim, proj)
    p["wo1"], p["bo1"] = lin(keys[3], proj, hidden_dim)
    p["g1"], p["be1"] = jnp.ones((1, hidden_dim), jnp.float32), jnp.zeros((1, hidden_dim), jnp.float32)
    p["wq2"], p["bq2"] = lin(keys[4], hidden_dim, proj)
    p["wk2"], p["bk2"] = lin(keys[5], hidden_dim, proj)
    p["wv2"], p["bv2"] = lin(keys[6], hidden_dim, proj)
    p["wo2"], p["bo2"] = lin(keys[7], proj, hidden_dim)
    p["g2"], p["be2"] = jnp.ones((1, hidden_dim), jnp.float32), jnp.zeros((1, hidden_dim), jnp.float32)
    p["wf1"], p["bf1"] = lin(keys[8], hidden_dim, ff_dim)
    p["wf2"], p["bf2"] = lin(keys[9], ff_dim, hidden_dim)
    p["g3"], p["be3"] = jnp.ones((1, hidden_dim), jnp.float32), jnp.zeros((1, hidden_dim), jnp.float32)
    return p


def init_decoder_params(key, sequence_length, num_layers, hidden_dim, num_heads, head_dim, ff_dim):
    keys = jax.random.split(key, num_layers + 1)
    return {
        "embedding": jax.random.normal(keys[0], (VOCAB_SIZE, hidden_dim), jnp.float32),
        "pos_table": jnp.asarray(get_sinusoid_encoding_table(sequence_length + 1, hidden_dim)),
        "layers": [
            init_layer_params(keys[l + 1], hidden_dim, num_heads, head_dim, ff_dim)
            for l in range(num_layers)
        ],
    }


# ---------------------------------------------------------------------------
# full Decoder forward (embedding/gather glue in plain JAX, stack in one Pallas call)
# ---------------------------------------------------------------------------
def decoder_forward(dec_inputs, enc_inputs, enc_outputs, params, *, num_heads, head_dim, eps):
    B, S = dec_inputs.shape
    position = jnp.broadcast_to(jnp.arange(S, dtype=dec_inputs.dtype), (B, S)) + 1
    x = params["embedding"][dec_inputs] + params["pos_table"][position]
    x = x.astype(jnp.float32)

    # Pad / causal attention masks are built by the PyTorch module but have NO effect
    # on the forward pass (masked_fill is not in-place); they are omitted here.
    num_layers = len(params["layers"])
    stacked = {
        name: jnp.stack([lp[name] for lp in params["layers"]], axis=0)
        for name in LAYER_PARAM_NAMES
    }

    out, sp, cp = decoder_stack(
        x, enc_outputs.astype(jnp.float32), stacked,
        num_heads=num_heads, head_dim=head_dim, eps=eps,
    )

    Se = enc_outputs.shape[1]
    sp = sp.reshape(num_layers, B, num_heads, S, S)
    cp = cp.reshape(num_layers, B, num_heads, S, Se)
    self_attention_probs = [sp[l] for l in range(num_layers)]
    dec_enc_attention_probs = [cp[l] for l in range(num_layers)]
    return out, self_attention_probs, dec_enc_attention_probs


# ---------------------------------------------------------------------------
if __name__ == "__main__":
    # small shapes consistent with the module
    batch = 2
    seq_len = 8          # decoder sequence length
    enc_seq_len = 8      # encoder sequence length
    num_layers = 2
    hidden_dim = 32
    num_heads = 4
    head_dim = 8         # num_heads * head_dim == hidden_dim (required by .view in PyTorch)
    feed_forward_dim = 64
    layer_norm_eps = 1e-6

    key = jax.random.PRNGKey(0)
    k_par, k_dec, k_enc_in, k_enc_out = jax.random.split(key, 4)

    params = init_decoder_params(
        k_par, seq_len, num_layers, hidden_dim, num_heads, head_dim, feed_forward_dim
    )

    dec_inputs = jax.random.randint(k_dec, (batch, seq_len), 0, VOCAB_SIZE, dtype=jnp.int32)
    enc_inputs = jax.random.randint(k_enc_in, (batch, enc_seq_len), 0, VOCAB_SIZE, dtype=jnp.int32)
    enc_outputs = jax.random.normal(k_enc_out, (batch, enc_seq_len, hidden_dim), jnp.float32)

    outputs, self_probs, dec_enc_probs = decoder_forward(
        dec_inputs, enc_inputs, enc_outputs, params,
        num_heads=num_heads, head_dim=head_dim, eps=layer_norm_eps,
    )
    jax.block_until_ready(outputs)

    assert outputs.shape == (batch, seq_len, hidden_dim)
    assert len(self_probs) == num_layers and len(dec_enc_probs) == num_layers
    assert self_probs[0].shape == (batch, num_heads, seq_len, seq_len)
    assert dec_enc_probs[0].shape == (batch, num_heads, seq_len, enc_seq_len)
    assert bool(jnp.all(jnp.isfinite(outputs)))
    print("KERNEL_OK")
</pallas_src>

<mosaic_0001>
module attributes {stable_mosaic.version = 11 : i64} {
  func.func @decoder_stack_kernel(%arg0: i32, %arg1: memref<2x8x32xf32, #tpu.memory_space<vmem>>, %arg2: memref<2x8x32xf32, #tpu.memory_space<vmem>>, %arg3: memref<1x32x32xf32, #tpu.memory_space<vmem>>, %arg4: memref<1x1x32xf32, #tpu.memory_space<vmem>>, %arg5: memref<1x32x32xf32, #tpu.memory_space<vmem>>, %arg6: memref<1x1x32xf32, #tpu.memory_space<vmem>>, %arg7: memref<1x32x32xf32, #tpu.memory_space<vmem>>, %arg8: memref<1x1x32xf32, #tpu.memory_space<vmem>>, %arg9: memref<1x32x32xf32, #tpu.memory_space<vmem>>, %arg10: memref<1x1x32xf32, #tpu.memory_space<vmem>>, %arg11: memref<1x1x32xf32, #tpu.memory_space<vmem>>, %arg12: memref<1x1x32xf32, #tpu.memory_space<vmem>>, %arg13: memref<1x32x32xf32, #tpu.memory_space<vmem>>, %arg14: memref<1x1x32xf32, #tpu.memory_space<vmem>>, %arg15: memref<1x32x32xf32, #tpu.memory_space<vmem>>, %arg16: memref<1x1x32xf32, #tpu.memory_space<vmem>>, %arg17: memref<1x32x32xf32, #tpu.memory_space<vmem>>, %arg18: memref<1x1x32xf32, #tpu.memory_space<vmem>>, %arg19: memref<1x32x32xf32, #tpu.memory_space<vmem>>, %arg20: memref<1x1x32xf32, #tpu.memory_space<vmem>>, %arg21: memref<1x1x32xf32, #tpu.memory_space<vmem>>, %arg22: memref<1x1x32xf32, #tpu.memory_space<vmem>>, %arg23: memref<1x32x64xf32, #tpu.memory_space<vmem>>, %arg24: memref<1x1x64xf32, #tpu.memory_space<vmem>>, %arg25: memref<1x64x32xf32, #tpu.memory_space<vmem>>, %arg26: memref<1x1x32xf32, #tpu.memory_space<vmem>>, %arg27: memref<1x1x32xf32, #tpu.memory_space<vmem>>, %arg28: memref<1x1x32xf32, #tpu.memory_space<vmem>>, %arg29: memref<2x8x32xf32, #tpu.memory_space<vmem>>, %arg30: memref<1x8x8x8xf32, #tpu.memory_space<vmem>>, %arg31: memref<1x8x8x8xf32, #tpu.memory_space<vmem>>) attributes {dimension_semantics = [#tpu.dimension_semantics<arbitrary>], iteration_bounds = array<i64: 2>, scalar_prefetch = 0 : i64, scratch_operands = 0 : i64, tpu.core_type = #tpu.core_type<tc>, window_params = [{pipeline_mode = #tpu.pipeline_mode<synchronous>, transform_indices = @transform_0, window_bounds = array<i64: 2, 8, 32>}, {pipeline_mode = #tpu.pipeline_mode<synchronous>, transform_indices = @transform_1, window_bounds = array<i64: 2, 8, 32>}, {transform_indices = @transform_2, window_bounds = array<i64: 1, 32, 32>}, {transform_indices = @transform_3, window_bounds = array<i64: 1, 1, 32>}, {transform_indices = @transform_4, window_bounds = array<i64: 1, 32, 32>}, {transform_indices = @transform_5, window_bounds = array<i64: 1, 1, 32>}, {transform_indices = @transform_6, window_bounds = array<i64: 1, 32, 32>}, {transform_indices = @transform_7, window_bounds = array<i64: 1, 1, 32>}, {transform_indices = @transform_8, window_bounds = array<i64: 1, 32, 32>}, {transform_indices = @transform_9, window_bounds = array<i64: 1, 1, 32>}, {transform_indices = @transform_10, window_bounds = array<i64: 1, 1, 32>}, {transform_indices = @transform_11, window_bounds = array<i64: 1, 1, 32>}, {transform_indices = @transform_12, window_bounds = array<i64: 1, 32, 32>}, {transform_indices = @transform_13, window_bounds = array<i64: 1, 1, 32>}, {transform_indices = @transform_14, window_bounds = array<i64: 1, 32, 32>}, {transform_indices = @transform_15, window_bounds = array<i64: 1, 1, 32>}, {transform_indices = @transform_16, window_bounds = array<i64: 1, 32, 32>}, {transform_indices = @transform_17, window_bounds = array<i64: 1, 1, 32>}, {transform_indices = @transform_18, window_bounds = array<i64: 1, 32, 32>}, {transform_indices = @transform_19, window_bounds = array<i64: 1, 1, 32>}, {transform_indices = @transform_20, window_bounds = array<i64: 1, 1, 32>}, {transform_indices = @transform_21, window_bounds = array<i64: 1, 1, 32>}, {transform_indices = @transform_22, window_bounds = array<i64: 1, 32, 64>}, {transform_indices = @transform_23, window_bounds = array<i64: 1, 1, 64>}, {transform_indices = @transform_24, window_bounds = array<i64: 1, 64, 32>}, {transform_indices = @transform_25, window_bounds = array<i64: 1, 1, 32>}, {transform_indices = @transform_26, window_bounds = array<i64: 1, 1, 32>}, {transform_indices = @transform_27, window_bounds = array<i64: 1, 1, 32>}, {pipeline_mode = #tpu.pipeline_mode<synchronous>, transform_indices = @transform_28, window_bounds = array<i64: 2, 8, 32>}, {transform_indices = @transform_29, window_bounds = array<i64: 1, 8, 8, 8>}, {transform_indices = @transform_30, window_bounds = array<i64: 1, 8, 8, 8>}]} {
    %c0_i32 = arith.constant 0 : i32
    %0 = arith.cmpi eq, %arg0, %c0_i32 : i32
    %1 = arith.extui %0 : i1 to i32
    %c0_i32_0 = arith.constant 0 : i32
    %2 = arith.cmpi ne, %1, %c0_i32_0 : i32
    scf.if %2 {
      %c0_133 = arith.constant 0 : index
      %c0_134 = arith.constant 0 : index
      %c0_135 = arith.constant 0 : index
      %293 = vector.load %arg1[%c0_133, %c0_134, %c0_135] : memref<2x8x32xf32, #tpu.memory_space<vmem>>, vector<2x8x32xf32>
      %c0_136 = arith.constant 0 : index
      %c0_137 = arith.constant 0 : index
      %c0_138 = arith.constant 0 : index
      %294 = vector.load %arg29[%c0_136, %c0_137, %c0_138] : memref<2x8x32xf32, #tpu.memory_space<vmem>>, vector<2x8x32xf32>
      tpu.vector_store %arg29[%c0_136, %c0_137, %c0_138], %293 {strides = array<i32>} : memref<2x8x32xf32, #tpu.memory_space<vmem>>, vector<2x8x32xf32>,
    } else {
    }
    %c0 = arith.constant 0 : index
    %c0_1 = arith.constant 0 : index
    %c0_2 = arith.constant 0 : index
    %3 = vector.load %arg29[%c0, %c0_1, %c0_2] : memref<2x8x32xf32, #tpu.memory_space<vmem>>, vector<2x8x32xf32>
    %4 = vector.shape_cast %3 : vector<2x8x32xf32> to vector<16x32xf32>
    %c0_3 = arith.constant 0 : index
    %c0_4 = arith.constant 0 : index
    %c0_5 = arith.constant 0 : index
    %5 = vector.load %arg2[%c0_3, %c0_4, %c0_5] : memref<2x8x32xf32, #tpu.memory_space<vmem>>, vector<2x8x32xf32>
    %6 = vector.shape_cast %5 : vector<2x8x32xf32> to vector<16x32xf32>
    %c0_6 = arith.constant 0 : index
    %c0_7 = arith.constant 0 : index
    %c0_8 = arith.constant 0 : index
    %7 = vector.load %arg3[%c0_6, %c0_7, %c0_8] : memref<1x32x32xf32, #tpu.memory_space<vmem>>, vector<1x32x32xf32>
    %8 = vector.shape_cast %7 : vector<1x32x32xf32> to vector<32x32xf32>
    %c0_9 = arith.constant 0 : index
    %c0_10 = arith.constant 0 : index
    %c0_11 = arith.constant 0 : index
    %9 = vector.load %arg4[%c0_9, %c0_10, %c0_11] : memref<1x1x32xf32, #tpu.memory_space<vmem>>, vector<1x1x32xf32>
    %10 = vector.shape_cast %9 : vector<1x1x32xf32> to vector<1x32xf32>
    %c0_12 = arith.constant 0 : index
    %c0_13 = arith.constant 0 : index
    %c0_14 = arith.constant 0 : index
    %11 = vector.load %arg5[%c0_12, %c0_13, %c0_14] : memref<1x32x32xf32, #tpu.memory_space<vmem>>, vector<1x32x32xf32>
    %12 = vector.shape_cast %11 : vector<1x32x32xf32> to vector<32x32xf32>
    %c0_15 = arith.constant 0 : index
    %c0_16 = arith.constant 0 : index
    %c0_17 = arith.constant 0 : index
    %13 = vector.load %arg6[%c0_15, %c0_16, %c0_17] : memref<1x1x32xf32, #tpu.memory_space<vmem>>, vector<1x1x32xf32>
    %14 = vector.shape_cast %13 : vector<1x1x32xf32> to vector<1x32xf32>
    %c0_18 = arith.constant 0 : index
    %c0_19 = arith.constant 0 : index
    %c0_20 = arith.constant 0 : index
    %15 = vector.load %arg7[%c0_18, %c0_19, %c0_20] : memref<1x32x32xf32, #tpu.memory_space<vmem>>, vector<1x32x32xf32>
    %16 = vector.shape_cast %15 : vector<1x32x32xf32> to vector<32x32xf32>
    %c0_21 = arith.constant 0 : index
    %c0_22 = arith.constant 0 : index
    %c0_23 = arith.constant 0 : index
    %17 = vector.load %arg8[%c0_21, %c0_22, %c0_23] : memref<1x1x32xf32, #tpu.memory_space<vmem>>, vector<1x1x32xf32>
    %18 = vector.shape_cast %17 : vector<1x1x32xf32> to vector<1x32xf32>
    %c0_24 = arith.constant 0 : index
    %c0_25 = arith.constant 0 : index
    %c0_26 = arith.constant 0 : index
    %19 = vector.load %arg9[%c0_24, %c0_25, %c0_26] : memref<1x32x32xf32, #tpu.memory_space<vmem>>, vector<1x32x32xf32>
    %20 = vector.shape_cast %19 : vector<1x32x32xf32> to vector<32x32xf32>
    %c0_27 = arith.constant 0 : index
    %c0_28 = arith.constant 0 : index
    %c0_29 = arith.constant 0 : index
    %21 = vector.load %arg10[%c0_27, %c0_28, %c0_29] : memref<1x1x32xf32, #tpu.memory_space<vmem>>, vector<1x1x32xf32>
    %22 = vector.shape_cast %21 : vector<1x1x32xf32> to vector<1x32xf32>
    %cst = arith.constant dense<0.000000e+00> : vector<16x32xf32>
    %23 = tpu.matmul %4, %8, %cst {dimension_numbers = #tpu.dot_dimension_numbers<[1], [0], [0], [1], [0, 0, 1, 1], [], []>} : vector<16x32xf32>, vector<32x32xf32>, vector<16x32xf32> -> vector<16x32xf32>
    %24 = vector.broadcast %10 : vector<1x32xf32> to vector<16x32xf32>
    %25 = arith.addf %23, %24 : vector<16x32xf32>
    %cst_30 = arith.constant dense<0.000000e+00> : vector<16x32xf32>
    %26 = tpu.matmul %4, %12, %cst_30 {dimension_numbers = #tpu.dot_dimension_numbers<[1], [0], [0], [1], [0, 0, 1, 1], [], []>} : vector<16x32xf32>, vector<32x32xf32>, vector<16x32xf32> -> vector<16x32xf32>
    %27 = vector.broadcast %14 : vector<1x32xf32> to vector<16x32xf32>
    %28 = arith.addf %26, %27 : vector<16x32xf32>
    %cst_31 = arith.constant dense<0.000000e+00> : vector<16x32xf32>
    %29 = tpu.matmul %4, %16, %cst_31 {dimension_numbers = #tpu.dot_dimension_numbers<[1], [0], [0], [1], [0, 0, 1, 1], [], []>} : vector<16x32xf32>, vector<32x32xf32>, vector<16x32xf32> -> vector<16x32xf32>
    %30 = vector.broadcast %18 : vector<1x32xf32> to vector<16x32xf32>
    %31 = arith.addf %29, %30 : vector<16x32xf32>
    %32 = vector.shape_cast %25 : vector<16x32xf32> to vector<2x8x32xf32>
    %33 = vector.extract_strided_slice %32 {offsets = [0, 0, 0], sizes = [2, 8, 8], strides = [1, 1, 1]} : vector<2x8x32xf32> to vector<2x8x8xf32>
    %34 = vector.extract_strided_slice %32 {offsets = [0, 0, 8], sizes = [2, 8, 8], strides = [1, 1, 1]} : vector<2x8x32xf32> to vector<2x8x8xf32>
    %35 = vector.extract_strided_slice %32 {offsets = [0, 0, 16], sizes = [2, 8, 8], strides = [1, 1, 1]} : vector<2x8x32xf32> to vector<2x8x8xf32>
    %36 = vector.extract_strided_slice %32 {offsets = [0, 0, 24], sizes = [2, 8, 8], strides = [1, 1, 1]} : vector<2x8x32xf32> to vector<2x8x8xf32>
    %37 = vector.shape_cast %33 : vector<2x8x8xf32> to vector<2x1x8x8xf32>
    %38 = vector.shape_cast %34 : vector<2x8x8xf32> to vector<2x1x8x8xf32>
    %39 = vector.shape_cast %35 : vector<2x8x8xf32> to vector<2x1x8x8xf32>
    %40 = vector.shape_cast %36 : vector<2x8x8xf32> to vector<2x1x8x8xf32>
    %41 = tpu.concatenate %37, %38, %39, %40 in 1 : vector<2x1x8x8xf32>, vector<2x1x8x8xf32>, vector<2x1x8x8xf32>, vector<2x1x8x8xf32> -> vector<2x4x8x8xf32>
    %42 = vector.shape_cast %41 : vector<2x4x8x8xf32> to vector<8x8x8xf32>
    %43 = vector.shape_cast %28 : vector<16x32xf32> to vector<2x8x32xf32>
    %44 = vector.extract_strided_slice %43 {offsets = [0, 0, 0], sizes = [2, 8, 8], strides = [1, 1, 1]} : vector<2x8x32xf32> to vector<2x8x8xf32>
    %45 = vector.extract_strided_slice %43 {offsets = [0, 0, 8], sizes = [2, 8, 8], strides = [1, 1, 1]} : vector<2x8x32xf32> to vector<2x8x8xf32>
    %46 = vector.extract_strided_slice %43 {offsets = [0, 0, 16], sizes = [2, 8, 8], strides = [1, 1, 1]} : vector<2x8x32xf32> to vector<2x8x8xf32>
    %47 = vector.extract_strided_slice %43 {offsets = [0, 0, 24], sizes = [2, 8, 8], strides = [1, 1, 1]} : vector<2x8x32xf32> to vector<2x8x8xf32>
    %48 = vector.shape_cast %44 : vector<2x8x8xf32> to vector<2x1x8x8xf32>
    %49 = vector.shape_cast %45 : vector<2x8x8xf32> to vector<2x1x8x8xf32>
    %50 = vector.shape_cast %46 : vector<2x8x8xf32> to vector<2x1x8x8xf32>
    %51 = vector.shape_cast %47 : vector<2x8x8xf32> to vector<2x1x8x8xf32>
    %52 = tpu.concatenate %48, %49, %50, %51 in 1 : vector<2x1x8x8xf32>, vector<2x1x8x8xf32>, vector<2x1x8x8xf32>, vector<2x1x8x8xf32> -> vector<2x4x8x8xf32>
    %53 = vector.shape_cast %52 : vector<2x4x8x8xf32> to vector<8x8x8xf32>
    %54 = vector.shape_cast %31 : vector<16x32xf32> to vector<2x8x32xf32>
    %55 = vector.extract_strided_slice %54 {offsets = [0, 0, 0], sizes = [2, 8, 8], strides = [1, 1, 1]} : vector<2x8x32xf32> to vector<2x8x8xf32>
    %56 = vector.extract_strided_slice %54 {offsets = [0, 0, 8], sizes = [2, 8, 8], strides = [1, 1, 1]} : vector<2x8x32xf32> to vector<2x8x8xf32>
    %57 = vector.extract_strided_slice %54 {offsets = [0, 0, 16], sizes = [2, 8, 8], strides = [1, 1, 1]} : vector<2x8x32xf32> to vector<2x8x8xf32>
    %58 = vector.extract_strided_slice %54 {offsets = [0, 0, 24], sizes = [2, 8, 8], strides = [1, 1, 1]} : vector<2x8x32xf32> to vector<2x8x8xf32>
    %59 = vector.shape_cast %55 : vector<2x8x8xf32> to vector<2x1x8x8xf32>
    %60 = vector.shape_cast %56 : vector<2x8x8xf32> to vector<2x1x8x8xf32>
    %61 = vector.shape_cast %57 : vector<2x8x8xf32> to vector<2x1x8x8xf32>
    %62 = vector.shape_cast %58 : vector<2x8x8xf32> to vector<2x1x8x8xf32>
    %63 = tpu.concatenate %59, %60, %61, %62 in 1 : vector<2x1x8x8xf32>, vector<2x1x8x8xf32>, vector<2x1x8x8xf32>, vector<2x1x8x8xf32> -> vector<2x4x8x8xf32>
    %64 = vector.shape_cast %63 : vector<2x4x8x8xf32> to vector<8x8x8xf32>
    "tpu.trace_start"() <{level = 10 : i32, message = "nqd,nkd->nqk"}> : () -> ()
    %cst_32 = arith.constant dense<0.000000e+00> : vector<8x8x8xf32>
    %65 = tpu.matmul %42, %53, %cst_32 {dimension_numbers = #tpu.dot_dimension_numbers<[2], [2], [1], [1], [0, 0, 0, 1, 1, 1], [0], [0]>} : vector<8x8x8xf32>, vector<8x8x8xf32>, vector<8x8x8xf32> -> vector<8x8x8xf32>
    "tpu.trace_stop"() : () -> ()
    %cst_33 = arith.constant 0.353553385 : f32
    %66 = vector.broadcast %cst_33 : f32 to vector<8x8x8xf32>
    %67 = arith.mulf %65, %66 : vector<8x8x8xf32>
    %cst_34 = arith.constant dense<0xFF800000> : vector<8x8xf32>
    %68 = vector.multi_reduction <maximumf>, %67, %cst_34 [2] : vector<8x8x8xf32> to vector<8x8xf32>
    %69 = vector.shape_cast %68 : vector<8x8xf32> to vector<8x8x1xf32>
    %70 = vector.broadcast %69 : vector<8x8x1xf32> to vector<8x8x8xf32>
    %71 = arith.subf %67, %70 : vector<8x8x8xf32>
    %72 = math.exp %71 : vector<8x8x8xf32>
    %cst_35 = arith.constant dense<0.000000e+00> : vector<8x8xf32>
    %73 = vector.multi_reduction <add>, %72, %cst_35 [2] : vector<8x8x8xf32> to vector<8x8xf32>
    %74 = vector.shape_cast %73 : vector<8x8xf32> to vector<8x8x1xf32>
    %75 = vector.broadcast %74 : vector<8x8x1xf32> to vector<8x8x8xf32>
    %76 = arith.divf %72, %75 : vector<8x8x8xf32>
    "tpu.trace_start"() <{level = 10 : i32, message = "nqk,nkd->nqd"}> : () -> ()
    %cst_36 = arith.constant dense<0.000000e+00> : vector<8x8x8xf32>
    %77 = tpu.matmul %76, %64, %cst_36 {dimension_numbers = #tpu.dot_dimension_numbers<[2], [1], [1], [2], [0, 0, 0, 1, 1, 2], [0], [0]>} : vector<8x8x8xf32>, vector<8x8x8xf32>, vector<8x8x8xf32> -> vector<8x8x8xf32>
    "tpu.trace_stop"() : () -> ()
    %78 = vector.shape_cast %77 : vector<8x8x8xf32> to vector<2x4x8x8xf32>
    %79 = vector.extract_strided_slice %78 {offsets = [0, 0, 0, 0], sizes = [2, 1, 8, 8], strides = [1, 1, 1, 1]} : vector<2x4x8x8xf32> to vector<2x1x8x8xf32>
    %80 = vector.shape_cast %79 : vector<2x1x8x8xf32> to vector<2x8x8xf32>
    %81 = vector.extract_strided_slice %78 {offsets = [0, 1, 0, 0], sizes = [2, 1, 8, 8], strides = [1, 1, 1, 1]} : vector<2x4x8x8xf32> to vector<2x1x8x8xf32>
    %82 = vector.shape_cast %81 : vector<2x1x8x8xf32> to vector<2x8x8xf32>
    %83 = vector.extract_strided_slice %78 {offsets = [0, 2, 0, 0], sizes = [2, 1, 8, 8], strides = [1, 1, 1, 1]} : vector<2x4x8x8xf32> to vector<2x1x8x8xf32>
    %84 = vector.shape_cast %83 : vector<2x1x8x8xf32> to vector<2x8x8xf32>
    %85 = vector.extract_strided_slice %78 {offsets = [0, 3, 0, 0], sizes = [2, 1, 8, 8], strides = [1, 1, 1, 1]} : vector<2x4x8x8xf32> to vector<2x1x8x8xf32>
    %86 = vector.shape_cast %85 : vector<2x1x8x8xf32> to vector<2x8x8xf32>
    %87 = tpu.concatenate %80, %82, %84, %86 in 2 : vector<2x8x8xf32>, vector<2x8x8xf32>, vector<2x8x8xf32>, vector<2x8x8xf32> -> vector<2x8x32xf32>
    %88 = vector.shape_cast %87 : vector<2x8x32xf32> to vector<16x32xf32>
    %cst_37 = arith.constant dense<0.000000e+00> : vector<16x32xf32>
    %89 = tpu.matmul %88, %20, %cst_37 {dimension_numbers = #tpu.dot_dimension_numbers<[1], [0], [0], [1], [0, 0, 1, 1], [], []>} : vector<16x32xf32>, vector<32x32xf32>, vector<16x32xf32> -> vector<16x32xf32>
    %90 = vector.broadcast %22 : vector<1x32xf32> to vector<16x32xf32>
    %91 = arith.addf %89, %90 : vector<16x32xf32>
    %92 = arith.addf %91, %4 : vector<16x32xf32>
    %c0_38 = arith.constant 0 : index
    %c0_39 = arith.constant 0 : index
    %c0_40 = arith.constant 0 : index
    %93 = vector.load %arg11[%c0_38, %c0_39, %c0_40] : memref<1x1x32xf32, #tpu.memory_space<vmem>>, vector<1x1x32xf32>
    %94 = vector.shape_cast %93 : vector<1x1x32xf32> to vector<1x32xf32>
    %c0_41 = arith.constant 0 : index
    %c0_42 = arith.constant 0 : index
    %c0_43 = arith.constant 0 : index
    %95 = vector.load %arg12[%c0_41, %c0_42, %c0_43] : memref<1x1x32xf32, #tpu.memory_space<vmem>>, vector<1x1x32xf32>
    %96 = vector.shape_cast %95 : vector<1x1x32xf32> to vector<1x32xf32>
    %cst_44 = arith.constant dense<0.000000e+00> : vector<16xf32>
    %97 = vector.multi_reduction <add>, %92, %cst_44 [1] : vector<16x32xf32> to vector<16xf32>
    %98 = vector.shape_cast %97 : vector<16xf32> to vector<16x1xf32>
    %cst_45 = arith.constant 3.200000e+01 : f32
    %99 = vector.broadcast %cst_45 : f32 to vector<16x1xf32>
    %100 = arith.divf %98, %99 : vector<16x1xf32>
    %101 = vector.broadcast %100 : vector<16x1xf32> to vector<16x32xf32>
    %102 = arith.subf %92, %101 : vector<16x32xf32>
    %103 = arith.mulf %102, %102 : vector<16x32xf32>
    %cst_46 = arith.constant dense<0.000000e+00> : vector<16xf32>
    %104 = vector.multi_reduction <add>, %103, %cst_46 [1] : vector<16x32xf32> to vector<16xf32>
    %105 = vector.shape_cast %104 : vector<16xf32> to vector<16x1xf32>
    %cst_47 = arith.constant 3.200000e+01 : f32
    %106 = vector.broadcast %cst_47 : f32 to vector<16x1xf32>
    %107 = arith.divf %105, %106 : vector<16x1xf32>
    %108 = vector.broadcast %100 : vector<16x1xf32> to vector<16x32xf32>
    %109 = arith.subf %92, %108 : vector<16x32xf32>
    %cst_48 = arith.constant 9.99999997E-7 : f32
    %110 = vector.broadcast %cst_48 : f32 to vector<16x1xf32>
    %111 = arith.addf %107, %110 : vector<16x1xf32>
    %112 = math.rsqrt %111 : vector<16x1xf32>
    %113 = vector.broadcast %112 : vector<16x1xf32> to vector<16x32xf32>
    %114 = arith.mulf %109, %113 : vector<16x32xf32>
    %115 = vector.broadcast %94 : vector<1x32xf32> to vector<16x32xf32>
    %116 = arith.mulf %114, %115 : vector<16x32xf32>
    %117 = vector.broadcast %96 : vector<1x32xf32> to vector<16x32xf32>
    %118 = arith.addf %116, %117 : vector<16x32xf32>
    %c0_49 = arith.constant 0 : index
    %c0_50 = arith.constant 0 : index
    %c0_51 = arith.constant 0 : index
    %119 = vector.load %arg13[%c0_49, %c0_50, %c0_51] : memref<1x32x32xf32, #tpu.memory_space<vmem>>, vector<1x32x32xf32>
    %120 = vector.shape_cast %119 : vector<1x32x32xf32> to vector<32x32xf32>
    %c0_52 = arith.constant 0 : index
    %c0_53 = arith.constant 0 : index
    %c0_54 = arith.constant 0 : index
    %121 = vector.load %arg14[%c0_52, %c0_53, %c0_54] : memref<1x1x32xf32, #tpu.memory_space<vmem>>, vector<1x1x32xf32>
    %122 = vector.shape_cast %121 : vector<1x1x32xf32> to vector<1x32xf32>
    %c0_55 = arith.constant 0 : index
    %c0_56 = arith.constant 0 : index
    %c0_57 = arith.constant 0 : index
    %123 = vector.load %arg15[%c0_55, %c0_56, %c0_57] : memref<1x32x32xf32, #tpu.memory_space<vmem>>, vector<1x32x32xf32>
    %124 = vector.shape_cast %123 : vector<1x32x32xf32> to vector<32x32xf32>
    %c0_58 = arith.constant 0 : index
    %c0_59 = arith.constant 0 : index
    %c0_60 = arith.constant 0 : index
    %125 = vector.load %arg16[%c0_58, %c0_59, %c0_60] : memref<1x1x32xf32, #tpu.memory_space<vmem>>, vector<1x1x32xf32>
    %126 = vector.shape_cast %125 : vector<1x1x32xf32> to vector<1x32xf32>
    %c0_61 = arith.constant 0 : index
    %c0_62 = arith.constant 0 : index
    %c0_63 = arith.constant 0 : index
    %127 = vector.load %arg17[%c0_61, %c0_62, %c0_63] : memref<1x32x32xf32, #tpu.memory_space<vmem>>, vector<1x32x32xf32>
    %128 = vector.shape_cast %127 : vector<1x32x32xf32> to vector<32x32xf32>
    %c0_64 = arith.constant 0 : index
    %c0_65 = arith.constant 0 : index
    %c0_66 = arith.constant 0 : index
    %129 = vector.load %arg18[%c0_64, %c0_65, %c0_66] : memref<1x1x32xf32, #tpu.memory_space<vmem>>, vector<1x1x32xf32>
    %130 = vector.shape_cast %129 : vector<1x1x32xf32> to vector<1x32xf32>
    %c0_67 = arith.constant 0 : index
    %c0_68 = arith.constant 0 : index
    %c0_69 = arith.constant 0 : index
    %131 = vector.load %arg19[%c0_67, %c0_68, %c0_69] : memref<1x32x32xf32, #tpu.memory_space<vmem>>, vector<1x32x32xf32>
    %132 = vector.shape_cast %131 : vector<1x32x32xf32> to vector<32x32xf32>
    %c0_70 = arith.constant 0 : index
    %c0_71 = arith.constant 0 : index
    %c0_72 = arith.constant 0 : index
    %133 = vector.load %arg20[%c0_70, %c0_71, %c0_72] : memref<1x1x32xf32, #tpu.memory_space<vmem>>, vector<1x1x32xf32>
    %134 = vector.shape_cast %133 : vector<1x1x32xf32> to vector<1x32xf32>
    %cst_73 = arith.constant dense<0.000000e+00> : vector<16x32xf32>
    %135 = tpu.matmul %4, %120, %cst_73 {dimension_numbers = #tpu.dot_dimension_numbers<[1], [0], [0], [1], [0, 0, 1, 1], [], []>} : vector<16x32xf32>, vector<32x32xf32>, vector<16x32xf32> -> vector<16x32xf32>
    %136 = vector.broadcast %122 : vector<1x32xf32> to vector<16x32xf32>
    %137 = arith.addf %135, %136 : vector<16x32xf32>
    %cst_74 = arith.constant dense<0.000000e+00> : vector<16x32xf32>
    %138 = tpu.matmul %6, %124, %cst_74 {dimension_numbers = #tpu.dot_dimension_numbers<[1], [0], [0], [1], [0, 0, 1, 1], [], []>} : vector<16x32xf32>, vector<32x32xf32>, vector<16x32xf32> -> vector<16x32xf32>
    %139 = vector.broadcast %126 : vector<1x32xf32> to vector<16x32xf32>
    %140 = arith.addf %138, %139 : vector<16x32xf32>
    %cst_75 = arith.constant dense<0.000000e+00> : vector<16x32xf32>
    %141 = tpu.matmul %6, %128, %cst_75 {dimension_numbers = #tpu.dot_dimension_numbers<[1], [0], [0], [1], [0, 0, 1, 1], [], []>} : vector<16x32xf32>, vector<32x32xf32>, vector<16x32xf32> -> vector<16x32xf32>
    %142 = vector.broadcast %130 : vector<1x32xf32> to vector<16x32xf32>
    %143 = arith.addf %141, %142 : vector<16x32xf32>
    %144 = vector.shape_cast %137 : vector<16x32xf32> to vector<2x8x32xf32>
    %145 = vector.extract_strided_slice %144 {offsets = [0, 0, 0], sizes = [2, 8, 8], strides = [1, 1, 1]} : vector<2x8x32xf32> to vector<2x8x8xf32>
    %146 = vector.extract_strided_slice %144 {offsets = [0, 0, 8], sizes = [2, 8, 8], strides = [1, 1, 1]} : vector<2x8x32xf32> to vector<2x8x8xf32>
    %147 = vector.extract_strided_slice %144 {offsets = [0, 0, 16], sizes = [2, 8, 8], strides = [1, 1, 1]} : vector<2x8x32xf32> to vector<2x8x8xf32>
    %148 = vector.extract_strided_slice %144 {offsets = [0, 0, 24], sizes = [2, 8, 8], strides = [1, 1, 1]} : vector<2x8x32xf32> to vector<2x8x8xf32>
    %149 = vector.shape_cast %145 : vector<2x8x8xf32> to vector<2x1x8x8xf32>
    %150 = vector.shape_cast %146 : vector<2x8x8xf32> to vector<2x1x8x8xf32>
    %151 = vector.shape_cast %147 : vector<2x8x8xf32> to vector<2x1x8x8xf32>
    %152 = vector.shape_cast %148 : vector<2x8x8xf32> to vector<2x1x8x8xf32>
    %153 = tpu.concatenate %149, %150, %151, %152 in 1 : vector<2x1x8x8xf32>, vector<2x1x8x8xf32>, vector<2x1x8x8xf32>, vector<2x1x8x8xf32> -> vector<2x4x8x8xf32>
    %154 = vector.shape_cast %153 : vector<2x4x8x8xf32> to vector<8x8x8xf32>
    %155 = vector.shape_cast %140 : vector<16x32xf32> to vector<2x8x32xf32>
    %156 = vector.extract_strided_slice %155 {offsets = [0, 0, 0], sizes = [2, 8, 8], strides = [1, 1, 1]} : vector<2x8x32xf32> to vector<2x8x8xf32>
    %157 = vector.extract_strided_slice %155 {offsets = [0, 0, 8], sizes = [2, 8, 8], strides = [1, 1, 1]} : vector<2x8x32xf32> to vector<2x8x8xf32>
    %158 = vector.extract_strided_slice %155 {offsets = [0, 0, 16], sizes = [2, 8, 8], strides = [1, 1, 1]} : vector<2x8x32xf32> to vector<2x8x8xf32>
    %159 = vector.extract_strided_slice %155 {offsets = [0, 0, 24], sizes = [2, 8, 8], strides = [1, 1, 1]} : vector<2x8x32xf32> to vector<2x8x8xf32>
    %160 = vector.shape_cast %156 : vector<2x8x8xf32> to vector<2x1x8x8xf32>
    %161 = vector.shape_cast %157 : vector<2x8x8xf32> to vector<2x1x8x8xf32>
    %162 = vector.shape_cast %158 : vector<2x8x8xf32> to vector<2x1x8x8xf32>
    %163 = vector.shape_cast %159 : vector<2x8x8xf32> to vector<2x1x8x8xf32>
    %164 = tpu.concatenate %160, %161, %162, %163 in 1 : vector<2x1x8x8xf32>, vector<2x1x8x8xf32>, vector<2x1x8x8xf32>, vector<2x1x8x8xf32> -> vector<2x4x8x8xf32>
    %165 = vector.shape_cast %164 : vector<2x4x8x8xf32> to vector<8x8x8xf32>
    %166 = vector.shape_cast %143 : vector<16x32xf32> to vector<2x8x32xf32>
    %167 = vector.extract_strided_slice %166 {offsets = [0, 0, 0], sizes = [2, 8, 8], strides = [1, 1, 1]} : vector<2x8x32xf32> to vector<2x8x8xf32>
    %168 = vector.extract_strided_slice %166 {offsets = [0, 0, 8], sizes = [2, 8, 8], strides = [1, 1, 1]} : vector<2x8x32xf32> to vector<2x8x8xf32>
    %169 = vector.extract_strided_slice %166 {offsets = [0, 0, 16], sizes = [2, 8, 8], strides = [1, 1, 1]} : vector<2x8x32xf32> to vector<2x8x8xf32>
    %170 = vector.extract_strided_slice %166 {offsets = [0, 0, 24], sizes = [2, 8, 8], strides = [1, 1, 1]} : vector<2x8x32xf32> to vector<2x8x8xf32>
    %171 = vector.shape_cast %167 : vector<2x8x8xf32> to vector<2x1x8x8xf32>
    %172 = vector.shape_cast %168 : vector<2x8x8xf32> to vector<2x1x8x8xf32>
    %173 = vector.shape_cast %169 : vector<2x8x8xf32> to vector<2x1x8x8xf32>
    %174 = vector.shape_cast %170 : vector<2x8x8xf32> to vector<2x1x8x8xf32>
    %175 = tpu.concatenate %171, %172, %173, %174 in 1 : vector<2x1x8x8xf32>, vector<2x1x8x8xf32>, vector<2x1x8x8xf32>, vector<2x1x8x8xf32> -> vector<2x4x8x8xf32>
    %176 = vector.shape_cast %175 : vector<2x4x8x8xf32> to vector<8x8x8xf32>
    "tpu.trace_start"() <{level = 10 : i32, message = "nqd,nkd->nqk"}> : () -> ()
    %cst_76 = arith.constant dense<0.000000e+00> : vector<8x8x8xf32>
    %177 = tpu.matmul %154, %165, %cst_76 {dimension_numbers = #tpu.dot_dimension_numbers<[2], [2], [1], [1], [0, 0, 0, 1, 1, 1], [0], [0]>} : vector<8x8x8xf32>, vector<8x8x8xf32>, vector<8x8x8xf32> -> vector<8x8x8xf32>
    "tpu.trace_stop"() : () -> ()
    %cst_77 = arith.constant 0.353553385 : f32
    %178 = vector.broadcast %cst_77 : f32 to vector<8x8x8xf32>
    %179 = arith.mulf %177, %178 : vector<8x8x8xf32>
    %cst_78 = arith.constant dense<0xFF800000> : vector<8x8xf32>
    %180 = vector.multi_reduction <maximumf>, %179, %cst_78 [2] : vector<8x8x8xf32> to vector<8x8xf32>
    %181 = vector.shape_cast %180 : vector<8x8xf32> to vector<8x8x1xf32>
    %182 = vector.broadcast %181 : vector<8x8x1xf32> to vector<8x8x8xf32>
    %183 = arith.subf %179, %182 : vector<8x8x8xf32>
    %184 = math.exp %183 : vector<8x8x8xf32>
    %cst_79 = arith.constant dense<0.000000e+00> : vector<8x8xf32>
    %185 = vector.multi_reduction <add>, %184, %cst_79 [2] : vector<8x8x8xf32> to vector<8x8xf32>
    %186 = vector.shape_cast %185 : vector<8x8xf32> to vector<8x8x1xf32>
    %187 = vector.broadcast %186 : vector<8x8x1xf32> to vector<8x8x8xf32>
    %188 = arith.divf %184, %187 : vector<8x8x8xf32>
    "tpu.trace_start"() <{level = 10 : i32, message = "nqk,nkd->nqd"}> : () -> ()
    %cst_80 = arith.constant dense<0.000000e+00> : vector<8x8x8xf32>
    %189 = tpu.matmul %188, %176, %cst_80 {dimension_numbers = #tpu.dot_dimension_numbers<[2], [1], [1], [2], [0, 0, 0, 1, 1, 2], [0], [0]>} : vector<8x8x8xf32>, vector<8x8x8xf32>, vector<8x8x8xf32> -> vector<8x8x8xf32>
    "tpu.trace_stop"() : () -> ()
    %190 = vector.shape_cast %189 : vector<8x8x8xf32> to vector<2x4x8x8xf32>
    %191 = vector.extract_strided_slice %190 {offsets = [0, 0, 0, 0], sizes = [2, 1, 8, 8], strides = [1, 1, 1, 1]} : vector<2x4x8x8xf32> to vector<2x1x8x8xf32>
    %192 = vector.shape_cast %191 : vector<2x1x8x8xf32> to vector<2x8x8xf32>
    %193 = vector.extract_strided_slice %190 {offsets = [0, 1, 0, 0], sizes = [2, 1, 8, 8], strides = [1, 1, 1, 1]} : vector<2x4x8x8xf32> to vector<2x1x8x8xf32>
    %194 = vector.shape_cast %193 : vector<2x1x8x8xf32> to vector<2x8x8xf32>
    %195 = vector.extract_strided_slice %190 {offsets = [0, 2, 0, 0], sizes = [2, 1, 8, 8], strides = [1, 1, 1, 1]} : vector<2x4x8x8xf32> to vector<2x1x8x8xf32>
    %196 = vector.shape_cast %195 : vector<2x1x8x8xf32> to vector<2x8x8xf32>
    %197 = vector.extract_strided_slice %190 {offsets = [0, 3, 0, 0], sizes = [2, 1, 8, 8], strides = [1, 1, 1, 1]} : vector<2x4x8x8xf32> to vector<2x1x8x8xf32>
    %198 = vector.shape_cast %197 : vector<2x1x8x8xf32> to vector<2x8x8xf32>
    %199 = tpu.concatenate %192, %194, %196, %198 in 2 : vector<2x8x8xf32>, vector<2x8x8xf32>, vector<2x8x8xf32>, vector<2x8x8xf32> -> vector<2x8x32xf32>
    %200 = vector.shape_cast %199 : vector<2x8x32xf32> to vector<16x32xf32>
    %cst_81 = arith.constant dense<0.000000e+00> : vector<16x32xf32>
    %201 = tpu.matmul %200, %132, %cst_81 {dimension_numbers = #tpu.dot_dimension_numbers<[1], [0], [0], [1], [0, 0, 1, 1], [], []>} : vector<16x32xf32>, vector<32x32xf32>, vector<16x32xf32> -> vector<16x32xf32>
    %202 = vector.broadcast %134 : vector<1x32xf32> to vector<16x32xf32>
    %203 = arith.addf %201, %202 : vector<16x32xf32>
    %204 = arith.addf %203, %118 : vector<16x32xf32>
    %c0_82 = arith.constant 0 : index
    %c0_83 = arith.constant 0 : index
    %c0_84 = arith.constant 0 : index
    %205 = vector.load %arg21[%c0_82, %c0_83, %c0_84] : memref<1x1x32xf32, #tpu.memory_space<vmem>>, vector<1x1x32xf32>
    %206 = vector.shape_cast %205 : vector<1x1x32xf32> to vector<1x32xf32>
    %c0_85 = arith.constant 0 : index
    %c0_86 = arith.constant 0 : index
    %c0_87 = arith.constant 0 : index
    %207 = vector.load %arg22[%c0_85, %c0_86, %c0_87] : memref<1x1x32xf32, #tpu.memory_space<vmem>>, vector<1x1x32xf32>
    %208 = vector.shape_cast %207 : vector<1x1x32xf32> to vector<1x32xf32>
    %cst_88 = arith.constant dense<0.000000e+00> : vector<16xf32>
    %209 = vector.multi_reduction <add>, %204, %cst_88 [1] : vector<16x32xf32> to vector<16xf32>
    %210 = vector.shape_cast %209 : vector<16xf32> to vector<16x1xf32>
    %cst_89 = arith.constant 3.200000e+01 : f32
    %211 = vector.broadcast %cst_89 : f32 to vector<16x1xf32>
    %212 = arith.divf %210, %211 : vector<16x1xf32>
    %213 = vector.broadcast %212 : vector<16x1xf32> to vector<16x32xf32>
    %214 = arith.subf %204, %213 : vector<16x32xf32>
    %215 = arith.mulf %214, %214 : vector<16x32xf32>
    %cst_90 = arith.constant dense<0.000000e+00> : vector<16xf32>
    %216 = vector.multi_reduction <add>, %215, %cst_90 [1] : vector<16x32xf32> to vector<16xf32>
    %217 = vector.shape_cast %216 : vector<16xf32> to vector<16x1xf32>
    %cst_91 = arith.constant 3.200000e+01 : f32
    %218 = vector.broadcast %cst_91 : f32 to vector<16x1xf32>
    %219 = arith.divf %217, %218 : vector<16x1xf32>
    %220 = vector.broadcast %212 : vector<16x1xf32> to vector<16x32xf32>
    %221 = arith.subf %204, %220 : vector<16x32xf32>
    %cst_92 = arith.constant 9.99999997E-7 : f32
    %222 = vector.broadcast %cst_92 : f32 to vector<16x1xf32>
    %223 = arith.addf %219, %222 : vector<16x1xf32>
    %224 = math.rsqrt %223 : vector<16x1xf32>
    %225 = vector.broadcast %224 : vector<16x1xf32> to vector<16x32xf32>
    %226 = arith.mulf %221, %225 : vector<16x32xf32>
    %227 = vector.broadcast %206 : vector<1x32xf32> to vector<16x32xf32>
    %228 = arith.mulf %226, %227 : vector<16x32xf32>
    %229 = vector.broadcast %208 : vector<1x32xf32> to vector<16x32xf32>
    %230 = arith.addf %228, %229 : vector<16x32xf32>
    %c0_93 = arith.constant 0 : index
    %c0_94 = arith.constant 0 : index
    %c0_95 = arith.constant 0 : index
    %231 = vector.load %arg23[%c0_93, %c0_94, %c0_95] : memref<1x32x64xf32, #tpu.memory_space<vmem>>, vector<1x32x64xf32>
    %232 = vector.shape_cast %231 : vector<1x32x64xf32> to vector<32x64xf32>
    %cst_96 = arith.constant dense<0.000000e+00> : vector<16x64xf32>
    %233 = tpu.matmul %230, %232, %cst_96 {dimension_numbers = #tpu.dot_dimension_numbers<[1], [0], [0], [1], [0, 0, 1, 1], [], []>} : vector<16x32xf32>, vector<32x64xf32>, vector<16x64xf32> -> vector<16x64xf32>
    %c0_97 = arith.constant 0 : index
    %c0_98 = arith.constant 0 : index
    %c0_99 = arith.constant 0 : index
    %234 = vector.load %arg24[%c0_97, %c0_98, %c0_99] : memref<1x1x64xf32, #tpu.memory_space<vmem>>, vector<1x1x64xf32>
    %235 = vector.shape_cast %234 : vector<1x1x64xf32> to vector<1x64xf32>
    %236 = vector.broadcast %235 : vector<1x64xf32> to vector<16x64xf32>
    %237 = arith.addf %233, %236 : vector<16x64xf32>
    %cst_100 = arith.constant 5.000000e-01 : f32
    %238 = vector.broadcast %cst_100 : f32 to vector<16x64xf32>
    %239 = arith.mulf %238, %237 : vector<16x64xf32>
    %240 = arith.mulf %237, %237 : vector<16x64xf32>
    %241 = arith.mulf %237, %240 : vector<16x64xf32>
    %cst_101 = arith.constant 4.471500e-02 : f32
    %242 = vector.broadcast %cst_101 : f32 to vector<16x64xf32>
    %243 = arith.mulf %242, %241 : vector<16x64xf32>
    %244 = arith.addf %237, %243 : vector<16x64xf32>
    %cst_102 = arith.constant 0.797884583 : f32
    %245 = vector.broadcast %cst_102 : f32 to vector<16x64xf32>
    %246 = arith.mulf %245, %244 : vector<16x64xf32>
    %247 = math.tanh %246 : vector<16x64xf32>
    %cst_103 = arith.constant 1.000000e+00 : f32
    %248 = vector.broadcast %cst_103 : f32 to vector<16x64xf32>
    %249 = arith.addf %248, %247 : vector<16x64xf32>
    %250 = arith.mulf %239, %249 : vector<16x64xf32>
    %c0_104 = arith.constant 0 : index
    %c0_105 = arith.constant 0 : index
    %c0_106 = arith.constant 0 : index
    %251 = vector.load %arg25[%c0_104, %c0_105, %c0_106] : memref<1x64x32xf32, #tpu.memory_space<vmem>>, vector<1x64x32xf32>
    %252 = vector.shape_cast %251 : vector<1x64x32xf32> to vector<64x32xf32>
    %cst_107 = arith.constant dense<0.000000e+00> : vector<16x32xf32>
    %253 = tpu.matmul %250, %252, %cst_107 {dimension_numbers = #tpu.dot_dimension_numbers<[1], [0], [0], [1], [0, 0, 1, 1], [], []>} : vector<16x64xf32>, vector<64x32xf32>, vector<16x32xf32> -> vector<16x32xf32>
    %c0_108 = arith.constant 0 : index
    %c0_109 = arith.constant 0 : index
    %c0_110 = arith.constant 0 : index
    %254 = vector.load %arg26[%c0_108, %c0_109, %c0_110] : memref<1x1x32xf32, #tpu.memory_space<vmem>>, vector<1x1x32xf32>
    %255 = vector.shape_cast %254 : vector<1x1x32xf32> to vector<1x32xf32>
    %256 = vector.broadcast %255 : vector<1x32xf32> to vector<16x32xf32>
    %257 = arith.addf %253, %256 : vector<16x32xf32>
    %258 = arith.addf %257, %230 : vector<16x32xf32>
    %c0_111 = arith.constant 0 : index
    %c0_112 = arith.constant 0 : index
    %c0_113 = arith.constant 0 : index
    %259 = vector.load %arg27[%c0_111, %c0_112, %c0_113] : memref<1x1x32xf32, #tpu.memory_space<vmem>>, vector<1x1x32xf32>
    %260 = vector.shape_cast %259 : vector<1x1x32xf32> to vector<1x32xf32>
    %c0_114 = arith.constant 0 : index
    %c0_115 = arith.constant 0 : index
    %c0_116 = arith.constant 0 : index
    %261 = vector.load %arg28[%c0_114, %c0_115, %c0_116] : memref<1x1x32xf32, #tpu.memory_space<vmem>>, vector<1x1x32xf32>
    %262 = vector.shape_cast %261 : vector<1x1x32xf32> to vector<1x32xf32>
    %cst_117 = arith.constant dense<0.000000e+00> : vector<16xf32>
    %263 = vector.multi_reduction <add>, %258, %cst_117 [1] : vector<16x32xf32> to vector<16xf32>
    %264 = vector.shape_cast %263 : vector<16xf32> to vector<16x1xf32>
    %cst_118 = arith.constant 3.200000e+01 : f32
    %265 = vector.broadcast %cst_118 : f32 to vector<16x1xf32>
    %266 = arith.divf %264, %265 : vector<16x1xf32>
    %267 = vector.broadcast %266 : vector<16x1xf32> to vector<16x32xf32>
    %268 = arith.subf %258, %267 : vector<16x32xf32>
    %269 = arith.mulf %268, %268 : vector<16x32xf32>
    %cst_119 = arith.constant dense<0.000000e+00> : vector<16xf32>
    %270 = vector.multi_reduction <add>, %269, %cst_119 [1] : vector<16x32xf32> to vector<16xf32>
    %271 = vector.shape_cast %270 : vector<16xf32> to vector<16x1xf32>
    %cst_120 = arith.constant 3.200000e+01 : f32
    %272 = vector.broadcast %cst_120 : f32 to vector<16x1xf32>
    %273 = arith.divf %271, %272 : vector<16x1xf32>
    %274 = vector.broadcast %266 : vector<16x1xf32> to vector<16x32xf32>
    %275 = arith.subf %258, %274 : vector<16x32xf32>
    %cst_121 = arith.constant 9.99999997E-7 : f32
    %276 = vector.broadcast %cst_121 : f32 to vector<16x1xf32>
    %277 = arith.addf %273, %276 : vector<16x1xf32>
    %278 = math.rsqrt %277 : vector<16x1xf32>
    %279 = vector.broadcast %278 : vector<16x1xf32> to vector<16x32xf32>
    %280 = arith.mulf %275, %279 : vector<16x32xf32>
    %281 = vector.broadcast %260 : vector<1x32xf32> to vector<16x32xf32>
    %282 = arith.mulf %280, %281 : vector<16x32xf32>
    %283 = vector.broadcast %262 : vector<1x32xf32> to vector<16x32xf32>
    %284 = arith.addf %282, %283 : vector<16x32xf32>
    %285 = vector.shape_cast %284 : vector<16x32xf32> to vector<2x8x32xf32>
    %c0_122 = arith.constant 0 : index
    %c0_123 = arith.constant 0 : index
    %c0_124 = arith.constant 0 : index
    %286 = vector.load %arg29[%c0_122, %c0_123, %c0_124] : memref<2x8x32xf32, #tpu.memory_space<vmem>>, vector<2x8x32xf32>
    tpu.vector_store %arg29[%c0_122, %c0_123, %c0_124], %285 {strides = array<i32>} : memref<2x8x32xf32, #tpu.memory_space<vmem>>, vector<2x8x32xf32>,
    %c0_125 = arith.constant 0 : index
    %c0_126 = arith.constant 0 : index
    %c0_127 = arith.constant 0 : index
    %c0_128 = arith.constant 0 : index
    %287 = vector.load %arg30[%c0_125, %c0_126, %c0_127, %c0_128] : memref<1x8x8x8xf32, #tpu.memory_space<vmem>>, vector<1x8x8x8xf32>
    %288 = vector.shape_cast %287 : vector<1x8x8x8xf32> to vector<8x8x8xf32>
    %289 = vector.shape_cast %76 : vector<8x8x8xf32> to vector<1x8x8x8xf32>
    tpu.vector_store %arg30[%c0_125, %c0_126, %c0_127, %c0_128], %289 {strides = array<i32>} : memref<1x8x8x8xf32, #tpu.memory_space<vmem>>, vector<1x8x8x8xf32>,
    %c0_129 = arith.constant 0 : index
    %c0_130 = arith.constant 0 : index
    %c0_131 = arith.constant 0 : index
    %c0_132 = arith.constant 0 : index
    %290 = vector.load %arg31[%c0_129, %c0_130, %c0_131, %c0_132] : memref<1x8x8x8xf32, #tpu.memory_space<vmem>>, vector<1x8x8x8xf32>
    %291 = vector.shape_cast %290 : vector<1x8x8x8xf32> to vector<8x8x8xf32>
    %292 = vector.shape_cast %188 : vector<8x8x8xf32> to vector<1x8x8x8xf32>
    tpu.vector_store %arg31[%c0_129, %c0_130, %c0_131, %c0_132], %292 {strides = array<i32>} : memref<1x8x8x8xf32, #tpu.memory_space<vmem>>, vector<1x8x8x8xf32>,
    return
  }
  func.func @transform_0(%arg0: i32) -> (i32, i32, i32) {
    %c0_i32 = arith.constant 0 : i32
    %c0_i32_0 = arith.constant 0 : i32
    %c0_i32_1 = arith.constant 0 : i32
    %c0_i32_2 = arith.constant 0 : i32
    return %c0_i32, %c0_i32_0, %c0_i32_1 : i32, i32, i32
  }
  func.func @transform_1(%arg0: i32) -> (i32, i32, i32) {
    %c0_i32 = arith.constant 0 : i32
    %c0_i32_0 = arith.constant 0 : i32
    %c0_i32_1 = arith.constant 0 : i32
    %c0_i32_2 = arith.constant 0 : i32
    return %c0_i32, %c0_i32_0, %c0_i32_1 : i32, i32, i32
  }
  func.func @transform_2(%arg0: i32) -> (i32, i32, i32) {
    %c0_i32 = arith.constant 0 : i32
    %c0_i32_0 = arith.constant 0 : i32
    %c0_i32_1 = arith.constant 0 : i32
    return %arg0, %c0_i32, %c0_i32_0 : i32, i32, i32
  }
  func.func @transform_3(%arg0: i32) -> (i32, i32, i32) {
    %c0_i32 = arith.constant 0 : i32
    %c0_i32_0 = arith.constant 0 : i32
    %c0_i32_1 = arith.constant 0 : i32
    return %arg0, %c0_i32, %c0_i32_0 : i32, i32, i32
  }
  func.func @transform_4(%arg0: i32) -> (i32, i32, i32) {
    %c0_i32 = arith.constant 0 : i32
    %c0_i32_0 = arith.constant 0 : i32
    %c0_i32_1 = arith.constant 0 : i32
    return %arg0, %c0_i32, %c0_i32_0 : i32, i32, i32
  }
  func.func @transform_5(%arg0: i32) -> (i32, i32, i32) {
    %c0_i32 = arith.constant 0 : i32
    %c0_i32_0 = arith.constant 0 : i32
    %c0_i32_1 = arith.constant 0 : i32
    return %arg0, %c0_i32, %c0_i32_0 : i32, i32, i32
  }
  func.func @transform_6(%arg0: i32) -> (i32, i32, i32) {
    %c0_i32 = arith.constant 0 : i32
    %c0_i32_0 = arith.constant 0 : i32
    %c0_i32_1 = arith.constant 0 : i32
    return %arg0, %c0_i32, %c0_i32_0 : i32, i32, i32
  }
  func.func @transform_7(%arg0: i32) -> (i32, i32, i32) {
    %c0_i32 = arith.constant 0 : i32
    %c0_i32_0 = arith.constant 0 : i32
    %c0_i32_1 = arith.constant 0 : i32
    return %arg0, %c0_i32, %c0_i32_0 : i32, i32, i32
  }
  func.func @transform_8(%arg0: i32) -> (i32, i32, i32) {
    %c0_i32 = arith.constant 0 : i32
    %c0_i32_0 = arith.constant 0 : i32
    %c0_i32_1 = arith.constant 0 : i32
    return %arg0, %c0_i32, %c0_i32_0 : i32, i32, i32
  }
  func.func @transform_9(%arg0: i32) -> (i32, i32, i32) {
    %c0_i32 = arith.constant 0 : i32
    %c0_i32_0 = arith.constant 0 : i32
    %c0_i32_1 = arith.constant 0 : i32
    return %arg0, %c0_i32, %c0_i32_0 : i32, i32, i32
  }
  func.func @transform_10(%arg0: i32) -> (i32, i32, i32) {
    %c0_i32 = arith.constant 0 : i32
    %c0_i32_0 = arith.constant 0 : i32
    %c0_i32_1 = arith.constant 0 : i32
    return %arg0, %c0_i32, %c0_i32_0 : i32, i32, i32
  }
  func.func @transform_11(%arg0: i32) -> (i32, i32, i32) {
    %c0_i32 = arith.constant 0 : i32
    %c0_i32_0 = arith.constant 0 : i32
    %c0_i32_1 = arith.constant 0 : i32
    return %arg0, %c0_i32, %c0_i32_0 : i32, i32, i32
  }
  func.func @transform_12(%arg0: i32) -> (i32, i32, i32) {
    %c0_i32 = arith.constant 0 : i32
    %c0_i32_0 = arith.constant 0 : i32
    %c0_i32_1 = arith.constant 0 : i32
    return %arg0, %c0_i32, %c0_i32_0 : i32, i32, i32
  }
  func.func @transform_13(%arg0: i32) -> (i32, i32, i32) {
    %c0_i32 = arith.constant 0 : i32
    %c0_i32_0 = arith.constant 0 : i32
    %c0_i32_1 = arith.constant 0 : i32
    return %arg0, %c0_i32, %c0_i32_0 : i32, i32, i32
  }
  func.func @transform_14(%arg0: i32) -> (i32, i32, i32) {
    %c0_i32 = arith.constant 0 : i32
    %c0_i32_0 = arith.constant 0 : i32
    %c0_i32_1 = arith.constant 0 : i32
    return %arg0, %c0_i32, %c0_i32_0 : i32, i32, i32
  }
  func.func @transform_15(%arg0: i32) -> (i32, i32, i32) {
    %c0_i32 = arith.constant 0 : i32
    %c0_i32_0 = arith.constant 0 : i32
    %c0_i32_1 = arith.constant 0 : i32
    return %arg0, %c0_i32, %c0_i32_0 : i32, i32, i32
  }
  func.func @transform_16(%arg0: i32) -> (i32, i32, i32) {
    %c0_i32 = arith.constant 0 : i32
    %c0_i32_0 = arith.constant 0 : i32
    %c0_i32_1 = arith.constant 0 : i32
    return %arg0, %c0_i32, %c0_i32_0 : i32, i32, i32
  }
  func.func @transform_17(%arg0: i32) -> (i32, i32, i32) {
    %c0_i32 = arith.constant 0 : i32
    %c0_i32_0 = arith.constant 0 : i32
    %c0_i32_1 = arith.constant 0 : i32
    return %arg0, %c0_i32, %c0_i32_0 : i32, i32, i32
  }
  func.func @transform_18(%arg0: i32) -> (i32, i32, i32) {
    %c0_i32 = arith.constant 0 : i32
    %c0_i32_0 = arith.constant 0 : i32
    %c0_i32_1 = arith.constant 0 : i32
    return %arg0, %c0_i32, %c0_i32_0 : i32, i32, i32
  }
  func.func @transform_19(%arg0: i32) -> (i32, i32, i32) {
    %c0_i32 = arith.constant 0 : i32
    %c0_i32_0 = arith.constant 0 : i32
    %c0_i32_1 = arith.constant 0 : i32
    return %arg0, %c0_i32, %c0_i32_0 : i32, i32, i32
  }
  func.func @transform_20(%arg0: i32) -> (i32, i32, i32) {
    %c0_i32 = arith.constant 0 : i32
    %c0_i32_0 = arith.constant 0 : i32
    %c0_i32_1 = arith.constant 0 : i32
    return %arg0, %c0_i32, %c0_i32_0 : i32, i32, i32
  }
  func.func @transform_21(%arg0: i32) -> (i32, i32, i32) {
    %c0_i32 = arith.constant 0 : i32
    %c0_i32_0 = arith.constant 0 : i32
    %c0_i32_1 = arith.constant 0 : i32
    return %arg0, %c0_i32, %c0_i32_0 : i32, i32, i32
  }
  func.func @transform_22(%arg0: i32) -> (i32, i32, i32) {
    %c0_i32 = arith.constant 0 : i32
    %c0_i32_0 = arith.constant 0 : i32
    %c0_i32_1 = arith.constant 0 : i32
    return %arg0, %c0_i32, %c0_i32_0 : i32, i32, i32
  }
  func.func @transform_23(%arg0: i32) -> (i32, i32, i32) {
    %c0_i32 = arith.constant 0 : i32
    %c0_i32_0 = arith.constant 0 : i32
    %c0_i32_1 = arith.constant 0 : i32
    return %arg0, %c0_i32, %c0_i32_0 : i32, i32, i32
  }
  func.func @transform_24(%arg0: i32) -> (i32, i32, i32) {
    %c0_i32 = arith.constant 0 : i32
    %c0_i32_0 = arith.constant 0 : i32
    %c0_i32_1 = arith.constant 0 : i32
    return %arg0, %c0_i32, %c0_i32_0 : i32, i32, i32
  }
  func.func @transform_25(%arg0: i32) -> (i32, i32, i32) {
    %c0_i32 = arith.constant 0 : i32
    %c0_i32_0 = arith.constant 0 : i32
    %c0_i32_1 = arith.constant 0 : i32
    return %arg0, %c0_i32, %c0_i32_0 : i32, i32, i32
  }
  func.func @transform_26(%arg0: i32) -> (i32, i32, i32) {
    %c0_i32 = arith.constant 0 : i32
    %c0_i32_0 = arith.constant 0 : i32
    %c0_i32_1 = arith.constant 0 : i32
    return %arg0, %c0_i32, %c0_i32_0 : i32, i32, i32
  }
  func.func @transform_27(%arg0: i32) -> (i32, i32, i32) {
    %c0_i32 = arith.constant 0 : i32
    %c0_i32_0 = arith.constant 0 : i32
    %c0_i32_1 = arith.constant 0 : i32
    return %arg0, %c0_i32, %c0_i32_0 : i32, i32, i32
  }
  func.func @transform_28(%arg0: i32) -> (i32, i32, i32) {
    %c0_i32 = arith.constant 0 : i32
    %c0_i32_0 = arith.constant 0 : i32
    %c0_i32_1 = arith.constant 0 : i32
    %c0_i32_2 = arith.constant 0 : i32
    return %c0_i32, %c0_i32_0, %c0_i32_1 : i32, i32, i32
  }
  func.func @transform_29(%arg0: i32) -> (i32, i32, i32, i32) {
    %c0_i32 = arith.constant 0 : i32
    %c0_i32_0 = arith.constant 0 : i32
    %c0_i32_1 = arith.constant 0 : i32
    %c0_i32_2 = arith.constant 0 : i32
    return %arg0, %c0_i32, %c0_i32_0, %c0_i32_1 : i32, i32, i32, i32
  }
  func.func @transform_30(%arg0: i32) -> (i32, i32, i32, i32) {
    %c0_i32 = arith.constant 0 : i32
    %c0_i32_0 = arith.constant 0 : i32
    %c0_i32_1 = arith.constant 0 : i32
    %c0_i32_2 = arith.constant 0 : i32
    return %arg0, %c0_i32, %c0_i32_0, %c0_i32_1 : i32, i32, i32, i32
  }
}

</mosaic_0001>

<bundles_post_ra>
// kernel: tpu_custom_call.1
= control target key start
LH: loop header
LB: loop body
LE: loop exit
PB: predicated region body
PF: predicated region fallthrough
CT: control target
= control target key end

     0   :  { %s6898_s6 = smov 1   ;;  %s6899_s10 = smov 2   ;;  %s8011_s0 = inlined_call_operand.smem [shape: u32[31], index: -1, kind: input, shape index: {}] }
   0x1   :  { %s6958_s5 = sld [smem:[%s8011_s0]]   ;;  %s6900_s14 = smov 3  }
   0x2   :  { %s6963_s9 = sld [smem:[%s8011_s0 + %s6898_s6]]   ;;  %s6901_s18 = smov 4  }
   0x3   :  { %s6968_s13 = sld [smem:[%s8011_s0 + %s6899_s10]]   ;;  %s6902_s22 = smov 5  }
   0x4   :  { %s6973_s17 = sld [smem:[%s8011_s0 + %s6900_s14]]   ;;  %s6903_s26 = smov 6  }
   0x5   :  { %s6978_s21 = sld [smem:[%s8011_s0 + %s6901_s18]]   ;;  %s6904_s30 = smov 7  }
   0x6   :  { %s6983_s25 = sld [smem:[%s8011_s0 + %s6902_s22]]   ;;  %s6905_s4 = smov 8  }
   0x7   :  { %8048 = sst [smem:[#allocation22_spill]] %s6958_s5  ;;  %s6906_s10 = smov 9  }
   0x8   :  { %8049 = sst [smem:[#allocation23_spill]] %s6963_s9  ;;  %s6907_s15 = smov 10  }
   0x9   :  { %8050 = sst [smem:[#allocation24_spill]] %s6968_s13  ;;  %s6908_s20 = smov 11  }
   0xa   :  { %8051 = sst [smem:[#allocation25_spill]] %s6973_s17  ;;  %s6910_s1 = smov 13  }
   0xb   :  { %8052 = sst [smem:[#allocation26_spill]] %s6978_s21  ;;  %s6911_s7 = smov 14  }
   0xc   :  { %8053 = sst [smem:[#allocation27_spill]] %s6983_s25  ;;  %s6913_s22 = smov 16  }
   0xd   :  { %s6988_s29 = sld [smem:[%s8011_s0 + %s6903_s26]]   ;;  %s6909_s26 = smov 12  }
   0xe   :  { %s6993_s3 = sld [smem:[%s8011_s0 + %s6904_s30]]   ;;  %s6914_s28 = smov 17  }
   0xf   :  { %s6998_s8 = sld [smem:[%s8011_s0 + %s6905_s4]]  }
  0x10   :  { %s7003_s14 = sld [smem:[%s8011_s0 + %s6906_s10]]  }
  0x11   :  { %s7008_s19 = sld [smem:[%s8011_s0 + %s6907_s15]]   ;;  %s6912_s15 = smov 15  }
  0x12   :  { %s7013_s24 = sld [smem:[%s8011_s0 + %s6908_s20]]  }
  0x13   :  { %8054 = sst [smem:[#allocation28_spill]] %s6988_s29 }
  0x14   :  { %8055 = sst [smem:[#allocation29_spill]] %s6993_s3 }
  0x15   :  { %8056 = sst [smem:[#allocation30_spill]] %s6998_s8 }
  0x16   :  { %8057 = sst [smem:[#allocation31_spill]] %s7003_s14 }
  0x17   :  { %8058 = sst [smem:[#allocation32_spill]] %s7008_s19 }
  0x18   :  { %8059 = sst [smem:[#allocation33_spill]] %s7013_s24 }
  0x19   :  { %s7018_s30 = sld [smem:[%s8011_s0 + %s6909_s26]]  }
  0x1a   :  { %s7023_s6 = sld [smem:[%s8011_s0 + %s6910_s1]]  }
  0x1b   :  { %s7028_s12 = sld [smem:[%s8011_s0 + %s6911_s7]]   ;;  %s6915_s7 = smov 18  }
  0x1c   :  { %s7033_s20 = sld [smem:[%s8011_s0 + %s6912_s15]]   ;;  %s6916_s15 = smov 19  }
  0x1d   :  { %s7038_s27 = sld [smem:[%s8011_s0 + %s6913_s22]]   ;;  %s6917_s22 = smov 20  }
  0x1e   :  { %s7043_s4 = sld [smem:[%s8011_s0 + %s6914_s28]]   ;;  %s6918_s28 = smov 21  }
  0x1f   :  { %8060 = sst [smem:[#allocation34_spill]] %s7018_s30 }
  0x20   :  { %8061 = sst [smem:[#allocation35_spill]] %s7023_s6 }
  0x21   :  { %8062 = sst [smem:[#allocation36_spill]] %s7028_s12 }
  0x22   :  { %8063 = sst [smem:[#allocation37_spill]] %s7033_s20 }
  0x23   :  { %8064 = sst [smem:[#allocation38_spill]] %s7038_s27 }
  0x24   :  { %8065 = sst [smem:[#allocation39_spill]] %s7043_s4 }
  0x25   :  { %s7048_s6 = sld [smem:[%s8011_s0 + %s6915_s7]]   ;;  %s6919_s7 = smov 22  }
  0x26   :  { %s7053_s20 = sld [smem:[%s8011_s0 + %s6916_s15]]   ;;  %s6920_s15 = smov 23  }
  0x27   :  { %s7058_s24 = sld [smem:[%s8011_s0 + %s6917_s22]]   ;;  %s6921_s22 = smov 24  }
  0x28   :  { %s7063_s4 = sld [smem:[%s8011_s0 + %s6918_s28]]   ;;  %s6922_s28 = smov 25  }
  0x29   :  { %s7068_s19 = sld [smem:[%s8011_s0 + %s6919_s7]]   ;;  %s6923_s7 = smov 26  }
  0x2a   :  { %s7088_s14 = sld [smem:[%s8011_s0 + %s6923_s7]]   ;;  %s6927_s7 = smov 30  }
  0x2b   :  { %8066 = sst [smem:[#allocation40_spill]] %s7048_s6 }
  0x2c   :  { %8067 = sst [smem:[#allocation41_spill]] %s7053_s20 }
  0x2d   :  { %8068 = sst [smem:[#allocation42_spill]] %s7058_s24 }
  0x2e   :  { %8069 = sst [smem:[#allocation43_spill]] %s7063_s4 }
  0x2f   :  { %8070 = sst [smem:[#allocation44_spill]] %s7068_s19 }
  0x30   :  { %s7073_s20 = sld [smem:[%s8011_s0 + %s6920_s15]]   ;;  %s6924_s15 = smov 27  }
  0x31   :  { %s7078_s24 = sld [smem:[%s8011_s0 + %s6921_s22]]   ;;  %s6925_s22 = smov 28  }
  0x32   :  { %s7083_s4 = sld [smem:[%s8011_s0 + %s6922_s28]]   ;;  %s6926_s28 = smov 29  }
  0x33   :  { %8074 = sst [smem:[#allocation48_spill]] %s7088_s14 }
  0x34   :  { %s7108_s14 = sld [smem:[%s8011_s0 + %s6927_s7]]  }
  0x36   :  { %8071 = sst [smem:[#allocation45_spill]] %s7073_s20 }
  0x37   :  { %8072 = sst [smem:[#allocation46_spill]] %s7078_s24 }
  0x38   :  { %8073 = sst [smem:[#allocation47_spill]] %s7083_s4 }
  0x39   :  { %s7093_s20 = sld [smem:[%s8011_s0 + %s6924_s15]]  }
  0x3a   :  { %s7098_s24 = sld [smem:[%s8011_s0 + %s6925_s22]]  }
  0x3b   :  { %s7103_s4 = sld [smem:[%s8011_s0 + %s6926_s28]]  }
  0x3c   :  { %8078 = sst [smem:[#allocation52_spill]] %s7108_s14 }
  0x3f   :  { %8075 = sst [smem:[#allocation49_spill]] %s7093_s20 }
  0x40   :  { %8076 = sst [smem:[#allocation50_spill]] %s7098_s24 }
  0x41   :  { %8077 = sst [smem:[#allocation51_spill]] %s7103_s4 }
  0x42   :  { %67 = vsyncpa [#allocation3], 0 }
  0x43   :  { %68 = vsyncpa [#allocation6], 0 }
  0x44   :  { %69 = vsyncpa [#allocation4], 0 }
  0x45   :  { %70 = vsyncpa [#allocation15], 0 }
  0x46   :  { %72 = vsyncpa [#allocation15 + $0x1], 0  ;;  %s7110_s15 = smov 0   ;;  %s7112_s16 = smov 0  }
  0x47   :  { %s7114_s18 = smov 0   ;;  %s7116_s22 = smov 0  }
  0x48 LB: > { %s8079_s30 = sld [smem:[#allocation34_spill]]  ;;  %s7129_s0 = sadd.s32 4294967295, %s6896_s22   ;;  %s6888_s16 = sphi %s7112_s16, %s8180_s16   ;;  %s6884_s15 = sphi %s7110_s15, %s8179_s15   ;;  %s6896_s22 = sphi %s7116_s22, %s8178_s22   ;;  %s6892_s18 = sphi %s7114_s18, %s8181_s18  }
  0x49   : > { %s8080_s27 = sld [smem:[#allocation38_spill]]  ;;  %s8012_s23 = sadd.s32 4294967294, %s6896_s22  }
  0x4a   : > { %s8081_s19 = sld [smem:[#allocation44_spill]]  ;;  %s7133_s26 = sadd.s32 1, %s6896_s22  }
  0x4b   : > { %s8082_s12 = sld [smem:[#allocation36_spill]]  ;;  %s283_s28 = sadd.s32 1, %s6892_s18 }
  0x4c   : > { %s8083_s6 = sld [smem:[#allocation40_spill]]  ;;  %s280_s1 = ssub.s32 %s6896_s22, %s7133_s26 }
  0x4d   : > { %s8084_s8 = sld [smem:[#allocation30_spill]]  ;;  %p290_p0 = scmp.ne.s32.totalorder %s6892_s18, %s6888_s16 }
  0x4e   : > { %8085 = sst [smem:[#allocation53_spill]] %s6888_s16  ;;  %p281_p1 = scmp.eq.s32.totalorder %s280_s1, 0 }
  0x4f   : > { %8086 = sst [smem:[#allocation54_spill]] %s6892_s18  ;;  %p291_p2 = scmp.eq.s32.totalorder %s6896_s22, 0 }
  0x50   : > { %8087 = sst [smem:[#allocation55_spill]] %s6896_s22  ;;  %p296_p3 = scmp.ne.s32.totalorder %s6888_s16, %s6884_s15 }
  0x51   : > { %8088 = sst [smem:[#allocation56_spill]] %s7129_s0  ;;  %p8027_p4 = scmp.eq.s32.totalorder %s7129_s0, 0 }
  0x52   : > { %8089 = sst [smem:[#allocation57_spill]] %s7133_s26  ;;  %p7146_p5 = por %p291_p2, %p290_p0 }
  0x53   : > { %s7144_s2 = scalar_select %p281_p1, %s6892_s18, %s283_s28  }
  0x54   : > { %p7152_p6 = por %p8027_p4, %p296_p3  ;;  %p8016_p7 = scmp.eq.s32.totalorder %s7129_s0, 1 }
  0x55   : > { %8090 = sst [smem:[#allocation58_spill]] %s7144_s2  ;;  %p841_p8 = scmp.eq.s32.totalorder %s8012_s23, 1 }
  0x56   : > { %s8092_s10 = scalar_select %p7152_p6, 1, 0 }
  0x57   : > { %p5769_p9 = scmp.ge.s32.totalorder %s6896_s22, 1  ;;  %p874_p10 = scmp.lt.s32.totalorder %s6896_s22, 3 }
  0x58   : > { %p7163_p11 = por %p8016_p7, %p290_p0  ;;  %p7167_p12 = por %p841_p8, %p296_p3 }
  0x59   : > { %p7171_p13 = pnand %p5769_p9, %p874_p10  ;;  %s6928_s1 = smov [#allocation2]  }
  0x5a   : > { %s8093_s11 = scalar_select %p7163_p11, 1, 0 }
  0x5b   : > { %s8095_s15 = scalar_select %p7167_p12, 1, 0 }
  0x5c   : > { %8094 = sst [smem:[#allocation59_spill]] %s8093_s11  ;;  %p6351_p2 = pneg %p7171_p13 }
  0x5d   : > { %8096 = sst [smem:[#allocation60_spill]] %s8095_s15  ;;  %s886_s23 = sshll.u32 %s6928_s1, 4  ;;  %s887_s23 = int_to_ptr.vmem [resolvable:$true] %s886_s23 }
  0x5e   : > { %s8097_s28 = scalar_select %p7171_p13, 1, 0 }
  0x5f   : > { %p7180_p0 = pnand %p6351_p2, %p8027_p4  ;;  %p6386_p8 = scmp.lt.s32.totalorder %s6896_s22, 2 }
  0x60   : > { %s955_s26 = sand.u32 1, %s6896_s22   ;;  %s6561_s15 = scalar_lea.vmem %s887_s23, 256 }
  0x61   : > { %s8098_s2 = scalar_select %p7180_p0, 1, 0 }
  0x62   : > { %p8028_p9 = pneg %p7180_p0  ;;  %p6562_p10 = scmp.ne.s32.totalorder %s887_s23, %s6561_s15 }
  0x63   : > { %p6569_p12 = scmp.lt.s32.totalorder %s887_s23, %s887_s23  ;;  %p6570_p11 = scmp.lt.s32.totalorder %s6561_s15, %s6561_s15 }
  0x64   : > { %p6564_p7 = pnand %p6562_p10, %p8028_p9 }
  0x65   : > { %p6571_p6 = por %p6570_p11, %p6569_p12 }
  0x66   : > { %p6565_p1 = pneg %p6564_p7 }
  0x68   : > { %p6572_p2 = pnand %p6571_p6, %p6565_p1 }
  0x6a   : > { %6575 = shalt.err (!%p6572_p2)
}
  0x6b   : > { %s8023_s1 = smov 128   ;;  %s8099_s5 = sld [smem:[#allocation22_spill]] }
  0x6c   : > { %s8025_s24 = smov 8   ;;  %p7202_p6 = pnand %p6386_p8, %p7146_p5 }
  0x6d   : > { %s957_s14 = sand.u32 1, %s6892_s18   ;;  %s7210_s4 = sshll.u32 %s6896_s22, 9 }
  0x6e   : > { %s7207_s11 = sshll.u32 %s957_s14, 5  ;;  %s7214_s20 = scalar_lea.hbm %s8084_s8, %s7210_s4 }
  0x6f   : > { %p7225_p7 = pneg %p7202_p6  ;;  %p6582_p1 = scmp.lt.s32.totalorder %s7214_s20, %s8084_s8 }
  0x71   : > { %6354 = dma.hbm_to_vmem [thread:$0]  (!%p7180_p0), %s8099_s5, 256, %s887_s23, [#allocation3], %s8023_s1, %s8023_s1, %s8025_s24  }
  0x72   : > { %s959_s23 = scalar_lea.vmem [#allocation7], %s7207_s11  ;;  %s7219_s1 = scalar_lea.sflag [#allocation3], %s955_s26 }
  0x73   : > { %s966_s7 = sshll.u32 %s959_s23, 4  ;;  %s6576_s24 = scalar_lea.hbm %s7214_s20, 512  ;;  %s7217_s7 = int_to_ptr.vmem [resolvable:$true] %s966_s7 }
  0x74   : > { %p6577_p5 = scmp.ne.s32.totalorder %s7214_s20, %s6576_s24  ;;  %s6581_s5 = scalar_lea.hbm %s8084_s8, 1024 }
  0x75   : > { %p6583_p8 = scmp.lt.s32.totalorder %s6581_s5, %s6576_s24 }
  0x76   : > { %p6579_p11 = pnand %p7225_p7, %p6577_p5 }
  0x77   : > { %p6584_p10 = por %p6583_p8, %p6582_p1 }
  0x78   : > { %p6580_p12 = pneg %p6579_p11 }
  0x7a   : > { %p6585_p2 = pnand %p6584_p10, %p6580_p12 }
  0x7c   : > { %6588 = shalt.err (!%p6585_p2)
}
  0x7d   : > { %s6589_s26 = scalar_lea.vmem %s7217_s7, 512  ;;  %s6931_s23 = smov [#allocation7]  }
  0x7e   : > { %p6590_p3 = scmp.ne.s32.totalorder %s7217_s7, %s6589_s26  ;;  %s6594_s18 = sshll.u32 %s6931_s23, 4  ;;  %s6595_s18 = int_to_ptr.vmem [resolvable:$false] %s6594_s18 }
  0x7f   : > { %s6596_s22 = scalar_lea.vmem %s6595_s18, 1024  ;;  %p6597_p5 = scmp.lt.s32.totalorder %s7217_s7, %s6595_s18 }
  0x80   : > { %p6592_p4 = pnand %p6590_p3, %p7225_p7  ;;  %p6598_p11 = scmp.lt.s32.totalorder %s6596_s22, %s6589_s26 }
  0x82   : > { %p6593_p9 = pneg %p6592_p4  ;;  %p6599_p13 = por %p6598_p11, %p6597_p5 }
  0x84   : > { %p6600_p0 = pnand %p6599_p13, %p6593_p9 }
  0x86   : > { %6603 = shalt.err (!%p6600_p0)
}
  0x87   : > { %s8102_s5 = smov 8   ;;  %s8103_s24 = smov 128  }
  0x88   : > { %6361 = dma.hbm_to_vmem [thread:$0]  (!%p7202_p6), %s7214_s20, 512, %s7217_s7, %s7219_s1, %s8103_s24, %s8103_s24, %s8102_s5  }
  0x89   : > { %s7249_s18 = scalar_lea.hbm %s8079_s30, %s7210_s4  ;;  %s998_s22 = scalar_lea.vmem [#allocation8], %s7207_s11 }
  0x8a   : > { %s1005_s26 = sshll.u32 %s998_s22, 4  ;;  %s6604_s23 = scalar_lea.hbm %s7249_s18, 512  ;;  %s1006_s26 = int_to_ptr.vmem [resolvable:$true] %s1005_s26 }
  0x8b   : > { %p6605_p4 = scmp.ne.s32.totalorder %s7249_s18, %s6604_s23  ;;  %s6609_s8 = scalar_lea.hbm %s8079_s30, 1024 }
  0x8c   : > { %p6610_p3 = scmp.lt.s32.totalorder %s7249_s18, %s8079_s30  ;;  %p6611_p9 = scmp.lt.s32.totalorder %s6609_s8, %s6604_s23 }
  0x8d   : > { %p6607_p13 = pnand %p6605_p4, %p7225_p7 }
  0x8e   : > { %p6612_p12 = por %p6611_p9, %p6610_p3 }
  0x8f   : > { %p6608_p0 = pneg %p6607_p13 }
  0x91   : > { %p6613_p1 = pnand %p6612_p12, %p6608_p0 }
  0x93   : > { %6616 = shalt.err (!%p6613_p1)
}
  0x94   : > { %s6617_s20 = scalar_lea.vmem %s1006_s26, 512  ;;  %s6932_s7 = smov [#allocation8]  }
  0x95   : > { %p6618_p8 = scmp.ne.s32.totalorder %s1006_s26, %s6617_s20  ;;  %s6622_s22 = sshll.u32 %s6932_s7, 4  ;;  %s6623_s22 = int_to_ptr.vmem [resolvable:$false] %s6622_s22 }
  0x96   : > { %s6624_s3 = scalar_lea.vmem %s6623_s22, 1024  ;;  %p6625_p5 = scmp.lt.s32.totalorder %s1006_s26, %s6623_s22 }
  0x97   : > { %p6620_p10 = pnand %p6618_p8, %p7225_p7  ;;  %p6626_p11 = scmp.lt.s32.totalorder %s6624_s3, %s6617_s20 }
  0x99   : > { %p6621_p2 = pneg %p6620_p10  ;;  %p6627_p4 = por %p6626_p11, %p6625_p5 }
  0x9b   : > { %p6628_p13 = pnand %p6627_p4, %p6621_p2 }
  0x9d   : > { %6631 = shalt.err (!%p6628_p13)
}
  0x9e   : > { %6364 = dma.hbm_to_vmem [thread:$0]  (!%p7202_p6), %s7249_s18, 512, %s1006_s26, %s7219_s1, %s8103_s24, %s8103_s24, %s8102_s5  }
  0x9f   : > { %s7270_s8 = scalar_lea.hbm %s8082_s12, %s7210_s4  ;;  %s1025_s3 = scalar_lea.vmem [#allocation9], %s7207_s11 }
  0xa0   : > { %s1032_s23 = sshll.u32 %s1025_s3, 4  ;;  %s6632_s20 = scalar_lea.hbm %s7270_s8, 512  ;;  %s1033_s23 = int_to_ptr.vmem [resolvable:$true] %s1032_s23 }
  0xa1   : > { %p6633_p0 = scmp.ne.s32.totalorder %s7270_s8, %s6632_s20  ;;  %s6637_s7 = scalar_lea.hbm %s8082_s12, 1024 }
  0xa2   : > { %p6638_p12 = scmp.lt.s32.totalorder %s7270_s8, %s8082_s12  ;;  %p6639_p1 = scmp.lt.s32.totalorder %s6637_s7, %s6632_s20 }
  0xa3   : > { %p6635_p3 = pnand %p6633_p0, %p7225_p7 }
  0xa4   : > { %p6640_p8 = por %p6639_p1, %p6638_p12 }
  0xa5   : > { %p6636_p9 = pneg %p6635_p3 }
  0xa7   : > { %p6641_p10 = pnand %p6640_p8, %p6636_p9 }
  0xa9   : > { %6644 = shalt.err (!%p6641_p10)
}
  0xaa   : > { %s6645_s18 = scalar_lea.vmem %s1033_s23, 512  ;;  %s6933_s26 = smov [#allocation9]  }
  0xab   : > { %p6646_p2 = scmp.ne.s32.totalorder %s1033_s23, %s6645_s18  ;;  %s6650_s22 = sshll.u32 %s6933_s26, 4  ;;  %s6651_s22 = int_to_ptr.vmem [resolvable:$false] %s6650_s22 }
  0xac   : > { %s6652_s3 = scalar_lea.vmem %s6651_s22, 1024  ;;  %p6653_p4 = scmp.lt.s32.totalorder %s1033_s23, %s6651_s22 }
  0xad   : > { %p6648_p5 = pnand %p6646_p2, %p7225_p7  ;;  %p6654_p13 = scmp.lt.s32.totalorder %s6652_s3, %s6645_s18 }
  0xaf   : > { %p6649_p11 = pneg %p6648_p5  ;;  %p6655_p0 = por %p6654_p13, %p6653_p4 }
  0xb1   : > { %p6656_p3 = pnand %p6655_p0, %p6649_p11 }
  0xb3   : > { %6659 = shalt.err (!%p6656_p3)
}
  0xb4   : > { %6367 = dma.hbm_to_vmem [thread:$0]  (!%p7202_p6), %s7270_s8, 512, %s1033_s23, %s7219_s1, %s8103_s24, %s8103_s24, %s8102_s5  }
  0xb5   : > { %s7291_s20 = scalar_lea.hbm %s8080_s27, %s7210_s4  ;;  %s1052_s7 = scalar_lea.vmem [#allocation10], %s7207_s11 }
  0xb6   : > { %s1059_s18 = sshll.u32 %s1052_s7, 4  ;;  %s6660_s26 = scalar_lea.hbm %s7291_s20, 512  ;;  %s1060_s18 = int_to_ptr.vmem [resolvable:$true] %s1059_s18 }
  0xb7   : > { %p6661_p9 = scmp.ne.s32.totalorder %s7291_s20, %s6660_s26  ;;  %s6665_s22 = scalar_lea.hbm %s8080_s27, 1024 }
  0xb8   : > { %p6666_p8 = scmp.lt.s32.totalorder %s7291_s20, %s8080_s27  ;;  %p6667_p10 = scmp.lt.s32.totalorder %s6665_s22, %s6660_s26 }
  0xb9   : > { %p6663_p12 = pnand %p6661_p9, %p7225_p7 }
  0xba   : > { %p6668_p2 = por %p6667_p10, %p6666_p8 }
  0xbb   : > { %p6664_p1 = pneg %p6663_p12 }
  0xbd   : > { %p6669_p5 = pnand %p6668_p2, %p6664_p1 }
  0xbf   : > { %6672 = shalt.err (!%p6669_p5)
}
  0xc0   : > { %s6673_s8 = scalar_lea.vmem %s1060_s18, 512  ;;  %s6934_s23 = smov [#allocation10]  }
  0xc1   : > { %p6674_p11 = scmp.ne.s32.totalorder %s1060_s18, %s6673_s8  ;;  %s6678_s3 = sshll.u32 %s6934_s23, 4  ;;  %s6679_s3 = int_to_ptr.vmem [resolvable:$false] %s6678_s3 }
  0xc2   : > { %s6680_s7 = scalar_lea.vmem %s6679_s3, 1024  ;;  %p6681_p0 = scmp.lt.s32.totalorder %s1060_s18, %s6679_s3 }
  0xc3   : > { %p6676_p4 = pnand %p6674_p11, %p7225_p7  ;;  %p6682_p3 = scmp.lt.s32.totalorder %s6680_s7, %s6673_s8 }
  0xc5   : > { %p6677_p13 = pneg %p6676_p4  ;;  %p6683_p9 = por %p6682_p3, %p6681_p0 }
  0xc7   : > { %p6684_p12 = pnand %p6683_p9, %p6677_p13 }
  0xc9   : > { %6687 = shalt.err (!%p6684_p12)
}
  0xca   : > { %6370 = dma.hbm_to_vmem [thread:$0]  (!%p7202_p6), %s7291_s20, 512, %s1060_s18, %s7219_s1, %s8103_s24, %s8103_s24, %s8102_s5  }
  0xcb   : > { %s7312_s26 = scalar_lea.hbm %s8083_s6, %s7210_s4  ;;  %s1079_s22 = scalar_lea.vmem [#allocation11], %s7207_s11 }
  0xcc   : > { %s1086_s8 = sshll.u32 %s1079_s22, 4  ;;  %s6688_s23 = scalar_lea.hbm %s7312_s26, 512  ;;  %s1087_s8 = int_to_ptr.vmem [resolvable:$true] %s1086_s8 }
  0xcd   : > { %p6689_p1 = scmp.ne.s32.totalorder %s7312_s26, %s6688_s23  ;;  %s6693_s3 = scalar_lea.hbm %s8083_s6, 1024 }
  0xce   : > { %p6694_p2 = scmp.lt.s32.totalorder %s7312_s26, %s8083_s6  ;;  %p6695_p5 = scmp.lt.s32.totalorder %s6693_s3, %s6688_s23 }
  0xcf   : > { %p6691_p8 = pnand %p6689_p1, %p7225_p7 }
  0xd0   : > { %p6696_p11 = por %p6695_p5, %p6694_p2 }
  0xd1   : > { %p6692_p10 = pneg %p6691_p8 }
  0xd3   : > { %p6697_p4 = pnand %p6696_p11, %p6692_p10 }
  0xd5   : > { %6700 = shalt.err (!%p6697_p4)
}
  0xd6   : > { %s6701_s20 = scalar_lea.vmem %s1087_s8, 512  ;;  %s6935_s18 = smov [#allocation11]  }
  0xd7   : > { %p6702_p13 = scmp.ne.s32.totalorder %s1087_s8, %s6701_s20  ;;  %s6706_s7 = sshll.u32 %s6935_s18, 4  ;;  %s6707_s7 = int_to_ptr.vmem [resolvable:$false] %s6706_s7 }
  0xd8   : > { %s6708_s22 = scalar_lea.vmem %s6707_s7, 1024  ;;  %p6709_p9 = scmp.lt.s32.totalorder %s1087_s8, %s6707_s7 }
  0xd9   : > { %p6704_p0 = pnand %p6702_p13, %p7225_p7  ;;  %p6710_p12 = scmp.lt.s32.totalorder %s6708_s22, %s6701_s20 }
  0xdb   : > { %p6705_p3 = pneg %p6704_p0  ;;  %p6711_p1 = por %p6710_p12, %p6709_p9 }
  0xdd   : > { %p6712_p8 = pnand %p6711_p1, %p6705_p3 }
  0xdf   : > { %6715 = shalt.err (!%p6712_p8)
}
  0xe0   : > { %6373 = dma.hbm_to_vmem [thread:$0]  (!%p7202_p6), %s7312_s26, 512, %s1087_s8, %s7219_s1, %s8103_s24, %s8103_s24, %s8102_s5  }
  0xe1   : > { %s6936_s23 = smov [#allocation5]   ;;  %s7333_s18 = scalar_lea.hbm %s8081_s19, %s7210_s4 }
  0xe2   : > { %s899_s3 = sshll.u32 %s6936_s23, 4  ;;  %p8104_p2 = scmp.ne.s32.totalorder %s8098_s2, 0  ;;  %s900_s3 = int_to_ptr.vmem [resolvable:$true] %s899_s3 }
  0xe3   : > { %s6727_s20 = scalar_lea.vmem %s900_s3, 256  ;;  %p6735_p13 = scmp.lt.s32.totalorder %s900_s3, %s900_s3 }
  0xe4   : > { %p6728_p10 = scmp.ne.s32.totalorder %s900_s3, %s6727_s20  ;;  %p8105_p5 = pneg %p8104_p2 }
  0xe5   : > { %p6736_p0 = scmp.lt.s32.totalorder %s6727_s20, %s6727_s20 }
  0xe6   : > { %p6730_p11 = pnand %p6728_p10, %p8105_p5 }
  0xe7   : > { %p6737_p3 = por %p6736_p0, %p6735_p13 }
  0xe8   : > { %p6731_p4 = pneg %p6730_p11 }
  0xea   : > { %p6738_p9 = pnand %p6737_p3, %p6731_p4 }
  0xec   : > { %6741 = shalt.err (!%p6738_p9)
}
  0xed   : > { %s8106_s9 = sld [smem:[#allocation23_spill]]  ;;  %s1118_s4 = scalar_lea.vmem [#allocation12], %s7207_s11 }
  0xee   : > { %s1125_s26 = sshll.u32 %s1118_s4, 4  ;;  %s6742_s8 = scalar_lea.hbm %s7333_s18, 512  ;;  %s1126_s26 = int_to_ptr.vmem [resolvable:$true] %s1125_s26 }
  0xef   : > { %p6743_p12 = scmp.ne.s32.totalorder %s7333_s18, %s6742_s8  ;;  %s6747_s2 = scalar_lea.hbm %s8081_s19, 1024 }
  0xf0   : > { %p6748_p10 = scmp.lt.s32.totalorder %s7333_s18, %s8081_s19  ;;  %p6749_p5 = scmp.lt.s32.totalorder %s6747_s2, %s6742_s8 }
  0xf1   : > { %p6745_p1 = pnand %p6743_p12, %p7225_p7 }
  0xf2   : > { %p6750_p11 = por %p6749_p5, %p6748_p10 }
  0xf3   : > { %6357 = dma.hbm_to_vmem [thread:$0]  (!%p8104_p2), %s8106_s9, 256, %s900_s3, [#allocation6], %s8103_s24, %s8103_s24, %s8102_s5  }
  0xf4   : > { %p6746_p8 = pneg %p6745_p1 }
  0xf6   : > { %p6751_p4 = pnand %p6750_p11, %p6746_p8 }
  0xf8   : > { %6754 = shalt.err (!%p6751_p4)
}
  0xf9   : > { %s6755_s7 = scalar_lea.vmem %s1126_s26, 512  ;;  %s6937_s11 = smov [#allocation12]  }
  0xfa   : > { %p6756_p13 = scmp.ne.s32.totalorder %s1126_s26, %s6755_s7  ;;  %s6760_s22 = sshll.u32 %s6937_s11, 4  ;;  %s6761_s22 = int_to_ptr.vmem [resolvable:$false] %s6760_s22 }
  0xfb   : > { %s6762_s23 = scalar_lea.vmem %s6761_s22, 1024  ;;  %p6763_p3 = scmp.lt.s32.totalorder %s1126_s26, %s6761_s22 }
  0xfc   : > { %p6758_p0 = pnand %p6756_p13, %p7225_p7  ;;  %p6764_p9 = scmp.lt.s32.totalorder %s6762_s23, %s6755_s7 }
  0xfe   : > { %p6759_p2 = pneg %p6758_p0  ;;  %p6765_p12 = por %p6764_p9, %p6763_p3 }
 0x100   : > { %p6766_p1 = pnand %p6765_p12, %p6759_p2 }
 0x102   : > { %6769 = shalt.err (!%p6766_p1)
}
 0x103   : > { %6376 = dma.hbm_to_vmem [thread:$0]  (!%p7202_p6), %s7333_s18, 512, %s1126_s26, %s7219_s1, %s8103_s24, %s8103_s24, %s8102_s5  }
 0x104   : > { %p8107_p7 = scmp.ne.s32.totalorder %s8097_s28, 0 }
 0x106   : > { %1169 = sbr.rel (%p8107_p7) target bundleno = 3930 (0xf5a), region = 132 }
 0x10b   : > { %p8108_p8 = scmp.eq.s32.totalorder %s7129_s0, 0 }
 0x10d   : > { %6863 = dma.done.wait (%p8108_p8), [#allocation3], 256   ;;  %p8109_p10 = pmov %p8108_p8 }
 0x10e   : > { %p8110_p5 = pmov %p8108_p8 }
 0x10f   : > { %6865 = vsyncadd (%p8109_p10), [#allocation3], 4294967040 }
 0x110   : > { %6867 = dma.done.wait (%p8110_p5), [#allocation6], 256   ;;  %p8111_p11 = pmov %p8110_p5 }
 0x111   : > { %s8036_s1 = sand.u32 1, %s7129_s0   ;;  %s1181_s15 = sand.u32 1, %s6888_s16  }
 0x112   : > { %6869 = vsyncadd (%p8111_p11), [#allocation6], 4294967040  ;;  %s7373_s28 = sshll.u32 %s1181_s15, 5  ;;  %s1180_s14 = scalar_lea.sflag [#allocation3], %s8036_s1 }
 0x113   : > { %s7378_s5 = scalar_lea.vmem [#allocation7], %s7373_s28  ;;  %p8113_p6 = scmp.ne.s32.totalorder %s8092_s10, 0 }
 0x114   : > { %8112 = sst [smem:[#allocation61_spill]] %s7378_s5 }
 0x115   : > { %6871 = dma.done.wait (%p8113_p6), %s1180_s14, 3072  }
 0x116   : > { %6873 = vsyncadd (%p8113_p6), %s1180_s14, 4294964224  ;;  %s8115_s13 = sld [smem:[#allocation24_spill]]  ;;  %s7384_s2 = sshll.u32 %s1181_s15, 6 }
 0x117   : > { %s8116_s21 = sld [smem:[#allocation26_spill]]  ;;  %p1403_p4 = scmp.lt.s32.totalorder %s7129_s0, 1 }
 0x118   : > { %s8118_s29 = sld [smem:[#allocation28_spill]] }
 0x119   : > { %s8121_s18 = sld [smem:[#allocation32_spill]] }
 0x11a   : > { %s8122_s20 = sld [smem:[#allocation33_spill]] }
 0x11b   : > { %s8123_s4 = sld [smem:[#allocation35_spill]] }
 0x11c   : > { %s8124_s26 = sld [smem:[#allocation37_spill]] }
 0x11d   : > { %s8125_s8 = sld [smem:[#allocation39_spill]] }
 0x11e   : > { %s8126_s7 = sld [smem:[#allocation41_spill]] }
 0x11f   : > { %s8127_s10 = sld [smem:[#allocation42_spill]] }
 0x120   : > { %s7388_s11 = scalar_select %p1403_p4, %s7129_s0, 1 }
 0x121   : > { %s8128_s22 = sld [smem:[#allocation43_spill]] }
 0x122   : > { %s5911_s23 = sshll.u32 %s7388_s11, 5  ;;  %s8129_s15 = sld [smem:[#allocation45_spill]] }
 0x123   : > { %s7394_s1 = scalar_lea.vmem %s8115_s13, %s5911_s23  ;;  %s8130_s6 = sld [smem:[#allocation46_spill]] }
 0x124   : > { %s7397_s9 = scalar_lea.vmem %s8116_s21, %s5911_s23  ;;  %s8132_s19 = sld [smem:[#allocation47_spill]] }
 0x125   : > { %8131 = sst [smem:[#allocation62_spill]] %s7397_s9  ;;  %s7402_s27 = scalar_lea.vmem %s8118_s29, %s5911_s23 }
 0x126   : > { %8133 = sst [smem:[#allocation63_spill]] %s7402_s27  ;;  %s1432_s14 = scalar_lea.vmem %s8121_s18, %s7388_s11 }
 0x127   : > { %s8134_s30 = sld [smem:[#allocation48_spill]]  ;;  %s1435_s13 = scalar_lea.vmem %s8122_s20, %s7388_s11 }
 0x128   : > { %s8135_s5 = sld [smem:[#allocation49_spill]]  ;;  %s1438_s17 = scalar_lea.vmem %s8123_s4, %s7388_s11 }
 0x129   : > { %s1441_s21 = scalar_lea.vmem %s8124_s26, %s7388_s11  ;;  %s1444_s12 = scalar_lea.vmem %s8125_s8, %s7388_s11 }
 0x12a   : > { %s1447_s25 = scalar_lea.vmem %s8126_s7, %s7388_s11  ;;  %s1450_s23 = scalar_lea.vmem %s8127_s10, %s7388_s11 }
 0x12b   : > { %s1453_s29 = scalar_lea.vmem %s8128_s22, %s7388_s11  ;;  %s1456_s27 = scalar_lea.vmem %s8129_s15, %s7388_s11 }
 0x12c   : > { %s5914_s24 = sshll.u32 %s7388_s11, 6  ;;  %s1464_s9 = scalar_lea.vmem %s8132_s19, %s7388_s11 }
 0x12d   : > { %s7428_s16 = scalar_lea.vmem %s8130_s6, %s5914_s24  ;;  %s1467_s3 = scalar_lea.vmem %s8134_s30, %s7388_s11 }
 0x12e   : > { %s1470_s0 = scalar_lea.vmem %s8135_s5, %s7388_s11  ;;  %s7437_s18 = scalar_lea.vmem [#allocation8], %s7373_s28 }
 0x12f   : > { %s7440_s20 = scalar_lea.vmem [#allocation9], %s7373_s28  ;;  %s7443_s4 = scalar_lea.vmem [#allocation10], %s7373_s28 }
 0x130   : > { %s7446_s26 = scalar_lea.vmem [#allocation11], %s7373_s28  ;;  %s7449_s8 = scalar_lea.vmem [#allocation12], %s7373_s28 }
 0x131   : > { %s7452_s7 = scalar_lea.vmem [#allocation14], %s7384_s2  ;;  %s7455_s10 = scalar_lea.vmem [#allocation16], %s7384_s2 }
 0x132   : > { %s8136_s22 = sld [smem:[#allocation56_spill]] }
 0x138   : > { %p8137_p13 = scmp.ne.s32.totalorder %s8136_s22, 0 }
 0x13a   : > { %1474 = sbr.rel (%p8137_p13) target bundleno = 321 (0x141), region = 168 }
 0x13f   : > { %v1475_v0 = vld [vmem:[#allocation2] sm:$0xff]  ;;  %vm1477_vm0 = vcmask 261120   ;;  %v1476_v1 = vld [vmem:[#allocation2 + $0x8] sm:$0xff] }
 0x140   : > { %1478 = vst.msk [vmem:[#allocation13] sm:$0xff] %vm1477_vm0, %v1475_v0  ;;  %1479 = vst.msk [vmem:[#allocation13 + $0x8] sm:$0xff] %vm1477_vm0, %v1476_v1 }
 0x141 PF: > { %s8138_s19 = sld [smem:[#allocation62_spill]]  ;;  %v1487_v2 = vld [vmem:[%s7394_s1 + $0x18] sm:$0xff]  ;;  %v1486_v3 = vld [vmem:[%s7394_s1 + $0x10] sm:$0xff]  ;;  %vm1510_vm1 = vcmask 261120   ;;  %v1485_v5 = vld [vmem:[%s7394_s1 + $0x8] sm:$0xff]  ;;  %v6938_v12 = vmov 0.0  }
 0x142   : > { %6045 = vmatprep.subr.mxu1 %v1487_v2  ;;  %v1484_v6 = vld [vmem:[%s7394_s1] sm:$0xff]  ;;  %s8139_s30 = sld [smem:[#allocation63_spill]]  ;;  %vm6939_vm2 = vmmov 0   ;;  %s6940_s5 = smov 104   ;;  %vm1802_vm3 = vcmask 64512   ;;  %vm3101_vm4 = vcmask 130048  }
 0x143   : > { %6046 = vmatpush3.msra.mxu1 %v1487_v2  ;;  %s8140_s6 = sld [smem:[#allocation25_spill]]  ;;  %s6941_s2 = smov 120   ;;  %vm3104_vm5 = vcmask 195584   ;;  %vm5118_vm6 = vcmask 523264  }
 0x144   : > { %6047 = vmatprep.subr.mxu1 %v1486_v3  ;;  %s8141_s1 = sld [smem:[#allocation27_spill]]  ;;  %s6942_s24 = smov 112  }
 0x145   : > { %6048 = vmatpush3.msra.mxu1 %v1486_v3  ;;  %s8144_s22 = sld [smem:[#allocation29_spill]] }
 0x146   : > { %6049 = vmatprep.subr.mxu1 %v1485_v5 }
 0x147   : > { %v7461_v4 = vld [vmem:[#allocation13] sm:$0xff]  ;;  %6050 = vmatpush3.msra.mxu1 %v1485_v5  ;;  %v7469_v7 = vld [vmem:[#allocation13 + $0x8] sm:$0xff]  ;;  %v1492_v8 = vld [vmem:[%s8138_s19 + $0x18] sm:$0xff] }
 0x148   : > { %6053 = vmatprep.mubr.msk.f32.mxu1 %vm1510_vm1, %v7461_v4  ;;  %6075 = vmatprep.mubr.msk.f32.mxu0 %vm1510_vm1, %v7461_v4  ;;  %v1491_v9 = vld [vmem:[%s8138_s19 + $0x10] sm:$0xff]  ;;  %v1490_v10 = vld [vmem:[%s8138_s19 + $0x8] sm:$0xff]  ;;  %v1489_v11 = vld [vmem:[%s8138_s19] sm:$0xff] }
 0x149   : > { %6051 = vmatprep.subr.mxu1 %v1484_v6  ;;  %v1497_v13 = vld [vmem:[%s8139_s30 + $0x18] sm:$0xff]  ;;  %v1496_v14 = vld [vmem:[%s8139_s30 + $0x10] sm:$0xff]  ;;  %v1495_v15 = vld [vmem:[%s8139_s30 + $0x8] sm:$0xff]  ;;  %s8142_s28 = scalar_lea.vmem %s8140_s6, %s7388_s11  ;;  %s6943_s6 = smov 8  }
 0x14a   : > { %6052 = vmatpush3.msra.mxu1 %v1484_v6  ;;  %6067 = vmatprep.subr.mxu0 %v1497_v13  ;;  %v1494_v16 = vld [vmem:[%s8139_s30] sm:$0xff]  ;;  %s8143_s15 = scalar_lea.vmem %s8141_s1, %s7388_s11  ;;  %s8146_s30 = sld [smem:[#allocation61_spill]] }
 0x14b   : > { %6054 = vmatmul.mubr.msk.f32.vlgmr.msra.gmra.mxu1 %vm1510_vm1, %v7469_v7  ;;  %6056 = vmatprep.subr.mxu1 %v1492_v8  ;;  %v5811_v18 = vld [vmem:[%s8142_s28] ss:$0 sm:$0xff]  ;;  %s8145_s19 = scalar_lea.vmem %s8144_s22, %s7388_s11  ;;  %s6944_s1 = smov 16  }
 0x14c   : > { %6057 = vmatpush3.msra.mxu1 %v1492_v8  ;;  %6064 = vmatprep.mubr.msk.f32.mxu1 %vm1510_vm1, %v7461_v4  ;;  %v5814_v22 = vld [vmem:[%s8143_s15] ss:$0 sm:$0xff] }
 0x14d   : > { %6058 = vmatprep.subr.mxu1 %v1491_v9  ;;  %6068 = vmatpush3.msra.mxu0 %v1497_v13  ;;  %v5817_v39 = vld [vmem:[%s8145_s19] ss:$0 sm:$0xff] }
 0x14e   : > { %6059 = vmatpush3.msra.mxu1 %v1491_v9  ;;  %6069 = vmatprep.subr.mxu0 %v1496_v14 }
 0x14f   : > { %6060 = vmatprep.subr.mxu1 %v1490_v10  ;;  %6070 = vmatpush3.msra.mxu0 %v1496_v14 }
 0x150   : > { %6061 = vmatpush3.msra.mxu1 %v1490_v10  ;;  %6071 = vmatprep.subr.mxu0 %v1495_v15 }
 0x151   : > { %6062 = vmatprep.subr.mxu1 %v1489_v11  ;;  %6072 = vmatpush3.msra.mxu0 %v1495_v15 }
 0x152   : > { %6063 = vmatpush3.msra.mxu1 %v1489_v11  ;;  %6073 = vmatprep.subr.mxu0 %v1494_v16 }
 0x153   : > { %6065 = vmatmul.mubr.msk.f32.vlgmr.msra.gmra.mxu1 %vm1510_vm1, %v7469_v7  ;;  %6078 = vmatprep.subr.mxu1 %v6938_v12 }
 0x154   : > { %6080 = vmatprep.mubr.msk.f32.mxu1 %vm6939_vm2, %v6938_v12  ;;  %6074 = vmatpush3.msra.mxu0 %v1494_v16 }
 0x155   : > { %6076 = vmatmul.mubr.msk.f32.vlgmr.msra.gmra.mxu0 %vm1510_vm1, %v7469_v7  ;;  %6088 = vmatprep.subr.mxu0 %v6938_v12 }
 0x156   : > { %6090 = vmatprep.mubr.msk.f32.mxu0 %vm6939_vm2, %v6938_v12 }
 0x20b   : > { %v6055_v17 = vpop.f32.mrf.mxu1 }
 0x20c   : > { %v1589_v25 = vadd.f32 %v6055_v17, %v5811_v18 }
 0x20d   : > { %v1583_v19 = vpop.f32.mrf.mxu1 }
 0x20e   : > { %v1584_v20 = vadd.f32 %v5811_v18, %v1583_v19 }
 0x210   : > { %1764 = vrot.lane.b32.xlu1 %v1584_v20, %s6940_s5  ;;  %1756 = vrot.lane.b32.xlu0 %v1584_v20, %s6941_s2 }
 0x213   : > { %v6066_v21 = vpop.f32.mrf.mxu1 }
 0x214   : > { %v1670_v26 = vadd.f32 %v6066_v21, %v5814_v22 }
 0x215   : > { %v1664_v23 = vpop.f32.mrf.mxu1  ;;  %v6077_v40 = vpop.f32.mrf.mxu0 }
 0x216   : > { %v1665_v24 = vadd.f32 %v5814_v22, %v1664_v23  ;;  %v7554_v41 = vadd.f32 %v6077_v40, %v5817_v39 }
 0x217   : > { %v1745_v42 = vpop.f32.mrf.mxu0 }
 0x218   : > { %6079 = vmatpush3.xpose.msk.msra.mxu1 %vm1802_vm3, %v1665_v24  ;;  %1774 = vrot.lane.b32.xlu1 %v1665_v24, %s6942_s24  ;;  %v1746_v43 = vadd.f32 %v5817_v39, %v1745_v42 }
 0x219   : > { %1770 = vrot.lane.b32.xlu0 %v1665_v24, %s6941_s2  ;;  %6083 = vmatprep.subr.mxu1 %v6938_v12 }
 0x21b   : > { %6081 = vmatmul.mubr.msk.f32.vlgmr.msra.gmra.mxu1 %vm1802_vm3, %v1584_v20 }
 0x21c   : > { %1778 = vrot.lane.b32.xlu1 %v1665_v24, %s6940_s5  ;;  %6085 = vmatprep.mubr.msk.f32.mxu1 %vm6939_vm2, %v6938_v12 }
 0x21d   : > { %1760 = vrot.lane.b32.xlu0 %v1584_v20, %s6942_s24 }
 0x220   : > { %1758 = vrot.lane.b32.xlu1 %v1589_v25, %s6941_s2 }
 0x221   : > { %1772 = vrot.lane.b32.xlu0 %v1670_v26, %s6941_s2 }
 0x224   : > { %1780 = vrot.lane.b32.xlu1 %v1670_v26, %s6940_s5 }
 0x225   : > { %1776 = vrot.lane.b32.xlu0 %v1670_v26, %s6942_s24 }
 0x228   : > { %1766 = vrot.lane.b32.xlu1 %v1589_v25, %s6940_s5 }
 0x229   : > { %1762 = vrot.lane.b32.xlu0 %v1589_v25, %s6942_s24 }
 0x282   : > { %v1765_v27 = vpop.permute.xlu1 %1764  ;;  %v1757_v28 = vpop.permute.xlu0 %1756 }
 0x28a   : > { %v1775_v29 = vpop.permute.xlu1 %1774 }
 0x28b   : > { %v1771_v30 = vpop.permute.xlu0 %1770  ;;  %6089 = vmatpush3.xpose.msk.msra.mxu0 %vm1802_vm3, %v1775_v29 }
 0x28c   : > { %6084 = vmatpush3.xpose.msk.msra.mxu1 %vm1802_vm3, %v1771_v30  ;;  %6098 = vmatprep.subr.mxu0 %v6938_v12 }
 0x28d   : > { %6093 = vmatprep.subr.mxu1 %v6938_v12 }
 0x28e   : > { %v1779_v31 = vpop.permute.xlu1 %1778 }
 0x28f   : > { %v1761_v32 = vpop.permute.xlu0 %1760  ;;  %6086 = vmatmul.mubr.msk.f32.vlgmr.msra.gmra.mxu1 %vm1802_vm3, %v1757_v28 }
 0x290   : > { %6091 = vmatmul.mubr.msk.f32.vlgmr.msra.gmra.mxu0 %vm1802_vm3, %v1761_v32  ;;  %6094 = vmatpush3.xpose.msk.msra.mxu1 %vm1802_vm3, %v1779_v31 }
 0x291   : > { %6099 = vmatpush3.xpose.msk.msra.mxu0 %vm1802_vm3, %v1670_v26  ;;  %6095 = vmatprep.mubr.msk.f32.mxu1 %vm6939_vm2, %v6938_v12 }
 0x292   : > { %v1759_v33 = vpop.permute.xlu1 %1758  ;;  %6100 = vmatprep.mubr.msk.f32.mxu0 %vm6939_vm2, %v6938_v12  ;;  %6103 = vmatprep.subr.mxu1 %v6938_v12 }
 0x293   : > { %v1773_v34 = vpop.permute.xlu0 %1772  ;;  %6096 = vmatmul.mubr.msk.f32.vlgmr.msra.gmra.mxu1 %vm1802_vm3, %v1765_v27  ;;  %6108 = vmatprep.subr.mxu0 %v6938_v12 }
 0x294   : > { %6101 = vmatmul.mubr.msk.f32.vlgmr.msra.gmra.mxu0 %vm1802_vm3, %v1589_v25  ;;  %6104 = vmatpush3.xpose.msk.msra.mxu1 %vm1802_vm3, %v1773_v34 }
 0x295   : > { %6105 = vmatprep.mubr.msk.f32.mxu1 %vm6939_vm2, %v6938_v12  ;;  %6113 = vmatprep.subr.mxu1 %v6938_v12 }
 0x296   : > { %v1781_v35 = vpop.permute.xlu1 %1780  ;;  %6110 = vmatprep.mubr.msk.f32.mxu0 %vm6939_vm2, %v6938_v12 }
 0x297   : > { %v1777_v36 = vpop.permute.xlu0 %1776  ;;  %6106 = vmatmul.mubr.msk.f32.vlgmr.msra.gmra.mxu1 %vm1802_vm3, %v1759_v33 }
 0x298   : > { %6109 = vmatpush3.xpose.msk.msra.mxu0 %vm1802_vm3, %v1777_v36  ;;  %6114 = vmatpush3.xpose.msk.msra.mxu1 %vm1802_vm3, %v1781_v35 }
 0x299   : > { %6115 = vmatprep.mubr.msk.f32.mxu1 %vm6939_vm2, %v6938_v12  ;;  %6118 = vmatprep.subr.mxu0 %v6938_v12 }
 0x29a   : > { %v1767_v37 = vpop.permute.xlu1 %1766  ;;  %6123 = vmatprep.subr.mxu1 %v6938_v12 }
 0x29b   : > { %v1763_v38 = vpop.permute.xlu0 %1762  ;;  %6116 = vmatmul.mubr.msk.f32.vlgmr.msra.gmra.mxu1 %vm1802_vm3, %v1767_v37 }
 0x29c   : > { %6111 = vmatmul.mubr.msk.f32.vlgmr.msra.gmra.mxu0 %vm1802_vm3, %v1763_v38  ;;  %6125 = vmatprep.mubr.msk.f32.mxu1 %vm6939_vm2, %v6938_v12 }
 0x29d   : > { %6120 = vmatprep.mubr.msk.f32.mxu0 %vm6939_vm2, %v6938_v12  ;;  %6119 = vmatpush3.msra.mxu0 %v1746_v43 }
 0x29e   : > { %6128 = vmatprep.subr.mxu0 %v6938_v12 }
 0x2db   : > { %v1873_v44 = vpop.f32.mrf.mxu1 }
 0x2dc   : > { %v2395_v45 = vmul.f32 0.35355338, %v1873_v44 }
 0x2dd   : > { %v6082_v46 = vpop.f32.mrf.mxu1 }
 0x2de   : > { %v2403_v47 = vsel %vm1802_vm3, %v2395_v45, -inf }
 0x2df   : > { %2404 = vmax.xlane.f32.xlu0 %v2403_v47 }
 0x34f   : > { %v1947_v48 = vpop.f32.mrf.mxu1 }
 0x350   : > { %v2396_v49 = vmul.f32 0.35355338, %v1947_v48  ;;  %v2021_v50 = vpop.f32.mrf.mxu0 }
 0x351   : > { %v2397_v51 = vmul.f32 0.35355338, %v2021_v50  ;;  %v6087_v52 = vpop.f32.mrf.mxu1 }
 0x352   : > { %v6092_v53 = vpop.f32.mrf.mxu0  ;;  %v2406_v54 = vsel %vm1802_vm3, %v2396_v49, -inf }
 0x353   : > { %2407 = vmax.xlane.f32.xlu1 %v2406_v54  ;;  %v2095_v55 = vpop.f32.mrf.mxu1  ;;  %v2409_v56 = vsel %vm1802_vm3, %v2397_v51, -inf }
 0x354   : > { %v2398_v57 = vmul.f32 0.35355338, %v2095_v55  ;;  %v2169_v58 = vpop.f32.mrf.mxu0  ;;  %2410 = vmax.xlane.f32.xlu0 %v2409_v56 }
 0x355   : > { %v2399_v59 = vmul.f32 0.35355338, %v2169_v58  ;;  %v6097_v60 = vpop.f32.mrf.mxu1 }
 0x356   : > { %v6102_v61 = vpop.f32.mrf.mxu0  ;;  %v2412_v62 = vsel %vm1802_vm3, %v2398_v57, -inf }
 0x357   : > { %v2243_v63 = vpop.f32.mrf.mxu1  ;;  %v2415_v0 = vsel %vm1802_vm3, %v2399_v59, -inf }
 0x358   : > { %v2400_v1 = vmul.f32 0.35355338, %v2243_v63  ;;  %2416 = vmax.xlane.f32.xlu1 %v2415_v0  ;;  %2413 = vmax.xlane.f32.xlu0 %v2412_v62 }
 0x359   : > { %v6107_v2 = vpop.f32.mrf.mxu1 }
 0x35a   : > { %v2418_v3 = vsel %vm1802_vm3, %v2400_v1, -inf }
 0x35b   : > { %v2391_v5 = vpop.f32.mrf.mxu1 }
 0x35c   : > { %v2317_v6 = vpop.f32.mrf.mxu0  ;;  %2419 = vmax.xlane.f32.xlu0 %v2418_v3  ;;  %v2402_v8 = vmul.f32 0.35355338, %v2391_v5 }
 0x35d   : > { %v2401_v9 = vmul.f32 0.35355338, %v2317_v6  ;;  %v6117_v10 = vpop.f32.mrf.mxu1 }
 0x35e   : > { %v6112_v11 = vpop.f32.mrf.mxu0  ;;  %v2424_v13 = vsel %vm1802_vm3, %v2402_v8, -inf }
 0x35f   : > { %v2421_v14 = vsel %vm1802_vm3, %v2401_v9, -inf }
 0x360   : > { %2422 = vmax.xlane.f32.xlu1 %v2421_v14  ;;  %2425 = vmax.xlane.f32.xlu0 %v2424_v13 }
 0x368   : > { %v2405_v15 = vpop.xlane.xlu0 %2404 }
 0x369   : > { %v2427_v16 = vsub.f32 %v2395_v45, %v2405_v15 }
 0x36b   : > { %v2435_v17 = vmul.f32 1.442695, %v2427_v16 }
 0x36d   : > { %6468 = vpow2.f32 %v2435_v17 }
 0x371   : > { %1784 = vrot.lane.b32.xlu1 %v1746_v43, %s6941_s2 }
 0x375   : > { %1796 = vrot.lane.b32.xlu1 %v1746_v43, %s6940_s5 }
 0x376   : > { %1790 = vrot.lane.b32.xlu0 %v1746_v43, %s6942_s24 }
 0x379   : > { %1786 = vrot.lane.b32.xlu1 %v7554_v41, %s6941_s2 }
 0x37a   : > { %v6469_v18 = vpop.eup %6468 }
 0x37b   : > { %v2451_v19 = vsel %vm1802_vm3, %v6469_v18, 0.0 }
 0x39d   : > { %2452 = vadd.xlane.f32.xlu1 %v2451_v19 }
 0x3dc   : > { %v2408_v20 = vpop.xlane.xlu1 %2407 }
 0x3dd   : > { %v2428_v21 = vsub.f32 %v2396_v49, %v2408_v20  ;;  %v2411_v22 = vpop.xlane.xlu0 %2410 }
 0x3de   : > { %v2429_v23 = vsub.f32 %v2397_v51, %v2411_v22 }
 0x3df   : > { %v2437_v24 = vmul.f32 1.442695, %v2428_v21 }
 0x3e0   : > { %v2439_v25 = vmul.f32 1.442695, %v2429_v23 }
 0x3e1   : > { %6470 = vpow2.f32 %v2437_v24  ;;  %v2417_v26 = vpop.xlane.xlu1 %2416  ;;  %v2414_v27 = vpop.xlane.xlu0 %2413 }
 0x3e2   : > { %6472 = vpow2.f32 %v2439_v25  ;;  %v2431_v28 = vsub.f32 %v2399_v59, %v2417_v26  ;;  %v2430_v29 = vsub.f32 %v2398_v57, %v2414_v27  ;;  %v3244_v26 = vld [vmem:[%s7437_s18 + $0x18] sm:$0xff] }
 0x3e3   : > { %v1502_v27 = vld [vmem:[%s8146_s30 + $0x18] sm:$0xff] }
 0x3e4   : > { %v2443_v30 = vmul.f32 1.442695, %v2431_v28  ;;  %v2441_v31 = vmul.f32 1.442695, %v2430_v29  ;;  %v3243_v28 = vld [vmem:[%s7437_s18 + $0x10] sm:$0xff] }
 0x3e5   : > { %v2420_v32 = vpop.xlane.xlu0 %2419  ;;  %v1501_v29 = vld [vmem:[%s8146_s30 + $0x10] sm:$0xff] }
 0x3e6   : > { %6474 = vpow2.f32 %v2443_v30  ;;  %v2432_v33 = vsub.f32 %v2400_v1, %v2420_v32  ;;  %v3242_v30 = vld [vmem:[%s7437_s18 + $0x8] sm:$0xff] }
 0x3e7   : > { %6476 = vpow2.f32 %v2441_v31 }
 0x3e8   : > { %v2445_v34 = vmul.f32 1.442695, %v2432_v33  ;;  %v1500_v33 = vld [vmem:[%s8146_s30 + $0x8] sm:$0xff] }
 0x3e9   : > { %v2423_v35 = vpop.xlane.xlu1 %2422  ;;  %v2426_v36 = vpop.xlane.xlu0 %2425 }
 0x3ea   : > { %6478 = vpow2.f32 %v2445_v34  ;;  %v2433_v37 = vsub.f32 %v2401_v9, %v2423_v35  ;;  %v2434_v38 = vsub.f32 %v2402_v8, %v2426_v36  ;;  %v3241_v34 = vld [vmem:[%s7437_s18] sm:$0xff]  ;;  %s6945_s18 = smov 24  }
 0x3eb   : > { %v1499_v36 = vld [vmem:[%s8146_s30] sm:$0xff]  ;;  %s6946_s30 = smov [#allocation14]  }
 0x3ec   : > { %v2447_v39 = vmul.f32 1.442695, %v2433_v37  ;;  %v2449_v40 = vmul.f32 1.442695, %v2434_v38 }
 0x3ed   : > { %v1785_v42 = vpop.permute.xlu1 %1784  ;;  %v1791_v62 = vpop.permute.xlu0 %1790 }
 0x3ee   : > { %v6471_v43 = vpop.eup %6470  ;;  %6480 = vpow2.f32 %v2447_v39  ;;  %6124 = vmatpush3.msra.mxu1 %v1785_v42  ;;  %v3249_v39 = vld [vmem:[%s7440_s20 + $0x18] sm:$0xff] }
 0x3ef   : > { %v6473_v44 = vpop.eup %6472  ;;  %6482 = vpow2.f32 %v2449_v40  ;;  %v2454_v45 = vsel %vm1802_vm3, %v6471_v43, 0.0  ;;  %6133 = vmatprep.subr.mxu1 %v6938_v12 }
 0x3f0   : > { %2455 = vadd.xlane.f32.xlu0 %v2454_v45  ;;  %v2457_v46 = vsel %vm1802_vm3, %v6473_v44, 0.0 }
 0x3f1   : > { %2458 = vadd.xlane.f32.xlu1 %v2457_v46  ;;  %v1797_v57 = vpop.permute.xlu1 %1796  ;;  %v1482_v46 = vld [vmem:[#allocation5] sm:$0xff] }
 0x3f3   : > { %v6475_v47 = vpop.eup %6474 }
 0x3f4   : > { %v6477_v48 = vpop.eup %6476  ;;  %v2463_v49 = vsel %vm1802_vm3, %v6475_v47, 0.0 }
 0x3f5   : > { %2464 = vadd.xlane.f32.xlu1 %v2463_v49  ;;  %v2460_v50 = vsel %vm1802_vm3, %v6477_v48, 0.0  ;;  %v1787_v58 = vpop.permute.xlu1 %1786 }
 0x3f6   : > { %2461 = vadd.xlane.f32.xlu0 %v2460_v50 }
 0x3f7   : > { %v7576_v51 = vpop.eup %6478 }
 0x3f8   : > { %v2466_v52 = vsel %vm1802_vm3, %v7576_v51, 0.0 }
 0x3fa   : > { %2467 = vadd.xlane.f32.xlu0 %v2466_v52 }
 0x3fb   : > { %v7580_v53 = vpop.eup %6480 }
 0x3fc   : > { %v7582_v54 = vpop.eup %6482  ;;  %v2469_v55 = vsel %vm1802_vm3, %v7580_v53, 0.0 }
 0x3fd   : > { %2470 = vadd.xlane.f32.xlu1 %v2469_v55  ;;  %v2472_v56 = vsel %vm1802_vm3, %v7582_v54, 0.0 }
 0x3fe   : > { %2473 = vadd.xlane.f32.xlu0 %v2472_v56 }
 0x40e   : > { %1798 = vrot.lane.b32.xlu1 %v7554_v41, %s6940_s5 }
 0x414   : > { %1792 = vrot.lane.b32.xlu0 %v7554_v41, %s6942_s24 }
 0x426   : > { %v2453_v59 = vpop.xlane.xlu1 %2452 }
 0x427   : > { %6484 = vrcp.f32 %v2453_v59 }
 0x434   : > { %v6485_v60 = vpop.eup %6484 }
 0x435   : > { %v2476_v61 = vmul.f32 %v6485_v60, %v6469_v18 }
 0x437   : > { %6121 = vmatmul.mubr.msk.f32.vlgmr.msra.gmra.mxu0 %vm1802_vm3, %v2476_v61  ;;  %5248 = vst.msk [vmem:[%s7452_s7] sm:$0xff] %vm1802_vm3, %v2476_v61  ;;  %v3248_v61 = vld [vmem:[%s7440_s20 + $0x10] sm:$0xff] }
 0x438   : > { %6129 = vmatpush3.msra.mxu0 %v1791_v62  ;;  %6130 = vmatprep.mubr.msk.f32.mxu0 %vm6939_vm2, %v6938_v12  ;;  %v3247_v62 = vld [vmem:[%s7440_s20 + $0x8] sm:$0xff] }
 0x439   : > { %6138 = vmatprep.subr.mxu0 %v6938_v12 }
 0x479   : > { %v2456_v63 = vpop.xlane.xlu0 %2455 }
 0x47a   : > { %6486 = vrcp.f32 %v2456_v63  ;;  %v2459_v0 = vpop.xlane.xlu1 %2458  ;;  %v3246_v63 = vld [vmem:[%s7440_s20] sm:$0xff] }
 0x47b   : > { %6488 = vrcp.f32 %v2459_v0  ;;  %v1483_v0 = vld [vmem:[#allocation5 + $0x8] sm:$0xff] }
 0x47e   : > { %v2465_v1 = vpop.xlane.xlu1 %2464 }
 0x47f   : > { %6490 = vrcp.f32 %v2465_v1  ;;  %v2462_v2 = vpop.xlane.xlu0 %2461 }
 0x480   : > { %6492 = vrcp.f32 %v2462_v2  ;;  %v5849_v2 = vld [vmem:[%s1438_s17] ss:$0 sm:$0xff] }
 0x483   : > { %v2468_v3 = vpop.xlane.xlu0 %2467 }
 0x484   : > { %6494 = vrcp.f32 %v2468_v3 }
 0x486   : > { %v2471_v5 = vpop.xlane.xlu1 %2470 }
 0x487   : > { %v6487_v6 = vpop.eup %6486  ;;  %6496 = vrcp.f32 %v2471_v5  ;;  %v2474_v8 = vpop.xlane.xlu0 %2473 }
 0x488   : > { %v6489_v9 = vpop.eup %6488  ;;  %6498 = vrcp.f32 %v2474_v8  ;;  %v2478_v10 = vmul.f32 %v6487_v6, %v6471_v43  ;;  %v3254_v8 = vld [vmem:[%s7443_s4 + $0x18] sm:$0xff] }
 0x489   : > { %v2480_v11 = vmul.f32 %v6489_v9, %v6473_v44  ;;  %v3253_v9 = vld [vmem:[%s7443_s4 + $0x10] sm:$0xff] }
 0x48a   : > { %6126 = vmatmul.mubr.msk.f32.vlgmr.msra.gmra.mxu1 %vm1802_vm3, %v2478_v10  ;;  %5249 = vst.msk [vmem:[%s7452_s7 + $0x8] sm:$0xff] %vm1802_vm3, %v2478_v10  ;;  %v1799_v20 = vpop.permute.xlu1 %1798  ;;  %v3252_v10 = vld [vmem:[%s7443_s4 + $0x8] sm:$0xff] }
 0x48b   : > { %6134 = vmatpush3.msra.mxu1 %v1797_v57  ;;  %6131 = vmatmul.mubr.msk.f32.vlgmr.msra.gmra.mxu0 %vm1802_vm3, %v2480_v11  ;;  %5250 = vst.msk [vmem:[%s7452_s7 + $0x10] sm:$0xff] %vm1802_vm3, %v2480_v11  ;;  %v1793_v17 = vpop.permute.xlu0 %1792  ;;  %v3251_v11 = vld [vmem:[%s7443_s4] sm:$0xff] }
 0x48c   : > { %v6491_v13 = vpop.eup %6490  ;;  %6139 = vmatpush3.msra.mxu0 %v7554_v41  ;;  %6135 = vmatprep.mubr.msk.f32.mxu1 %vm6939_vm2, %v6938_v12 }
 0x48d   : > { %v6493_v14 = vpop.eup %6492  ;;  %6140 = vmatprep.mubr.msk.f32.mxu0 %vm6939_vm2, %v6938_v12  ;;  %6143 = vmatprep.subr.mxu1 %v6938_v12  ;;  %v2484_v15 = vmul.f32 %v6491_v13, %v6475_v47 }
 0x48e   : > { %6148 = vmatprep.subr.mxu0 %v6938_v12  ;;  %v2482_v16 = vmul.f32 %v6493_v14, %v6477_v48 }
 0x48f   : > { %6141 = vmatmul.mubr.msk.f32.vlgmr.msra.gmra.mxu0 %vm1802_vm3, %v2484_v15  ;;  %5252 = vst.msk [vmem:[%s7452_s7 + $0x20] sm:$0xff] %vm1802_vm3, %v2484_v15 }
 0x490   : > { %6136 = vmatmul.mubr.msk.f32.vlgmr.msra.gmra.mxu1 %vm1802_vm3, %v2482_v16  ;;  %5251 = vst.msk [vmem:[%s7452_s7 + $0x18] sm:$0xff] %vm1802_vm3, %v2482_v16  ;;  %6149 = vmatpush3.msra.mxu0 %v1793_v17  ;;  %v5852_v16 = vld [vmem:[%s1441_s21] ss:$0 sm:$0xff]  ;;  %s8150_s21 = sld [smem:[#allocation31_spill]] }
 0x491   : > { %v6495_v41 = vpop.eup %6494  ;;  %6144 = vmatpush3.msra.mxu1 %v1787_v58  ;;  %6145 = vmatprep.mubr.msk.f32.mxu1 %vm6939_vm2, %v6938_v12 }
 0x492   : > { %6153 = vmatprep.subr.mxu1 %v6938_v12  ;;  %v2486_v18 = vmul.f32 %v6495_v41, %v7576_v51  ;;  %6150 = vmatprep.mubr.msk.f32.mxu0 %vm6939_vm2, %v6938_v12 }
 0x493   : > { %6158 = vmatprep.subr.mxu0 %v1502_v27 }
 0x494   : > { %v6497_v19 = vpop.eup %6496  ;;  %6146 = vmatmul.mubr.msk.f32.vlgmr.msra.gmra.mxu1 %vm1802_vm3, %v2486_v18  ;;  %5253 = vst.msk [vmem:[%s7452_s7 + $0x28] sm:$0xff] %vm1802_vm3, %v2486_v18 }
 0x495   : > { %v6499_v21 = vpop.eup %6498  ;;  %6154 = vmatpush3.msra.mxu1 %v1799_v20  ;;  %6155 = vmatprep.mubr.msk.f32.mxu1 %vm6939_vm2, %v6938_v12  ;;  %v2488_v22 = vmul.f32 %v6497_v19, %v7580_v53  ;;  %v5855_v19 = vld [vmem:[%s1444_s12] ss:$0 sm:$0xff] }
 0x496   : > { %v2490_v23 = vmul.f32 %v6499_v21, %v7582_v54  ;;  %6169 = vmatprep.subr.mxu1 %v3244_v26  ;;  %s8151_s12 = scalar_lea.vmem %s8150_s21, %s7388_s11 }
 0x497   : > { %6151 = vmatmul.mubr.msk.f32.vlgmr.msra.gmra.mxu0 %vm1802_vm3, %v2488_v22  ;;  %5254 = vst.msk [vmem:[%s7452_s7 + $0x30] sm:$0xff] %vm1802_vm3, %v2488_v22 }
 0x498   : > { %6156 = vmatmul.mubr.msk.f32.vlgmr.msra.gmra.mxu1 %vm1802_vm3, %v2490_v23  ;;  %5255 = vst.msk [vmem:[%s7452_s7 + $0x38] sm:$0xff] %vm1802_vm3, %v2490_v23  ;;  %6159 = vmatpush3.msra.mxu0 %v1502_v27 }
 0x499   : > { %6177 = vmatprep.mubr.msk.f32.mxu1 %vm1510_vm1, %v7461_v4  ;;  %6170 = vmatpush3.msra.mxu1 %v3244_v26 }
 0x49a   : > { %6171 = vmatprep.subr.mxu1 %v3243_v28  ;;  %6160 = vmatprep.subr.mxu0 %v1501_v29 }
 0x49b   : > { %6172 = vmatpush3.msra.mxu1 %v3243_v28  ;;  %6161 = vmatpush3.msra.mxu0 %v1501_v29 }
 0x49c   : > { %6173 = vmatprep.subr.mxu1 %v3242_v30  ;;  %6162 = vmatprep.subr.mxu0 %v1500_v33 }
 0x49d   : > { %6174 = vmatpush3.msra.mxu1 %v3242_v30  ;;  %6163 = vmatpush3.msra.mxu0 %v1500_v33 }
 0x49e   : > { %6175 = vmatprep.subr.mxu1 %v3241_v34  ;;  %6164 = vmatprep.subr.mxu0 %v1499_v36 }
 0x49f   : > { %6176 = vmatpush3.msra.mxu1 %v3241_v34  ;;  %6165 = vmatpush3.msra.mxu0 %v1499_v36 }
 0x4a0   : > { %6178 = vmatmul.mubr.msk.f32.vlgmr.msra.gmra.mxu1 %vm1510_vm1, %v7469_v7  ;;  %6180 = vmatprep.subr.mxu0 %v3249_v39 }
 0x4a1   : > { %6199 = vmatprep.mubr.msk.f32.mxu1 %vm1510_vm1, %v1482_v46  ;;  %6191 = vmatprep.subr.mxu1 %v3254_v8 }
 0x4a2   : > { %6192 = vmatpush3.msra.mxu1 %v3254_v8 }
 0x4a3   : > { %6193 = vmatprep.subr.mxu1 %v3253_v9 }
 0x4a4   : > { %6194 = vmatpush3.msra.mxu1 %v3253_v9 }
 0x4a5   : > { %6195 = vmatprep.subr.mxu1 %v3252_v10 }
 0x4a6   : > { %6196 = vmatpush3.msra.mxu1 %v3252_v10 }
 0x4a7   : > { %6197 = vmatprep.subr.mxu1 %v3251_v11 }
 0x4a8   : > { %6198 = vmatpush3.msra.mxu1 %v3251_v11 }
 0x4a9   : > { %6200 = vmatmul.mubr.msk.f32.vlgmr.msra.gmra.mxu1 %vm1510_vm1, %v1483_v0  ;;  %6207 = vmatprep.subr.mxu1 %v6938_v12 }
 0x4aa   : > { %6209 = vmatprep.mubr.msk.f32.mxu1 %vm6939_vm2, %v6938_v12 }
 0x4f7   : > { %v2560_v24 = vpop.f32.mrf.mxu0 }
 0x4f9   : > { %v6122_v25 = vpop.f32.mrf.mxu0 }
 0x54a   : > { %v2633_v31 = vpop.f32.mrf.mxu1 }
 0x54b   : > { %v2706_v32 = vpop.f32.mrf.mxu0  ;;  %3077 = vrot.lane.b32.xlu0 %v2633_v31, %s6943_s6 }
 0x54c   : > { %v6127_v4 = vpop.f32.mrf.mxu1 }
 0x54d   : > { %v6132_v35 = vpop.f32.mrf.mxu0 }
 0x54f   : > { %v2852_v37 = vpop.f32.mrf.mxu0  ;;  %3085 = vrot.lane.b32.xlu0 %v2706_v32, %s6944_s1 }
 0x550   : > { %v2779_v38 = vpop.f32.mrf.mxu1 }
 0x551   : > { %v6142_v40 = vpop.f32.mrf.mxu0 }
 0x552   : > { %v6137_v42 = vpop.f32.mrf.mxu1 }
 0x553   : > { %3093 = vrot.lane.b32.xlu0 %v2779_v38, %s6945_s18 }
 0x554   : > { %v2925_v43 = vpop.f32.mrf.mxu1 }
 0x555   : > { %3079 = vrot.lane.b32.xlu1 %v2925_v43, %s6943_s6 }
 0x556   : > { %v6147_v44 = vpop.f32.mrf.mxu1 }
 0x557   : > { %v2998_v45 = vpop.f32.mrf.mxu0 }
 0x558   : > { %v3071_v47 = vpop.f32.mrf.mxu1 }
 0x559   : > { %3087 = vrot.lane.b32.xlu1 %v2998_v45, %s6944_s1  ;;  %v6152_v7 = vpop.f32.mrf.mxu0 }
 0x55a   : > { %v6157_v48 = vpop.f32.mrf.mxu1 }
 0x55d   : > { %3095 = vrot.lane.b32.xlu1 %v3071_v47, %s6945_s18 }
 0x560   : > { %v6179_v1 = vpop.f32.mrf.mxu1 }
 0x561   : > { %v7675_v3 = vadd.f32 %v6179_v1, %v5849_v2 }
 0x562   : > { %v3333_v5 = vpop.f32.mrf.mxu1 }
 0x563   : > { %v3334_v6 = vadd.f32 %v5849_v2, %v3333_v5 }
 0x565   : > { %3512 = vrot.lane.b32.xlu1 %v3334_v6, %s6941_s2  ;;  %3516 = vrot.lane.b32.xlu0 %v3334_v6, %s6942_s24 }
 0x569   : > { %3520 = vrot.lane.b32.xlu1 %v3334_v6, %s6940_s5  ;;  %v6201_v20 = vpop.f32.mrf.mxu1 }
 0x56a   : > { %v7715_v21 = vadd.f32 %v6201_v20, %v5855_v19 }
 0x56b   : > { %v3501_v32 = vpop.f32.mrf.mxu1 }
 0x56c   : > { %v3502_v4 = vadd.f32 %v5855_v19, %v3501_v32 }
 0x5bd   : > { %v3078_v49 = vpop.permute.xlu0 %3077 }
 0x5be   : > { %v3099_v51 = vsel %vm1802_vm3, %v2560_v24, %v3078_v49 }
 0x5c1   : > { %v3086_v50 = vpop.permute.xlu0 %3085 }
 0x5c2   : > { %v3102_v52 = vsel %vm3101_vm4, %v3099_v51, %v3086_v50 }
 0x5c5   : > { %v3094_v53 = vpop.permute.xlu0 %3093 }
 0x5c6   : > { %v3105_v54 = vsel %vm3104_vm5, %v3102_v52, %v3094_v53 }
 0x5c7   : > { %v3080_v55 = vpop.permute.xlu1 %3079  ;;  %6166 = vmatprep.mubr.msk.f32.mxu0 %vm1510_vm1, %v3105_v54 }
 0x5c8   : > { %v3100_v57 = vsel %vm1802_vm3, %v2852_v37, %v3080_v55 }
 0x5cb   : > { %v3088_v56 = vpop.permute.xlu1 %3087 }
 0x5cc   : > { %v3103_v58 = vsel %vm3101_vm4, %v3100_v57, %v3088_v56 }
 0x5cf   : > { %v3096_v59 = vpop.permute.xlu1 %3095 }
 0x5d0   : > { %v3106_v60 = vsel %vm3104_vm5, %v3103_v58, %v3096_v59 }
 0x5d1   : > { %6167 = vmatmul.mubr.msk.f32.vlgmr.msra.gmra.mxu0 %vm1510_vm1, %v3106_v60 }
 0x5d2   : > { %6181 = vmatpush3.msra.mxu0 %v3249_v39  ;;  %6188 = vmatprep.mubr.msk.f32.mxu0 %vm1510_vm1, %v1482_v46 }
 0x5d3   : > { %6182 = vmatprep.subr.mxu0 %v3248_v61 }
 0x5d4   : > { %6183 = vmatpush3.msra.mxu0 %v3248_v61 }
 0x5d5   : > { %6184 = vmatprep.subr.mxu0 %v3247_v62 }
 0x5d6   : > { %6185 = vmatpush3.msra.mxu0 %v3247_v62 }
 0x5d7   : > { %6186 = vmatprep.subr.mxu0 %v3246_v63  ;;  %v3513_v22 = vpop.permute.xlu1 %3512  ;;  %v3517_v23 = vpop.permute.xlu0 %3516 }
 0x5d8   : > { %6187 = vmatpush3.msra.mxu0 %v3246_v63 }
 0x5d9   : > { %6189 = vmatmul.mubr.msk.f32.vlgmr.msra.gmra.mxu0 %vm1510_vm1, %v1483_v0  ;;  %6202 = vmatprep.subr.mxu0 %v6938_v12 }
 0x5da   : > { %6204 = vmatprep.mubr.msk.f32.mxu0 %vm6939_vm2, %v6938_v12 }
 0x5db   : > { %v3521_v24 = vpop.permute.xlu1 %3520 }
 0x691   : > { %v7688_v13 = vpop.f32.mrf.mxu0 }
 0x693   : > { %v7690_v14 = vpop.f32.mrf.mxu0 }
 0x699   : > { %v6190_v15 = vpop.f32.mrf.mxu0 }
 0x69a   : > { %v3426_v18 = vadd.f32 %v6190_v15, %v5852_v16 }
 0x69b   : > { %v3420_v17 = vpop.f32.mrf.mxu0 }
 0x69c   : > { %v3421_v41 = vadd.f32 %v5852_v16, %v3420_v17 }
 0x69e   : > { %6203 = vmatpush3.xpose.msk.msra.mxu0 %vm1802_vm3, %v3421_v41  ;;  %3526 = vrot.lane.b32.xlu0 %v3421_v41, %s6941_s2 }
 0x69f   : > { %3534 = vrot.lane.b32.xlu1 %v3421_v41, %s6940_s5  ;;  %6212 = vmatprep.subr.mxu0 %v6938_v12 }
 0x6a1   : > { %6205 = vmatmul.mubr.msk.f32.vlgmr.msra.gmra.mxu0 %vm1802_vm3, %v3334_v6 }
 0x6a2   : > { %3530 = vrot.lane.b32.xlu0 %v3421_v41, %s6942_s24  ;;  %6214 = vmatprep.mubr.msk.f32.mxu0 %vm6939_vm2, %v6938_v12 }
 0x6a3   : > { %3514 = vrot.lane.b32.xlu1 %v7675_v3, %s6941_s2 }
 0x6a6   : > { %3528 = vrot.lane.b32.xlu0 %v3426_v18, %s6941_s2 }
 0x6a7   : > { %3536 = vrot.lane.b32.xlu1 %v3426_v18, %s6940_s5 }
 0x6aa   : > { %3532 = vrot.lane.b32.xlu0 %v3426_v18, %s6942_s24 }
 0x6ab   : > { %3522 = vrot.lane.b32.xlu1 %v7675_v3, %s6940_s5 }
 0x6ae   : > { %3518 = vrot.lane.b32.xlu0 %v7675_v3, %s6942_s24 }
 0x710   : > { %v3527_v25 = vpop.permute.xlu0 %3526 }
 0x711   : > { %v3535_v26 = vpop.permute.xlu1 %3534  ;;  %6208 = vmatpush3.xpose.msk.msra.mxu1 %vm1802_vm3, %v3527_v25 }
 0x712   : > { %6217 = vmatprep.subr.mxu1 %v6938_v12 }
 0x714   : > { %v3531_v27 = vpop.permute.xlu0 %3530  ;;  %6210 = vmatmul.mubr.msk.f32.vlgmr.msra.gmra.mxu1 %vm1802_vm3, %v3513_v22 }
 0x715   : > { %v3515_v28 = vpop.permute.xlu1 %3514  ;;  %6213 = vmatpush3.xpose.msk.msra.mxu0 %vm1802_vm3, %v3531_v27  ;;  %6218 = vmatpush3.xpose.msk.msra.mxu1 %vm1802_vm3, %v3535_v26 }
 0x716   : > { %6219 = vmatprep.mubr.msk.f32.mxu1 %vm6939_vm2, %v6938_v12  ;;  %6227 = vmatprep.subr.mxu1 %v6938_v12 }
 0x717   : > { %6222 = vmatprep.subr.mxu0 %v6938_v12 }
 0x718   : > { %v3529_v29 = vpop.permute.xlu0 %3528  ;;  %6220 = vmatmul.mubr.msk.f32.vlgmr.msra.gmra.mxu1 %vm1802_vm3, %v3521_v24  ;;  %6215 = vmatmul.mubr.msk.f32.vlgmr.msra.gmra.mxu0 %vm1802_vm3, %v3517_v23 }
 0x719   : > { %v3537_v30 = vpop.permute.xlu1 %3536  ;;  %6223 = vmatpush3.xpose.msk.msra.mxu0 %vm1802_vm3, %v3426_v18  ;;  %6228 = vmatpush3.xpose.msk.msra.mxu1 %vm1802_vm3, %v3529_v29 }
 0x71a   : > { %6224 = vmatprep.mubr.msk.f32.mxu0 %vm6939_vm2, %v6938_v12  ;;  %6229 = vmatprep.mubr.msk.f32.mxu1 %vm6939_vm2, %v6938_v12 }
 0x71b   : > { %6237 = vmatprep.subr.mxu1 %v6938_v12  ;;  %6232 = vmatprep.subr.mxu0 %v6938_v12 }
 0x71c   : > { %v3533_v31 = vpop.permute.xlu0 %3532  ;;  %6230 = vmatmul.mubr.msk.f32.vlgmr.msra.gmra.mxu1 %vm1802_vm3, %v3515_v28  ;;  %6225 = vmatmul.mubr.msk.f32.vlgmr.msra.gmra.mxu0 %vm1802_vm3, %v7675_v3 }
 0x71d   : > { %6233 = vmatpush3.xpose.msk.msra.mxu0 %vm1802_vm3, %v3533_v31  ;;  %6238 = vmatpush3.xpose.msk.msra.mxu1 %vm1802_vm3, %v3537_v30  ;;  %v3523_v33 = vpop.permute.xlu1 %3522 }
 0x71e   : > { %6239 = vmatprep.mubr.msk.f32.mxu1 %vm6939_vm2, %v6938_v12  ;;  %6234 = vmatprep.mubr.msk.f32.mxu0 %vm6939_vm2, %v6938_v12 }
 0x71f   : > { %6242 = vmatprep.subr.mxu0 %v6938_v12  ;;  %6247 = vmatprep.subr.mxu1 %v6938_v12 }
 0x720   : > { %v3519_v34 = vpop.permute.xlu0 %3518  ;;  %6240 = vmatmul.mubr.msk.f32.vlgmr.msra.gmra.mxu1 %vm1802_vm3, %v3523_v33 }
 0x721   : > { %6235 = vmatmul.mubr.msk.f32.vlgmr.msra.gmra.mxu0 %vm1802_vm3, %v3519_v34  ;;  %6249 = vmatprep.mubr.msk.f32.mxu1 %vm6939_vm2, %v6938_v12 }
 0x722   : > { %6243 = vmatpush3.msra.mxu0 %v3502_v4  ;;  %6244 = vmatprep.mubr.msk.f32.mxu0 %vm6939_vm2, %v6938_v12 }
 0x723   : > { %6252 = vmatprep.subr.mxu0 %v6938_v12 }
 0x761   : > { %v3628_v35 = vpop.f32.mrf.mxu0 }
 0x762   : > { %v4150_v36 = vmul.f32 0.35355338, %v3628_v35 }
 0x763   : > { %v6206_v37 = vpop.f32.mrf.mxu0 }
 0x764   : > { %v4158_v38 = vsel %vm1802_vm3, %v4150_v36, -inf }
 0x765   : > { %4159 = vmax.xlane.f32.xlu0 %v4158_v38 }
 0x7d4   : > { %v3702_v39 = vpop.f32.mrf.mxu1 }
 0x7d5   : > { %v4151_v40 = vmul.f32 0.35355338, %v3702_v39 }
 0x7d6   : > { %v6211_v42 = vpop.f32.mrf.mxu1 }
 0x7d7   : > { %v4161_v43 = vsel %vm1802_vm3, %v4151_v40, -inf }
 0x7d8   : > { %4162 = vmax.xlane.f32.xlu1 %v4161_v43  ;;  %v3776_v44 = vpop.f32.mrf.mxu0  ;;  %v3850_v45 = vpop.f32.mrf.mxu1 }
 0x7d9   : > { %v4152_v46 = vmul.f32 0.35355338, %v3776_v44  ;;  %v4153_v48 = vmul.f32 0.35355338, %v3850_v45 }
 0x7da   : > { %v6216_v47 = vpop.f32.mrf.mxu0  ;;  %v6221_v7 = vpop.f32.mrf.mxu1 }
 0x7db   : > { %v4164_v49 = vsel %vm1802_vm3, %v4152_v46, -inf  ;;  %v4167_v56 = vsel %vm1802_vm3, %v4153_v48, -inf }
 0x7dc   : > { %v3998_v50 = vpop.f32.mrf.mxu1  ;;  %4165 = vmax.xlane.f32.xlu0 %v4164_v49  ;;  %v3924_v51 = vpop.f32.mrf.mxu0 }
 0x7dd   : > { %v4154_v52 = vmul.f32 0.35355338, %v3924_v51  ;;  %v4155_v55 = vmul.f32 0.35355338, %v3998_v50 }
 0x7de   : > { %v6226_v53 = vpop.f32.mrf.mxu0  ;;  %v6231_v54 = vpop.f32.mrf.mxu1 }
 0x7df   : > { %v4170_v57 = vsel %vm1802_vm3, %v4154_v52, -inf  ;;  %v4173_v0 = vsel %vm1802_vm3, %v4155_v55, -inf }
 0x7e0   : > { %v4146_v58 = vpop.f32.mrf.mxu1  ;;  %4168 = vmax.xlane.f32.xlu0 %v4167_v56  ;;  %4171 = vmax.xlane.f32.xlu1 %v4170_v57 }
 0x7e1   : > { %v4072_v59 = vpop.f32.mrf.mxu0  ;;  %v4157_v62 = vmul.f32 0.35355338, %v4146_v58 }
 0x7e2   : > { %v4156_v60 = vmul.f32 0.35355338, %v4072_v59  ;;  %v6241_v61 = vpop.f32.mrf.mxu1 }
 0x7e3   : > { %v6236_v63 = vpop.f32.mrf.mxu0  ;;  %v4179_v2 = vsel %vm1802_vm3, %v4157_v62, -inf }
 0x7e4   : > { %4174 = vmax.xlane.f32.xlu0 %v4173_v0  ;;  %v4176_v1 = vsel %vm1802_vm3, %v4156_v60, -inf }
 0x7e5   : > { %4177 = vmax.xlane.f32.xlu1 %v4176_v1 }
 0x7e8   : > { %4180 = vmax.xlane.f32.xlu0 %v4179_v2 }
 0x7ee   : > { %v4160_v3 = vpop.xlane.xlu0 %4159 }
 0x7ef   : > { %v4182_v5 = vsub.f32 %v4150_v36, %v4160_v3 }
 0x7f1   : > { %v4190_v6 = vmul.f32 1.442695, %v4182_v5 }
 0x7f3   : > { %6500 = vpow2.f32 %v4190_v6 }
 0x7f6   : > { %3540 = vrot.lane.b32.xlu1 %v3502_v4, %s6941_s2 }
 0x7fa   : > { %3552 = vrot.lane.b32.xlu1 %v3502_v4, %s6940_s5 }
 0x7fe   : > { %3546 = vrot.lane.b32.xlu0 %v3502_v4, %s6942_s24  ;;  %3542 = vrot.lane.b32.xlu1 %v7715_v21, %s6941_s2  ;;  %s5296_s2 = sshll.u32 %s7452_s7, 4  ;;  %s7922_s2 = int_to_ptr.vmem [resolvable:$true] %s5296_s2 }
 0x7ff   : > { %s6770_s19 = scalar_lea.vmem %s7922_s2, 1024 }
 0x800   : > { %v6501_v8 = vpop.eup %6500  ;;  %p6771_p0 = scmp.ne.s32.totalorder %s7922_s2, %s6770_s19 }
 0x801   : > { %v4206_v9 = vsel %vm1802_vm3, %v6501_v8, 0.0 }
 0x822   : > { %4207 = vadd.xlane.f32.xlu1 %v4206_v9 }
 0x861   : > { %v4163_v10 = vpop.xlane.xlu1 %4162 }
 0x862   : > { %v4183_v11 = vsub.f32 %v4151_v40, %v4163_v10 }
 0x864   : > { %v4192_v15 = vmul.f32 1.442695, %v4183_v11 }
 0x865   : > { %v4166_v16 = vpop.xlane.xlu0 %4165 }
 0x866   : > { %6502 = vpow2.f32 %v4192_v15  ;;  %v4184_v17 = vsub.f32 %v4152_v46, %v4166_v16 }
 0x868   : > { %v4194_v41 = vmul.f32 1.442695, %v4184_v17 }
 0x869   : > { %v4169_v18 = vpop.xlane.xlu0 %4168  ;;  %v4172_v19 = vpop.xlane.xlu1 %4171 }
 0x86a   : > { %6504 = vpow2.f32 %v4194_v41  ;;  %v4185_v20 = vsub.f32 %v4153_v48, %v4169_v18  ;;  %v4186_v22 = vsub.f32 %v4154_v52, %v4172_v19  ;;  %v3259_v19 = vld [vmem:[%s7446_s26 + $0x18] sm:$0xff] }
 0x86c   : > { %v4196_v23 = vmul.f32 1.442695, %v4185_v20  ;;  %v4198_v24 = vmul.f32 1.442695, %v4186_v22  ;;  %v3258_v20 = vld [vmem:[%s7446_s26 + $0x10] sm:$0xff] }
 0x86d   : > { %v4175_v25 = vpop.xlane.xlu0 %4174 }
 0x86e   : > { %6506 = vpow2.f32 %v4196_v23  ;;  %v4187_v26 = vsub.f32 %v4155_v55, %v4175_v25  ;;  %v4178_v27 = vpop.xlane.xlu1 %4177  ;;  %v3257_v23 = vld [vmem:[%s7446_s26 + $0x8] sm:$0xff] }
 0x86f   : > { %6508 = vpow2.f32 %v4198_v24  ;;  %v4188_v28 = vsub.f32 %v4156_v60, %v4178_v27  ;;  %v3256_v24 = vld [vmem:[%s7446_s26] sm:$0xff] }
 0x870   : > { %v4200_v29 = vmul.f32 1.442695, %v4187_v26 }
 0x871   : > { %v4202_v30 = vmul.f32 1.442695, %v4188_v28  ;;  %v4181_v31 = vpop.xlane.xlu0 %4180 }
 0x872   : > { %6510 = vpow2.f32 %v4200_v29  ;;  %v4189_v32 = vsub.f32 %v4157_v62, %v4181_v31  ;;  %v3541_v4 = vpop.permute.xlu1 %3540 }
 0x873   : > { %v6503_v33 = vpop.eup %6502  ;;  %6512 = vpow2.f32 %v4202_v30  ;;  %6248 = vmatpush3.msra.mxu1 %v3541_v4 }
 0x874   : > { %v4204_v34 = vmul.f32 1.442695, %v4189_v32  ;;  %v4209_v35 = vsel %vm1802_vm3, %v6503_v33, 0.0  ;;  %6257 = vmatprep.subr.mxu1 %v6938_v12 }
 0x875   : > { %4210 = vadd.xlane.f32.xlu0 %v4209_v35  ;;  %v3547_v53 = vpop.permute.xlu0 %3546  ;;  %v5844_v35 = vld [vmem:[%s8151_s12] ss:$0 sm:$0xff] }
 0x876   : > { %6514 = vpow2.f32 %v4204_v34  ;;  %v3553_v48 = vpop.permute.xlu1 %3552 }
 0x877   : > { %v6505_v36 = vpop.eup %6504 }
 0x878   : > { %v4212_v37 = vsel %vm1802_vm3, %v6505_v36, 0.0 }
 0x879   : > { %4213 = vadd.xlane.f32.xlu1 %v4212_v37  ;;  %v6548_v37 = vld [vmem:[#allocation13] sm:$0xff] }
 0x87a   : > { %v3543_v49 = vpop.permute.xlu1 %3542 }
 0x87b   : > { %v6507_v38 = vpop.eup %6506 }
 0x87c   : > { %v6509_v39 = vpop.eup %6508  ;;  %v4215_v40 = vsel %vm1802_vm3, %v6507_v38, 0.0 }
 0x87d   : > { %4216 = vadd.xlane.f32.xlu0 %v4215_v40  ;;  %v4218_v42 = vsel %vm1802_vm3, %v6509_v39, 0.0  ;;  %v3191_v40 = vadd.f32 %v7688_v13, %v5844_v35 }
 0x87e   : > { %4219 = vadd.xlane.f32.xlu1 %v4218_v42  ;;  %v6549_v42 = vld [vmem:[#allocation13 + $0x8] sm:$0xff] }
 0x87f   : > { %v7773_v43 = vpop.eup %6510 }
 0x880   : > { %v7775_v44 = vpop.eup %6512  ;;  %v4221_v45 = vsel %vm1802_vm3, %v7773_v43, 0.0 }
 0x881   : > { %4222 = vadd.xlane.f32.xlu0 %v4221_v45  ;;  %v4224_v46 = vsel %vm1802_vm3, %v7775_v44, 0.0 }
 0x882   : > { %4225 = vadd.xlane.f32.xlu1 %v4224_v46 }
 0x883   : > { %v7781_v47 = vpop.eup %6514 }
 0x884   : > { %v4227_v7 = vsel %vm1802_vm3, %v7781_v47, 0.0 }
 0x885   : > { %4228 = vadd.xlane.f32.xlu0 %v4227_v7 }
 0x893   : > { %3554 = vrot.lane.b32.xlu1 %v7715_v21, %s6940_s5 }
 0x89b   : > { %3548 = vrot.lane.b32.xlu0 %v7715_v21, %s6942_s24 }
 0x8ab   : > { %v4208_v50 = vpop.xlane.xlu1 %4207 }
 0x8ac   : > { %6516 = vrcp.f32 %v4208_v50 }
 0x8b9   : > { %v6517_v51 = vpop.eup %6516 }
 0x8ba   : > { %v4231_v52 = vmul.f32 %v6517_v51, %v6501_v8 }
 0x8bc   : > { %6245 = vmatmul.mubr.msk.f32.vlgmr.msra.gmra.mxu0 %vm1802_vm3, %v4231_v52  ;;  %5256 = vst.msk [vmem:[%s7455_s10] sm:$0xff] %vm1802_vm3, %v4231_v52 }
 0x8bd   : > { %6253 = vmatpush3.msra.mxu0 %v3547_v53  ;;  %6254 = vmatprep.mubr.msk.f32.mxu0 %vm6939_vm2, %v6938_v12 }
 0x8be   : > { %6262 = vmatprep.subr.mxu0 %v6938_v12 }
 0x8fe   : > { %v4211_v54 = vpop.xlane.xlu0 %4210 }
 0x8ff   : > { %6518 = vrcp.f32 %v4211_v54 }
 0x902   : > { %v4214_v55 = vpop.xlane.xlu1 %4213 }
 0x903   : > { %6520 = vrcp.f32 %v4214_v55 }
 0x906   : > { %v4217_v56 = vpop.xlane.xlu0 %4216 }
 0x907   : > { %6522 = vrcp.f32 %v4217_v56  ;;  %v4220_v57 = vpop.xlane.xlu1 %4219 }
 0x908   : > { %6524 = vrcp.f32 %v4220_v57 }
 0x90a   : > { %v4223_v58 = vpop.xlane.xlu0 %4222 }
 0x90b   : > { %6526 = vrcp.f32 %v4223_v58  ;;  %v4226_v59 = vpop.xlane.xlu1 %4225 }
 0x90c   : > { %v6519_v60 = vpop.eup %6518  ;;  %6528 = vrcp.f32 %v4226_v59 }
 0x90d   : > { %v4233_v61 = vmul.f32 %v6519_v60, %v6503_v33 }
 0x90e   : > { %v4229_v62 = vpop.xlane.xlu0 %4228 }
 0x90f   : > { %6530 = vrcp.f32 %v4229_v62  ;;  %6250 = vmatmul.mubr.msk.f32.vlgmr.msra.gmra.mxu1 %vm1802_vm3, %v4233_v61  ;;  %5257 = vst.msk [vmem:[%s7455_s10 + $0x8] sm:$0xff] %vm1802_vm3, %v4233_v61  ;;  %v3555_v11 = vpop.permute.xlu1 %3554 }
 0x910   : > { %v6521_v63 = vpop.eup %6520  ;;  %6258 = vmatpush3.msra.mxu1 %v3553_v48  ;;  %6259 = vmatprep.mubr.msk.f32.mxu1 %vm6939_vm2, %v6938_v12 }
 0x911   : > { %v4235_v0 = vmul.f32 %v6521_v63, %v6505_v36  ;;  %6267 = vmatprep.subr.mxu1 %v6938_v12  ;;  %v3186_v36 = vadd.f32 %v5844_v35, %v7690_v14 }
 0x912   : > { %v3549_v8 = vpop.permute.xlu0 %3548 }
 0x913   : > { %6255 = vmatmul.mubr.msk.f32.vlgmr.msra.gmra.mxu0 %vm1802_vm3, %v4235_v0  ;;  %5258 = vst.msk [vmem:[%s7455_s10 + $0x10] sm:$0xff] %vm1802_vm3, %v4235_v0 }
 0x914   : > { %v6523_v1 = vpop.eup %6522  ;;  %6263 = vmatpush3.msra.mxu0 %v7715_v21  ;;  %6264 = vmatprep.mubr.msk.f32.mxu0 %vm6939_vm2, %v6938_v12 }
 0x915   : > { %v6525_v2 = vpop.eup %6524  ;;  %6272 = vmatprep.subr.mxu0 %v6938_v12  ;;  %v4237_v3 = vmul.f32 %v6523_v1, %v6507_v38  ;;  %v3194_v38 = vadd.f32 %v6548_v37, %v3186_v36  ;;  %v4996_v37 = vld [vmem:[%s7449_s8 + $0x18] sm:$0xff] }
 0x916   : > { %v4239_v5 = vmul.f32 %v6525_v2, %v6509_v39 }
 0x917   : > { %6260 = vmatmul.mubr.msk.f32.vlgmr.msra.gmra.mxu1 %vm1802_vm3, %v4237_v3  ;;  %5259 = vst.msk [vmem:[%s7455_s10 + $0x18] sm:$0xff] %vm1802_vm3, %v4237_v3  ;;  %v3198_v39 = vsel %vm1510_vm1, %v3194_v38, 0.0 }
 0x918   : > { %v6527_v6 = vpop.eup %6526  ;;  %6265 = vmatmul.mubr.msk.f32.vlgmr.msra.gmra.mxu0 %vm1802_vm3, %v4239_v5  ;;  %5260 = vst.msk [vmem:[%s7455_s10 + $0x20] sm:$0xff] %vm1802_vm3, %v4239_v5  ;;  %6268 = vmatpush3.msra.mxu1 %v3543_v49 }
 0x919   : > { %v6529_v21 = vpop.eup %6528  ;;  %6273 = vmatpush3.msra.mxu0 %v3549_v8  ;;  %6269 = vmatprep.mubr.msk.f32.mxu1 %vm6939_vm2, %v6938_v12  ;;  %v4241_v9 = vmul.f32 %v6527_v6, %v7773_v43  ;;  %v3195_v43 = vadd.f32 %v6549_v42, %v3191_v40  ;;  %v4993_v40 = vld [vmem:[%s7449_s8] sm:$0xff] }
 0x91a   : > { %6277 = vmatprep.subr.mxu1 %v6938_v12  ;;  %6274 = vmatprep.mubr.msk.f32.mxu0 %vm6939_vm2, %v6938_v12  ;;  %v4243_v10 = vmul.f32 %v6529_v21, %v7775_v44  ;;  %v5847_v21 = vld [vmem:[%s1432_s14] ss:$0 sm:$0xff] }
 0x91b   : > { %6270 = vmatmul.mubr.msk.f32.vlgmr.msra.gmra.mxu1 %vm1802_vm3, %v4241_v9  ;;  %5261 = vst.msk [vmem:[%s7455_s10 + $0x28] sm:$0xff] %vm1802_vm3, %v4241_v9  ;;  %6282 = vmatprep.subr.mxu0 %v3259_v19  ;;  %v3201_v44 = vsel %vm1510_vm1, %v3195_v43, 0.0 }
 0x91c   : > { %v6531_v15 = vpop.eup %6530  ;;  %6278 = vmatpush3.msra.mxu1 %v3555_v11  ;;  %6275 = vmatmul.mubr.msk.f32.vlgmr.msra.gmra.mxu0 %vm1802_vm3, %v4243_v10  ;;  %5262 = vst.msk [vmem:[%s7455_s10 + $0x30] sm:$0xff] %vm1802_vm3, %v4243_v10 }
 0x91d   : > { %6279 = vmatprep.mubr.msk.f32.mxu1 %vm6939_vm2, %v6938_v12  ;;  %v4245_v16 = vmul.f32 %v6531_v15, %v7781_v47  ;;  %6283 = vmatpush3.msra.mxu0 %v3259_v19  ;;  %v5848_v15 = vld [vmem:[%s1435_s13] ss:$0 sm:$0xff] }
 0x91e   : > { %6284 = vmatprep.subr.mxu0 %v3258_v20  ;;  %6293 = vmatprep.subr.mxu1 %v4996_v37 }
 0x91f   : > { %6280 = vmatmul.mubr.msk.f32.vlgmr.msra.gmra.mxu1 %vm1802_vm3, %v4245_v16  ;;  %5263 = vst.msk [vmem:[%s7455_s10 + $0x38] sm:$0xff] %vm1802_vm3, %v4245_v16  ;;  %6285 = vmatpush3.msra.mxu0 %v3258_v20 }
 0x920   : > { %6286 = vmatprep.subr.mxu0 %v3257_v23  ;;  %6294 = vmatpush3.msra.mxu1 %v4996_v37 }
 0x921   : > { %6287 = vmatpush3.msra.mxu0 %v3257_v23 }
 0x922   : > { %6288 = vmatprep.subr.mxu0 %v3256_v24 }
 0x923   : > { %6289 = vmatpush3.msra.mxu0 %v3256_v24 }
 0x97c   : > { %v4315_v17 = vpop.f32.mrf.mxu0 }
 0x97e   : > { %v6246_v41 = vpop.f32.mrf.mxu0 }
 0x9cf   : > { %v4388_v18 = vpop.f32.mrf.mxu1 }
 0x9d0   : > { %4832 = vrot.lane.b32.xlu0 %v4388_v18, %s6943_s6 }
 0x9d1   : > { %v6251_v22 = vpop.f32.mrf.mxu1 }
 0x9d3   : > { %v4461_v12 = vpop.f32.mrf.mxu0 }
 0x9d4   : > { %4840 = vrot.lane.b32.xlu0 %v4461_v12, %s6944_s1 }
 0x9d5   : > { %v6256_v25 = vpop.f32.mrf.mxu0 }
 0x9d7   : > { %v4534_v26 = vpop.f32.mrf.mxu1 }
 0x9d8   : > { %v4607_v27 = vpop.f32.mrf.mxu0  ;;  %4848 = vrot.lane.b32.xlu0 %v4534_v26, %s6945_s18 }
 0x9d9   : > { %v6261_v28 = vpop.f32.mrf.mxu1 }
 0x9da   : > { %v6266_v29 = vpop.f32.mrf.mxu0 }
 0x9db   : > { %v4680_v30 = vpop.f32.mrf.mxu1 }
 0x9dc   : > { %4834 = vrot.lane.b32.xlu1 %v4680_v30, %s6943_s6  ;;  %v4753_v31 = vpop.f32.mrf.mxu0 }
 0x9dd   : > { %v6271_v32 = vpop.f32.mrf.mxu1 }
 0x9de   : > { %v6276_v4 = vpop.f32.mrf.mxu0 }
 0x9df   : > { %v4826_v33 = vpop.f32.mrf.mxu1 }
 0x9e0   : > { %4842 = vrot.lane.b32.xlu1 %v4753_v31, %s6944_s1  ;;  %s6774_s1 = sshll.u32 %s6946_s30, 4  ;;  %s6775_s1 = int_to_ptr.vmem [resolvable:$false] %s6774_s1 }
 0x9e1   : > { %v6281_v34 = vpop.f32.mrf.mxu1  ;;  %s6776_s7 = scalar_lea.vmem %s6775_s1, 2048  ;;  %p6777_p12 = scmp.lt.s32.totalorder %s7922_s2, %s6775_s1 }
 0x9e2   : > { %p6778_p1 = scmp.lt.s32.totalorder %s6776_s7, %s6770_s19 }
 0x9e4   : > { %4850 = vrot.lane.b32.xlu1 %v4826_v33, %s6945_s18  ;;  %p6779_p7 = por %p6778_p1, %p6777_p12 }
 0x9f7   : > { %3199 = vadd.xlane.f32.xlu0 %v3198_v39  ;;  %v4994_v39 = vld [vmem:[%s7449_s8 + $0x8] sm:$0xff] }
 0xa08   : > { %3202 = vadd.xlane.f32.xlu1 %v3201_v44 }
 0xa42   : > { %v4833_v45 = vpop.permute.xlu0 %4832 }
 0xa43   : > { %v4854_v47 = vsel %vm1802_vm3, %v4315_v17, %v4833_v45  ;;  %v5882_v17 = vld [vmem:[%s1447_s25] ss:$0 sm:$0xff] }
 0xa46   : > { %v4841_v46 = vpop.permute.xlu0 %4840 }
 0xa47   : > { %v4856_v7 = vsel %vm3101_vm4, %v4854_v47, %v4841_v46 }
 0xa4a   : > { %v4849_v48 = vpop.permute.xlu0 %4848 }
 0xa4b   : > { %v4858_v14 = vsel %vm3104_vm5, %v4856_v7, %v4849_v48  ;;  %v5885_v7 = vld [vmem:[%s1450_s23] ss:$0 sm:$0xff] }
 0xa4c   : > { %6290 = vmatprep.mubr.msk.f32.mxu0 %vm1510_vm1, %v4858_v14 }
 0xa4e   : > { %v4835_v49 = vpop.permute.xlu1 %4834 }
 0xa4f   : > { %v4855_v13 = vsel %vm1802_vm3, %v4607_v27, %v4835_v49  ;;  %v5886_v49 = vld [vmem:[%s1453_s29] ss:$0 sm:$0xff] }
 0xa52   : > { %v4843_v50 = vpop.permute.xlu1 %4842 }
 0xa53   : > { %v4857_v51 = vsel %vm3101_vm4, %v4855_v13, %v4843_v50 }
 0xa56   : > { %v4851_v52 = vpop.permute.xlu1 %4850 }
 0xa57   : > { %v4859_v53 = vsel %vm3104_vm5, %v4857_v51, %v4851_v52 }
 0xa58   : > { %6291 = vmatmul.mubr.msk.f32.vlgmr.msra.gmra.mxu0 %vm1510_vm1, %v4859_v53 }
 0xa80   : > { %v3200_v54 = vpop.xlane.xlu0 %3199 }
 0xa81   : > { %v3205_v55 = vmul.f32 0.03125, %v3200_v54 }
 0xa83   : > { %v3207_v56 = vsub.f32 %v3194_v38, %v3205_v55  ;;  %v4995_v38 = vld [vmem:[%s7449_s8 + $0x10] sm:$0xff]  ;;  %v5110_v55 = vld [vmem:[%s7428_s16 + $0x38] sm:$0xff] }
 0xa84   : > { %6295 = vmatprep.subr.mxu1 %v4995_v38  ;;  %6304 = vmatprep.subr.mxu0 %v5110_v55 }
 0xa85   : > { %v3209_v57 = vmul.f32 %v3207_v56, %v3207_v56  ;;  %6296 = vmatpush3.msra.mxu1 %v4995_v38  ;;  %6305 = vmatpush3.msra.mxu0 %v5110_v55 }
 0xa86   : > { %6297 = vmatprep.subr.mxu1 %v4994_v39 }
 0xa87   : > { %v3211_v58 = vsel %vm1510_vm1, %v3209_v57, 0.0  ;;  %6298 = vmatpush3.msra.mxu1 %v4994_v39  ;;  %v5108_v57 = vld [vmem:[%s7428_s16 + $0x28] sm:$0xff] }
 0xa88   : > { %3212 = vadd.xlane.f32.xlu0 %v3211_v58  ;;  %6299 = vmatprep.subr.mxu1 %v4993_v40  ;;  %v5107_v58 = vld [vmem:[%s7428_s16 + $0x20] sm:$0xff] }
 0xa89   : > { %6300 = vmatpush3.msra.mxu1 %v4993_v40 }
 0xa91   : > { %v3203_v59 = vpop.xlane.xlu1 %3202 }
 0xa92   : > { %v3206_v60 = vmul.f32 0.03125, %v3203_v59  ;;  %v5106_v59 = vld [vmem:[%s7428_s16 + $0x18] sm:$0xff] }
 0xa94   : > { %v3208_v61 = vsub.f32 %v3195_v43, %v3206_v60  ;;  %v5105_v60 = vld [vmem:[%s7428_s16 + $0x10] sm:$0xff] }
 0xa96   : > { %v3210_v62 = vmul.f32 %v3208_v61, %v3208_v61 }
 0xa98   : > { %v3214_v63 = vsel %vm1510_vm1, %v3210_v62, 0.0  ;;  %v5103_v62 = vld [vmem:[%s7428_s16] sm:$0xff] }
 0xa99   : > { %3215 = vadd.xlane.f32.xlu0 %v3214_v63  ;;  %v5887_v63 = vld [vmem:[%s1456_s27] ss:$0 sm:$0xff]  ;;  %s8159_s27 = sld [smem:[#allocation56_spill]] }
 0xa9f   : > { %s5915_s8 = sshll.u32 %s8159_s27, 10  ;;  %s8163_s24 = sand.u32 1, %s8159_s27  }
 0xaa0   : > { %s7926_s22 = scalar_lea.sflag [#allocation15], %s8163_s24 }
 0xb11   : > { %v3213_v0 = vpop.xlane.xlu0 %3212 }
 0xb12   : > { %v3217_v1 = vmul.f32 0.03125, %v3213_v0 }
 0xb14   : > { %v3219_v2 = vadd.f32 1e-06, %v3217_v1 }
 0xb16   : > { %6532 = vrsqrt.f32 %v3219_v2 }
 0xb18   : > { %v6292_v3 = vpop.f32.mrf.mxu0 }
 0xb19   : > { %v4944_v24 = vadd.f32 %v6292_v3, %v5882_v17 }
 0xb1a   : > { %v4938_v10 = vpop.f32.mrf.mxu0 }
 0xb1b   : > { %v4939_v41 = vadd.f32 %v5882_v17, %v4938_v10 }
 0xb22   : > { %v3216_v5 = vpop.xlane.xlu0 %3215 }
 0xb23   : > { %v6533_v6 = vpop.eup %6532  ;;  %v3218_v8 = vmul.f32 0.03125, %v3216_v5 }
 0xb24   : > { %v3223_v9 = vmul.f32 %v6533_v6, %v3207_v56  ;;  %v5109_v56 = vld [vmem:[%s7428_s16 + $0x30] sm:$0xff] }
 0xb25   : > { %v3220_v11 = vadd.f32 1e-06, %v3218_v8  ;;  %6306 = vmatprep.subr.mxu0 %v5109_v56 }
 0xb26   : > { %v3231_v16 = vmul.f32 %v5847_v21, %v3223_v9  ;;  %6307 = vmatpush3.msra.mxu0 %v5109_v56 }
 0xb27   : > { %6534 = vrsqrt.f32 %v3220_v11  ;;  %6308 = vmatprep.subr.mxu0 %v5108_v57 }
 0xb28   : > { %v3239_v18 = vadd.f32 %v5848_v15, %v3231_v16  ;;  %6309 = vmatpush3.msra.mxu0 %v5108_v57 }
 0xb29   : > { %6310 = vmatprep.subr.mxu0 %v5107_v58 }
 0xb2a   : > { %v4947_v19 = vadd.f32 %v4939_v41, %v3239_v18  ;;  %6311 = vmatpush3.msra.mxu0 %v5107_v58 }
 0xb2b   : > { %6312 = vmatprep.subr.mxu0 %v5106_v59 }
 0xb2c   : > { %v4951_v20 = vsel %vm1510_vm1, %v4947_v19, 0.0  ;;  %6313 = vmatpush3.msra.mxu0 %v5106_v59 }
 0xb2d   : > { %4952 = vadd.xlane.f32.xlu1 %v4951_v20  ;;  %6314 = vmatprep.subr.mxu0 %v5105_v60 }
 0xb2e   : > { %6315 = vmatpush3.msra.mxu0 %v5105_v60 }
 0xb34   : > { %v6535_v22 = vpop.eup %6534 }
 0xb35   : > { %v3224_v12 = vmul.f32 %v6535_v22, %v3208_v61  ;;  %v5104_v61 = vld [vmem:[%s7428_s16 + $0x8] sm:$0xff]  ;;  %s8160_s16 = sld [smem:[#allocation51_spill]] }
 0xb36   : > { %6316 = vmatprep.subr.mxu0 %v5104_v61 }
 0xb37   : > { %v3232_v23 = vmul.f32 %v5847_v21, %v3224_v12  ;;  %6317 = vmatpush3.msra.mxu0 %v5104_v61 }
 0xb38   : > { %6318 = vmatprep.subr.mxu0 %v5103_v62 }
 0xb39   : > { %v3240_v25 = vadd.f32 %v5848_v15, %v3232_v23  ;;  %6319 = vmatpush3.msra.mxu0 %v5103_v62 }
 0xb3b   : > { %v4948_v26 = vadd.f32 %v4944_v24, %v3240_v25  ;;  %v5890_v25 = vld [vmem:[%s1464_s9] ss:$0 sm:$0xff]  ;;  %s8161_s23 = smov %s8160_s16  ;;  %s8162_s9 = sld [smem:[#allocation59_spill]] }
 0xb3c   : > { %s7920_s15 = scalar_lea.hbm %s8160_s16, %s5915_s8 }
 0xb3d   : > { %v4954_v27 = vsel %vm1510_vm1, %v4948_v26, 0.0 }
 0xb3e   : > { %4955 = vadd.xlane.f32.xlu0 %v4954_v27 }
 0xb41   : > { %p8164_p2 = scmp.ne.s32.totalorder %s8162_s9, 0 }
 0xb43   : > { %p6772_p3 = pnand %p6771_p0, %p8164_p2 }
 0xb45   : > { %p6773_p9 = pneg %p6772_p3 }
 0xb47   : > { %p6780_p8 = pnand %p6779_p7, %p6773_p9 }
 0xbb6   : > { %v4953_v28 = vpop.xlane.xlu1 %4952 }
 0xbb7   : > { %v4957_v29 = vmul.f32 0.03125, %v4953_v28 }
 0xbb9   : > { %v4959_v30 = vsub.f32 %v4947_v19, %v4957_v29 }
 0xbbb   : > { %v4961_v31 = vmul.f32 %v4959_v30, %v4959_v30 }
 0xbbd   : > { %v4963_v32 = vsel %vm1510_vm1, %v4961_v31, 0.0 }
 0xbbe   : > { %4964 = vadd.xlane.f32.xlu1 %v4963_v32 }
 0xbc7   : > { %v4956_v4 = vpop.xlane.xlu0 %4955 }
 0xbc8   : > { %v4958_v33 = vmul.f32 0.03125, %v4956_v4 }
 0xbca   : > { %v4960_v34 = vsub.f32 %v4948_v26, %v4958_v33 }
 0xbcc   : > { %v4962_v35 = vmul.f32 %v4960_v34, %v4960_v34 }
 0xbce   : > { %v4966_v36 = vsel %vm1510_vm1, %v4962_v35, 0.0 }
 0xbcf   : > { %4967 = vadd.xlane.f32.xlu0 %v4966_v36 }
 0xc47   : > { %v4965_v42 = vpop.xlane.xlu1 %4964 }
 0xc48   : > { %v4969_v43 = vmul.f32 0.03125, %v4965_v42 }
 0xc4a   : > { %v4971_v44 = vadd.f32 1e-06, %v4969_v43 }
 0xc4c   : > { %6536 = vrsqrt.f32 %v4971_v44 }
 0xc58   : > { %v4968_v45 = vpop.xlane.xlu0 %4967 }
 0xc59   : > { %v6537_v46 = vpop.eup %6536  ;;  %v4970_v47 = vmul.f32 0.03125, %v4968_v45 }
 0xc5a   : > { %v4975_v48 = vmul.f32 %v6537_v46, %v4959_v30 }
 0xc5b   : > { %v4972_v14 = vadd.f32 1e-06, %v4970_v47 }
 0xc5c   : > { %v4983_v50 = vmul.f32 %v5885_v7, %v4975_v48 }
 0xc5d   : > { %6538 = vrsqrt.f32 %v4972_v14 }
 0xc5e   : > { %v7883_v13 = vadd.f32 %v5886_v49, %v4983_v50 }
 0xc60   : > { %6301 = vmatprep.mubr.msk.f32.mxu1 %vm1510_vm1, %v7883_v13 }
 0xc6a   : > { %v6539_v51 = vpop.eup %6538 }
 0xc6b   : > { %v4976_v52 = vmul.f32 %v6539_v51, %v4960_v34 }
 0xc6d   : > { %v4984_v53 = vmul.f32 %v5885_v7, %v4976_v52 }
 0xc6f   : > { %v4992_v54 = vadd.f32 %v5886_v49, %v4984_v53 }
 0xc71   : > { %6302 = vmatmul.mubr.msk.f32.vlgmr.msra.gmra.mxu1 %vm1510_vm1, %v4992_v54 }
 0xd31   : > { %v6303_v0 = vpop.f32.mrf.mxu1 }
 0xd32   : > { %v5082_v1 = vadd.f32 %v6303_v0, %v5887_v63 }
 0xd33   : > { %v5076_v2 = vpop.f32.mrf.mxu1 }
 0xd34   : > { %v5088_v3 = vmul.f32 %v5082_v1, %v5082_v1  ;;  %v5077_v5 = vadd.f32 %v5887_v63, %v5076_v2  ;;  %v5086_v12 = vmul.f32 0.5, %v5082_v1 }
 0xd36   : > { %v5090_v6 = vmul.f32 %v5088_v3, %v5082_v1  ;;  %v5087_v8 = vmul.f32 %v5077_v5, %v5077_v5  ;;  %v5085_v20 = vmul.f32 0.5, %v5077_v5 }
 0xd38   : > { %v5092_v21 = vmul.f32 0.044715, %v5090_v6  ;;  %v5089_v9 = vmul.f32 %v5087_v8, %v5077_v5 }
 0xd3a   : > { %v5094_v10 = vadd.f32 %v5092_v21, %v5082_v1  ;;  %v5091_v11 = vmul.f32 0.044715, %v5089_v9 }
 0xd3c   : > { %v5096_v15 = vmul.f32 0.7978846, %v5094_v10  ;;  %v5093_v16 = vadd.f32 %v5091_v11, %v5077_v5 }
 0xd3e   : > { %6540 = vtanh.f32 %v5096_v15  ;;  %v5095_v17 = vmul.f32 0.7978846, %v5093_v16 }
 0xd40   : > { %6542 = vtanh.f32 %v5095_v17 }
 0xd4b   : > { %v6541_v41 = vpop.eup %6540 }
 0xd4c   : > { %v5100_v19 = vadd.f32 1.0, %v6541_v41 }
 0xd4d   : > { %v6543_v18 = vpop.eup %6542 }
 0xd4e   : > { %v5099_v22 = vadd.f32 1.0, %v6543_v18  ;;  %v5102_v24 = vmul.f32 %v5100_v19, %v5086_v12 }
 0xd50   : > { %v5101_v23 = vmul.f32 %v5099_v22, %v5085_v20 }
 0xd52   : > { %6320 = vmatprep.mubr.msk.f32.mxu0 %vm5118_vm6, %v5101_v23 }
 0xd53   : > { %6321 = vmatmul.mubr.msk.f32.vlgmr.msra.gmra.mxu0 %vm5118_vm6, %v5102_v24 }
 0xe13   : > { %v6322_v26 = vpop.f32.mrf.mxu0 }
 0xe14   : > { %v5197_v27 = vadd.f32 %v6322_v26, %v5890_v25 }
 0xe15   : > { %v5191_v28 = vpop.f32.mrf.mxu0 }
 0xe16   : > { %v5192_v29 = vadd.f32 %v5890_v25, %v5191_v28  ;;  %v5201_v30 = vadd.f32 %v5197_v27, %v4992_v54 }
 0xe18   : > { %v5207_v31 = vsel %vm1510_vm1, %v5201_v30, 0.0  ;;  %v5200_v32 = vadd.f32 %v5192_v29, %v7883_v13 }
 0xe19   : > { %5208 = vadd.xlane.f32.xlu0 %v5207_v31 }
 0xe1a   : > { %v5204_v4 = vsel %vm1510_vm1, %v5200_v32, 0.0 }
 0xe1b   : > { %5205 = vadd.xlane.f32.xlu1 %v5204_v4 }
 0xea2   : > { %v5209_v33 = vpop.xlane.xlu0 %5208 }
 0xea3   : > { %v5211_v34 = vmul.f32 0.03125, %v5209_v33 }
 0xea4   : > { %v5206_v35 = vpop.xlane.xlu1 %5205 }
 0xea5   : > { %v7905_v36 = vsub.f32 %v5201_v30, %v5211_v34  ;;  %v5210_v37 = vmul.f32 0.03125, %v5206_v35 }
 0xea7   : > { %v7907_v38 = vsub.f32 %v5200_v32, %v5210_v37  ;;  %v5215_v39 = vmul.f32 %v7905_v36, %v7905_v36 }
 0xea9   : > { %v5219_v40 = vsel %vm1510_vm1, %v5215_v39, 0.0  ;;  %v5214_v42 = vmul.f32 %v7907_v38, %v7907_v38 }
 0xeaa   : > { %5220 = vadd.xlane.f32.xlu0 %v5219_v40 }
 0xeab   : > { %v5216_v43 = vsel %vm1510_vm1, %v5214_v42, 0.0 }
 0xeac   : > { %5217 = vadd.xlane.f32.xlu1 %v5216_v43 }
 0xead   : > { %6783 = shalt.err (!%p6780_p8)
}
 0xeae   : > { %s6784_s18 = scalar_lea.hbm %s7920_s15, 1024  ;;  %s6788_s28 = scalar_lea.hbm %s8161_s23, 2048 }
 0xeaf   : > { %p6785_p10 = scmp.ne.s32.totalorder %s7920_s15, %s6784_s18  ;;  %p6789_p6 = scmp.lt.s32.totalorder %s7920_s15, %s8161_s23 }
 0xeb0   : > { %p6790_p4 = scmp.lt.s32.totalorder %s6788_s28, %s6784_s18 }
 0xeb1   : > { %p6786_p5 = pnand %p6785_p10, %p8164_p2 }
 0xeb2   : > { %p6791_p13 = por %p6790_p4, %p6789_p6 }
 0xeb3   : > { %p6787_p11 = pneg %p6786_p5 }
 0xeb5   : > { %p6792_p0 = pnand %p6791_p13, %p6787_p11 }
 0xeb7   : > { %6795 = shalt.err (!%p6792_p0)
}
 0xeb8   : > { %s6947_s20 = smov 128   ;;  %s8165_s17 = sld [smem:[#allocation52_spill]] }
 0xeb9   : > { %6345 = dma.vmem_to_hbm [thread:$0]  (%p8164_p2), %s7922_s2, 1024, %s7920_s15, %s7926_s22, %s6947_s20, %s6947_s20, %s6943_s6  }
 0xeba   : > { %s5312_s12 = sshll.u32 %s7455_s10, 4  ;;  %s6948_s26 = smov [#allocation16]   ;;  %s5313_s12 = int_to_ptr.vmem [resolvable:$true] %s5312_s12 }
 0xebb   : > { %s6796_s4 = scalar_lea.vmem %s5313_s12, 1024  ;;  %s6800_s5 = sshll.u32 %s6948_s26, 4  ;;  %s6801_s5 = int_to_ptr.vmem [resolvable:$false] %s6800_s5 }
 0xebc   : > { %p6797_p3 = scmp.ne.s32.totalorder %s5313_s12, %s6796_s4  ;;  %s6802_s13 = scalar_lea.vmem %s6801_s5, 2048 }
 0xebd   : > { %p6803_p1 = scmp.lt.s32.totalorder %s5313_s12, %s6801_s5  ;;  %p6804_p7 = scmp.lt.s32.totalorder %s6802_s13, %s6796_s4 }
 0xebe   : > { %s7951_s21 = scalar_lea.hbm %s8165_s17, %s5915_s8  ;;  %p6798_p9 = pnand %p6797_p3, %p8164_p2 }
 0xebf   : > { %p6805_p8 = por %p6804_p7, %p6803_p1 }
 0xec0   : > { %p6799_p12 = pneg %p6798_p9 }
 0xec2   : > { %p6806_p10 = pnand %p6805_p8, %p6799_p12 }
 0xec4   : > { %6809 = shalt.err (!%p6806_p10)
}
 0xec5   : > { %s6810_s10 = scalar_lea.hbm %s7951_s21, 1024  ;;  %s6814_s25 = scalar_lea.hbm %s8165_s17, 2048 }
 0xec6   : > { %p6811_p5 = scmp.ne.s32.totalorder %s7951_s21, %s6810_s10  ;;  %p6815_p4 = scmp.lt.s32.totalorder %s7951_s21, %s8165_s17 }
 0xec7   : > { %p6816_p13 = scmp.lt.s32.totalorder %s6814_s25, %s6810_s10 }
 0xec8   : > { %p6812_p11 = pnand %p6811_p5, %p8164_p2 }
 0xec9   : > { %p6817_p0 = por %p6816_p13, %p6815_p4 }
 0xeca   : > { %p6813_p6 = pneg %p6812_p11 }
 0xecc   : > { %p6818_p3 = pnand %p6817_p0, %p6813_p6 }
 0xece   : > { %6821 = shalt.err (!%p6818_p3)
}
 0xecf   : > { %6346 = dma.vmem_to_hbm [thread:$0]  (%p8164_p2), %s5313_s12, 1024, %s7951_s21, %s7926_s22, %s6947_s20, %s6947_s20, %s6943_s6  }
 0xed0   : > { %v5893_v49 = vld [vmem:[%s1467_s3] ss:$0 sm:$0xff]  ;;  %s6949_s16 = smov [#allocation13]   ;;  %p8168_p9 = scmp.eq.s32.totalorder %s8159_s27, 1 }
 0xed1   : > { %v5894_v51 = vld [vmem:[%s1470_s0] ss:$0 sm:$0xff]  ;;  %s5280_s9 = sshll.u32 %s6949_s16, 4  ;;  %s5281_s9 = int_to_ptr.vmem [resolvable:$true] %s5280_s9 }
 0xed2   : > { %s6822_s3 = scalar_lea.vmem %s5281_s9, 256  ;;  %p6829_p7 = scmp.lt.s32.totalorder %s5281_s9, %s5281_s9 }
 0xed3   : > { %p6823_p2 = scmp.ne.s32.totalorder %s5281_s9, %s6822_s3  ;;  %p6830_p8 = scmp.lt.s32.totalorder %s6822_s3, %s6822_s3 }
 0xed5   : > { %p6824_p12 = pnand %p6823_p2, %p8168_p9  ;;  %p6831_p10 = por %p6830_p8, %p6829_p7 }
 0xed7   : > { %p6825_p1 = pneg %p6824_p12 }
 0xed9   : > { %p6832_p5 = pnand %p6831_p10, %p6825_p1 }
 0xf33   : > { %v5221_v44 = vpop.xlane.xlu0 %5220 }
 0xf34   : > { %v5223_v45 = vmul.f32 0.03125, %v5221_v44 }
 0xf35   : > { %v5218_v46 = vpop.xlane.xlu1 %5217 }
 0xf36   : > { %v5225_v47 = vadd.f32 1e-06, %v5223_v45  ;;  %v5222_v7 = vmul.f32 0.03125, %v5218_v46 }
 0xf38   : > { %6544 = vrsqrt.f32 %v5225_v47  ;;  %v5224_v48 = vadd.f32 1e-06, %v5222_v7 }
 0xf3a   : > { %6546 = vrsqrt.f32 %v5224_v48 }
 0xf45   : > { %v6545_v14 = vpop.eup %6544 }
 0xf46   : > { %v5229_v50 = vmul.f32 %v6545_v14, %v7905_v36 }
 0xf47   : > { %v6547_v13 = vpop.eup %6546 }
 0xf48   : > { %v5228_v52 = vmul.f32 %v6547_v13, %v7907_v38  ;;  %v5237_v53 = vmul.f32 %v5893_v49, %v5229_v50 }
 0xf4a   : > { %v5236_v54 = vmul.f32 %v5893_v49, %v5228_v52  ;;  %v5245_v55 = vadd.f32 %v5894_v51, %v5237_v53 }
 0xf4c   : > { %v5244_v56 = vadd.f32 %v5894_v51, %v5236_v54  ;;  %5247 = vst.msk [vmem:[#allocation13 + $0x8] sm:$0xff] %vm1510_vm1, %v5245_v55 }
 0xf4e   : > { %5246 = vst.msk [vmem:[#allocation13] sm:$0xff] %vm1510_vm1, %v5244_v56 }
 0xf4f   : > { %6835 = shalt.err (!%p6832_p5)
}
 0xf50   : > { %p8169_p11 = pmov %p8168_p9  ;;  %s8170_s0 = sld [smem:[#allocation50_spill]] }
 0xf51   : > { %p8171_p6 = pmov %p8168_p9 }
 0xf56   : > { %6344 = dma.vmem_to_hbm [thread:$0]  (%p8169_p11), %s5281_s9, 256, %s8170_s0, [#allocation4], %s6947_s20, %s6947_s20, %s6943_s6  }
 0xf57   : > { %6875 = dma.done.wait (%p8171_p6), [#allocation4], 256   ;;  %p8172_p4 = pmov %p8171_p6 }
 0xf59   : > { %6877 = vsyncadd (%p8172_p4), [#allocation4], 4294967040 }
 0xf5a PF: > { %s8173_s11 = sld [smem:[#allocation55_spill]] }
 0xf5b   : > { %s8175_s2 = sld [smem:[#allocation60_spill]] }
 0xf60   : > { %s8174_s8 = sadd.s32 4294967294, %s8173_s11   ;;  %p8177_p0 = scmp.ge.s32.totalorder %s8173_s11, 2 }
 0xf61   : > { %s5331_s15 = sand.u32 1, %s8174_s8   ;;  %p8176_p13 = scmp.ne.s32.totalorder %s8175_s2, 0 }
 0xf62   : > { %s5332_s24 = scalar_lea.sflag [#allocation15], %s5331_s15 }
 0xf63   : > { %p6378_p3 = pnand %p8177_p0, %p8176_p13 }
 0xf65   : > { %p6379_p2 = pneg %p6378_p3 }
 0xf67   : > { %6879 = dma.done.wait (%p6379_p2), %s5332_s24, 2048  }
 0xf68   : > { %6881 = vsyncadd (%p6379_p2), %s5332_s24, 4294965248  ;;  %s8178_s22 = sld [smem:[#allocation57_spill]] }
 0xf69   : > { %s8179_s15 = sld [smem:[#allocation53_spill]] }
 0xf6a   : > { %s8180_s16 = sld [smem:[#allocation54_spill]] }
 0xf6b   : > { %s8181_s18 = sld [smem:[#allocation58_spill]] }
 0xf6e   : > { %p75_p9 = scmp.ge.s32.totalorder %s8178_s22, 4  }
 0xf70   :  { %77 = sbr.rel (!%p75_p9) target bundleno = 72 (0x48), region = 357 }
 0xf75   :  { %5346 = vsyncpa [#allocation3], 1 }
 0xf76   :  { %5348 = vsyncpa [#allocation3 + $0x1], 1 }
 0xf77   :  { %5349 = vsyncpa [#allocation6], 1 }
 0xf78   :  { %5350 = vsyncpa [#allocation4], 1 }
 0xf79   :  { %5352 = vsyncpa [#allocation4 + $0x1], 1 }
 0xf7a   :  { %5353 = vsyncpa [#allocation15], 1 }
 0xf7b   :  { %5355 = vsyncpa [#allocation15 + $0x1], 1 }

</bundles_post_ra>
